<compile_context>
chip_gen: v7x
topology: tpu7x:2x2x1
jax: 0.10.0
libtpu: 0.0.40
codegen_flags: <defaults>
</compile_context>

<pallas_src>
import functools

import jax
import jax.numpy as jnp
from jax.experimental import pallas as pl
from jax.experimental.pallas import tpu as pltpu


# ----------------------------- Pallas kernel -------------------------------

def _bottleneck_kernel(x_ref, w1_ref, s1_ref, b1_ref,
                       w2_ref, s2_ref, b2_ref,
                       w3_ref, s3_ref, b3_ref, *rest,
                       H, W, Wp, HALO, M2, Ho, Wo, stride, has_downsample):
    """Fused Bottleneck forward for one image.

    x_ref  : (1, H*W, Cin_p) bf16   NHWC-flattened, lane-padded, NO spatial halo
    w1     : (Cin_p, Pp)     bf16   1x1 conv
    w2     : (9*Pp, Pp)      bf16   3x3 conv, tap-major stacked along K
    w3     : (Pp, Cout_p)    bf16   1x1 conv (1/stride^2 avg factor folded in)
    pw     : (Wo, W)         bf16   0/1 column-pool selection (only stride > 1)
    wd     : (Cin_p, Cout_p) bf16   downsample 1x1 conv (1/stride^2 folded in)
    s*/b*  : (1, C)          f32    folded BatchNorm scale / bias
    o_ref  : (1, Ho*Wo, Cout_p) bf16
    hbuf   : (R, Pp)         bf16   scratch holding the spatially haloed conv1
                                    activation (zero ring + zero guard rows so
                                    every shifted tap read is in-bounds and
                                    boundary-correct).
    """
    rest = list(rest)
    pw_ref = rest.pop(0) if stride > 1 else None
    if has_downsample:
        wd_ref = rest.pop(0)
        sd_ref = rest.pop(0)
        bd_ref = rest.pop(0)
    o_ref, hbuf = rest

    f32, bf16 = jnp.float32, jnp.bfloat16
    pw = pw_ref[...] if stride > 1 else None           # hoisted (tiny constant)

    xv = x_ref[0]                                       # (M, Cin_p) bf16

    # ---- conv1 (1x1) + bn1 + relu; single hoisted f32->bf16 cast ----------
    h1 = jnp.dot(xv, w1_ref[...], preferred_element_type=f32)
    h1b = jnp.maximum(h1 * s1_ref[...] + b1_ref[...], 0.0).astype(bf16)

    # ---- build the 1-pixel zero halo in VMEM (no padded x copy in HBM) ----
    hbuf[...] = jnp.zeros_like(hbuf)
    for y in range(H):
        dst = HALO + (y + 1) * Wp + 1                   # even offsets (W even)
        hbuf[pl.ds(dst, W), :] = h1b[y * W:(y + 1) * W, :]

    # ---- conv2 (3x3, pad=1): 9 shifted views of the haloed activation,
    #      K-stacked into ONE MXU matmul with K = 9*Pp.
    taps = []
    for t in range(9):
        dy, dx = t // 3, t % 3
        off = (dy - 1) * Wp + (dx - 1)
        taps.append(hbuf[pl.ds(HALO + off, M2), :])     # (M2, Pp) bf16
    acc2 = jnp.dot(jnp.concatenate(taps, axis=1), w2_ref[...],
                   preferred_element_type=f32)          # (M2, Pp) f32
    h2 = jnp.maximum(acc2 * s2_ref[...] + b2_ref[...], 0.0)

    # ---- exact avg-pool / interior-row selection (no dense pool matrix).
    #      y direction: contiguous row slices;  x direction: tiny (Wo, W)
    #      0/1 matmul.  1/stride^2 is folded into w3 / wd at prep time.
    def pool_rows(v, pitch, base):
        blocks = []
        for py in range(Ho):
            b0 = base + py * stride * pitch
            ys = v[b0:b0 + W, :]
            for dy in range(1, stride):
                o = b0 + dy * pitch
                ys = ys + v[o:o + W, :]
            if stride == 1:
                blocks.append(ys.astype(bf16))
            else:
                blocks.append(
                    jnp.dot(pw, ys.astype(bf16),
                            preferred_element_type=f32).astype(bf16))
        return jnp.concatenate(blocks, axis=0)          # (Ho*Wo, C) bf16

    pooled = pool_rows(h2, Wp, Wp + 1)                  # (Mo, Pp) bf16

    # ---- conv3 (1x1) + bn3 -------------------------------------------------
    out = jnp.dot(pooled, w3_ref[...], preferred_element_type=f32)
    out = out * s3_ref[...] + b3_ref[...]               # (Mo, Cout_p) f32

    # ---- identity / downsample branch --------------------------------------
    if has_downsample:
        idn_in = pool_rows(xv, W, 0) if stride > 1 else xv
        idn = jnp.dot(idn_in, wd_ref[...], preferred_element_type=f32)
        idn = idn * sd_ref[...] + bd_ref[...]
    else:
        idn = xv.astype(f32)                            # Cin_p == Cout_p here

    o_ref[0] = jnp.maximum(out + idn, 0.0).astype(o_ref.dtype)


# ------------------------- one-time parameter prep -------------------------

def _round_up(x, m):
    return (x + m - 1) // m * m


def fold_bn(p, eps=1e-5):
    scale = p["gamma"] / jnp.sqrt(p["var"] + eps)
    bias = p["beta"] - p["mean"] * scale
    return scale, bias


def _pad_vec(v, n):
    return jnp.pad(v, (0, n - v.shape[0])).reshape(1, n).astype(jnp.float32)


def _pad_mat(w2d, k, n):
    return jnp.pad(w2d, ((0, k - w2d.shape[0]), (0, n - w2d.shape[1]))
                   ).astype(jnp.bfloat16)


def prepare_params(params, Cin, planes, stride, H, W):
    """Fold BN, transpose/pad weights, stack conv2 taps, build pool selector."""
    Cout = planes * 4
    Cin_p = _round_up(Cin, 128)
    Pp = _round_up(planes, 128)
    Cout_p = _round_up(Cout, 128)
    Wp, Hp = W + 2, H + 2                     # 1-pixel spatial halo
    HALO = Wp + 1                             # guard rows in the halo scratch
    M = H * W
    M2 = _round_up(Hp * Wp, 8)                # rows carried through conv2
    R = _round_up(M2 + 2 * HALO, 8)           # halo-scratch rows
    Ho, Wo = H // stride, W // stride
    Mo = Ho * Wo
    has_ds = (stride > 1) or (Cin != Cout)
    inv = 1.0 / (stride * stride)

    s1, b1 = fold_bn(params["bn1"])
    s2, b2 = fold_bn(params["bn2"])
    s3, b3 = fold_bn(params["bn3"])

    # conv2 weight (O, I, 3, 3) -> tap-major, per-tap padded, stacked along K.
    w2 = jnp.transpose(params["w2"], (2, 3, 1, 0)).reshape(9, planes, planes)
    w2 = jnp.pad(w2, ((0, 0), (0, Pp - planes), (0, Pp - planes)))
    w2 = w2.reshape(9 * Pp, Pp).astype(jnp.bfloat16)

    prep = {
        "stride": stride, "H": H, "W": W, "Wp": Wp, "HALO": HALO,
        "M": M, "M2": M2, "R": R, "Ho": Ho, "Wo": Wo, "Mo": Mo,
        "Cin": Cin, "Cout": Cout,
        "Cin_p": Cin_p, "Pp": Pp, "Cout_p": Cout_p, "has_downsample": has_ds,
        "w1": _pad_mat(params["w1"][:, :, 0, 0].T, Cin_p, Pp),
        "s1": _pad_vec(s1, Pp), "b1": _pad_vec(b1, Pp),
        "w2": w2, "s2": _pad_vec(s2, Pp), "b2": _pad_vec(b2, Pp),
        # fold the 1/stride^2 average into the 1x1 conv that follows the pool
        "w3": _pad_mat(params["w3"][:, :, 0, 0].T * inv, Pp, Cout_p),
        "s3": _pad_vec(s3, Cout_p), "b3": _pad_vec(b3, Cout_p),
    }
    if has_ds:
        sd, bd = fold_bn(params["bnd"])
        prep["wd"] = _pad_mat(params["wd"][:, :, 0, 0].T * inv, Cin_p, Cout_p)
        prep["sd"] = _pad_vec(sd, Cout_p)
        prep["bd"] = _pad_vec(bd, Cout_p)
    if stride > 1:
        # 0/1 selector: pw[px, x] = 1 iff x // stride == px
        prep["pw"] = (jnp.arange(W)[None, :] // stride
                      == jnp.arange(Wo)[:, None]).astype(jnp.bfloat16)
    return prep


# ------------------------------- forward -----------------------------------

def _const_spec(shape):
    return pl.BlockSpec(shape, lambda b: (0,) * len(shape))


def to_padded_nhwc(x_nchw, prep):
    """Entry adapter: NCHW f32 -> (N, H*W, Cin_p) bf16 (only paid once when
    chaining blocks; intermediate activations stay in this layout)."""
    N, Cin, H, W = x_nchw.shape
    assert (H, W, Cin) == (prep["H"], prep["W"], prep["Cin"])
    x = jnp.transpose(x_nchw, (0, 2, 3, 1)).reshape(N, H * W, Cin)
    x = jnp.pad(x, ((0, 0), (0, 0), (0, prep["Cin_p"] - Cin)))
    return x.astype(jnp.bfloat16)


def bottleneck_forward_raw(x_flat, prep):
    """x_flat: (N, H*W, Cin_p) bf16  ->  (N, Ho*Wo, Cout_p) bf16."""
    N = x_flat.shape[0]
    M, M2, Mo = prep["M"], prep["M2"], prep["Mo"]
    Cin_p, Pp, Cout_p = prep["Cin_p"], prep["Pp"], prep["Cout_p"]
    stride, has_ds = prep["stride"], prep["has_downsample"]

    inputs = [x_flat, prep["w1"], prep["s1"], prep["b1"],
              prep["w2"], prep["s2"], prep["b2"],
              prep["w3"], prep["s3"], prep["b3"]]
    in_specs = [pl.BlockSpec((1, M, Cin_p), lambda b: (b, 0, 0)),
                _const_spec((Cin_p, Pp)), _const_spec((1, Pp)),
                _const_spec((1, Pp)),
                _const_spec((9 * Pp, Pp)), _const_spec((1, Pp)),
                _const_spec((1, Pp)),
                _const_spec((Pp, Cout_p)), _const_spec((1, Cout_p)),
                _const_spec((1, Cout_p))]
    if stride > 1:
        inputs.append(prep["pw"])
        in_specs.append(_const_spec((prep["Wo"], prep["W"])))
    if has_ds:
        inputs += [prep["wd"], prep["sd"], prep["bd"]]
        in_specs += [_const_spec((Cin_p, Cout_p)), _const_spec((1, Cout_p)),
                     _const_spec((1, Cout_p))]

    kernel = functools.partial(
        _bottleneck_kernel, H=prep["H"], W=prep["W"], Wp=prep["Wp"],
        HALO=prep["HALO"], M2=M2, Ho=prep["Ho"], Wo=prep["Wo"],
        stride=stride, has_downsample=has_ds)

    # --- VMEM budget (per image) and cost estimate ---------------------------
    weight_bytes = sum(int(v.size) * v.dtype.itemsize for v in inputs[1:])
    est = (2 * (M * Cin_p + Mo * Cout_p) * 2      # double-buffered x / out
           + 2 * weight_bytes                      # double-buffered constants
           + prep["R"] * Pp * 2                    # halo scratch
           + M2 * Pp * (2 * 9 + 4 + 4)             # stacked taps + f32 temps
           + M * Pp * 6)
    vmem_limit = int(min(max(2 * est, 32 << 20), 64 << 20))

    flops = 2 * N * (M * Cin_p * Pp + M2 * 9 * Pp * Pp + Mo * Pp * Cout_p
                     + (Mo * Cin_p * Cout_p if has_ds else 0))
    bytes_accessed = int(x_flat.size) * 2 + N * Mo * Cout_p * 2 + weight_bytes

    return pl.pallas_call(
        kernel,
        out_shape=jax.ShapeDtypeStruct((N, Mo, Cout_p), jnp.bfloat16),
        grid=(N,),
        in_specs=in_specs,
        out_specs=pl.BlockSpec((1, Mo, Cout_p), lambda b: (b, 0, 0)),
        scratch_shapes=[pltpu.VMEM((prep["R"], Pp), jnp.bfloat16)],
        compiler_params=pltpu.CompilerParams(
            dimension_semantics=("parallel",),     # v7x: batch over the 2 TCs
            vmem_limit_bytes=vmem_limit),
        cost_estimate=pl.CostEstimate(flops=flops, transcendentals=0,
                                      bytes_accessed=bytes_accessed),
    )(*inputs)


def bottleneck_forward(x_nchw, prep):
    """Module-equivalent forward: NCHW f32 in -> NCHW f32 out (verification)."""
    N = x_nchw.shape[0]
    raw = bottleneck_forward_raw(to_padded_nhwc(x_nchw, prep), prep)
    out = raw[:, :, :prep["Cout"]].astype(jnp.float32)
    out = out.reshape(N, prep["Ho"], prep["Wo"], prep["Cout"])
    return jnp.transpose(out, (0, 3, 1, 2))


# --------------------------- pure-JAX reference -----------------------------

def reference(x_nchw, params, stride):
    x = jnp.transpose(x_nchw, (0, 2, 3, 1))

    def conv(y, w_oihw):
        w = jnp.transpose(w_oihw, (2, 3, 1, 0))  # HWIO
        pad = "SAME" if w_oihw.shape[2] == 3 else "VALID"
        return jax.lax.conv_general_dilated(
            y, w, (1, 1), pad, dimension_numbers=("NHWC", "HWIO", "NHWC"))

    def bn(y, p):
        s, b = fold_bn(p)
        return y * s + b

    def pool(y, s):
        n, h, w, c = y.shape
        return y.reshape(n, h // s, s, w // s, s, c).mean(axis=(2, 4))

    out = jax.nn.relu(bn(conv(x, params["w1"]), params["bn1"]))
    out = jax.nn.relu(bn(conv(out, params["w2"]), params["bn2"]))
    if stride > 1:
        out = pool(out, stride)
    out = bn(conv(out, params["w3"]), params["bn3"])
    Cout = params["w3"].shape[0]
    if stride > 1 or x.shape[-1] != Cout:
        idn = pool(x, stride) if stride > 1 else x
        idn = bn(conv(idn, params["wd"]), params["bnd"])
    else:
        idn = x
    out = jax.nn.relu(out + idn)
    return jnp.transpose(out, (0, 3, 1, 2))


# ---------------------------------- main ------------------------------------

def make_bn_params(key, c):
    k1, k2, k3, k4 = jax.random.split(key, 4)
    return {
        "gamma": jax.random.normal(k1, (c,), jnp.float32) * 0.1 + 1.0,
        "beta": jax.random.normal(k2, (c,), jnp.float32) * 0.1,
        "mean": jax.random.normal(k3, (c,), jnp.float32) * 0.1,
        "var": jax.random.uniform(k4, (c,), jnp.float32, minval=0.5, maxval=1.5),
    }


if __name__ == "__main__":
    N, Cin, H, W = 2, 16, 16, 16
    planes, stride = 8, 2  # exercises avgpool + downsample branch

    keys = jax.random.split(jax.random.PRNGKey(0), 10)
    x = jax.random.normal(keys[0], (N, Cin, H, W), jnp.float32)
    params = {
        "w1": jax.random.normal(keys[1], (planes, Cin, 1, 1), jnp.float32) * 0.1,
        "w2": jax.random.normal(keys[2], (planes, planes, 3, 3), jnp.float32) * 0.1,
        "w3": jax.random.normal(keys[3], (planes * 4, planes, 1, 1), jnp.float32) * 0.1,
        "wd": jax.random.normal(keys[4], (planes * 4, Cin, 1, 1), jnp.float32) * 0.1,
        "bn1": make_bn_params(keys[5], planes),
        "bn2": make_bn_params(keys[6], planes),
        "bn3": make_bn_params(keys[7], planes * 4),
        "bnd": make_bn_params(keys[8], planes * 4),
    }

    prep = prepare_params(params, Cin, planes, stride, H, W)   # one-time prep
    out = jax.block_until_ready(bottleneck_forward(x, prep))

    assert out.shape == (N, planes * 4, H // stride, W // stride), out.shape
    ref = reference(x, params, stride)
    err = float(jnp.max(jnp.abs(out - ref)))
    # bf16 MXU inputs (f32 accumulate) -> loosened tolerance vs the f32 reference.
    assert err < 5e-2, f"max abs error {err}"
    print("KERNEL_OK")
</pallas_src>

<mosaic_0001>
module attributes {stable_mosaic.version = 11 : i64} {
  func.func @_bottleneck_kernel(%arg0: i32, %arg1: memref<1x256x128xbf16, #tpu.memory_space<vmem>>, %arg2: memref<128x128xbf16, #tpu.memory_space<vmem>>, %arg3: memref<1x128xf32, #tpu.memory_space<vmem>>, %arg4: memref<1x128xf32, #tpu.memory_space<vmem>>, %arg5: memref<1152x128xbf16, #tpu.memory_space<vmem>>, %arg6: memref<1x128xf32, #tpu.memory_space<vmem>>, %arg7: memref<1x128xf32, #tpu.memory_space<vmem>>, %arg8: memref<128x128xbf16, #tpu.memory_space<vmem>>, %arg9: memref<1x128xf32, #tpu.memory_space<vmem>>, %arg10: memref<1x128xf32, #tpu.memory_space<vmem>>, %arg11: memref<8x16xbf16, #tpu.memory_space<vmem>>, %arg12: memref<128x128xbf16, #tpu.memory_space<vmem>>, %arg13: memref<1x128xf32, #tpu.memory_space<vmem>>, %arg14: memref<1x128xf32, #tpu.memory_space<vmem>>, %arg15: memref<1x64x128xbf16, #tpu.memory_space<vmem>>, %arg16: memref<368x128xbf16, #tpu.memory_space<vmem>>) attributes {dimension_semantics = [#tpu.dimension_semantics<parallel>], iteration_bounds = array<i64: 2>, scalar_prefetch = 0 : i64, scratch_operands = 1 : i64, tpu.core_type = #tpu.core_type<tc>, window_params = [{transform_indices = @transform_0, window_bounds = array<i64: 1, 256, 128>}, {pipeline_mode = #tpu.pipeline_mode<synchronous>, transform_indices = @transform_1, window_bounds = array<i64: 128, 128>}, {pipeline_mode = #tpu.pipeline_mode<synchronous>, transform_indices = @transform_2, window_bounds = array<i64: 1, 128>}, {pipeline_mode = #tpu.pipeline_mode<synchronous>, transform_indices = @transform_3, window_bounds = array<i64: 1, 128>}, {pipeline_mode = #tpu.pipeline_mode<synchronous>, transform_indices = @transform_4, window_bounds = array<i64: 1152, 128>}, {pipeline_mode = #tpu.pipeline_mode<synchronous>, transform_indices = @transform_5, window_bounds = array<i64: 1, 128>}, {pipeline_mode = #tpu.pipeline_mode<synchronous>, transform_indices = @transform_6, window_bounds = array<i64: 1, 128>}, {pipeline_mode = #tpu.pipeline_mode<synchronous>, transform_indices = @transform_7, window_bounds = array<i64: 128, 128>}, {pipeline_mode = #tpu.pipeline_mode<synchronous>, transform_indices = @transform_8, window_bounds = array<i64: 1, 128>}, {pipeline_mode = #tpu.pipeline_mode<synchronous>, transform_indices = @transform_9, window_bounds = array<i64: 1, 128>}, {pipeline_mode = #tpu.pipeline_mode<synchronous>, transform_indices = @transform_10, window_bounds = array<i64: 8, 16>}, {pipeline_mode = #tpu.pipeline_mode<synchronous>, transform_indices = @transform_11, window_bounds = array<i64: 128, 128>}, {pipeline_mode = #tpu.pipeline_mode<synchronous>, transform_indices = @transform_12, window_bounds = array<i64: 1, 128>}, {pipeline_mode = #tpu.pipeline_mode<synchronous>, transform_indices = @transform_13, window_bounds = array<i64: 1, 128>}, {transform_indices = @transform_14, window_bounds = array<i64: 1, 64, 128>}]} {
    %c0 = arith.constant 0 : index
    %c0_0 = arith.constant 0 : index
    %0 = vector.load %arg11[%c0, %c0_0] : memref<8x16xbf16, #tpu.memory_space<vmem>>, vector<8x16xbf16>
    %c0_1 = arith.constant 0 : index
    %c0_2 = arith.constant 0 : index
    %c0_3 = arith.constant 0 : index
    %1 = vector.load %arg1[%c0_1, %c0_2, %c0_3] : memref<1x256x128xbf16, #tpu.memory_space<vmem>>, vector<1x256x128xbf16>
    %2 = vector.shape_cast %1 : vector<1x256x128xbf16> to vector<256x128xbf16>
    %c0_4 = arith.constant 0 : index
    %c0_5 = arith.constant 0 : index
    %3 = vector.load %arg2[%c0_4, %c0_5] : memref<128x128xbf16, #tpu.memory_space<vmem>>, vector<128x128xbf16>
    %cst = arith.constant dense<0.000000e+00> : vector<256x128xf32>
    %4 = tpu.matmul %2, %3, %cst {dimension_numbers = #tpu.dot_dimension_numbers<[1], [0], [0], [1], [0, 0, 1, 1], [], []>} : vector<256x128xbf16>, vector<128x128xbf16>, vector<256x128xf32> -> vector<256x128xf32>
    %c0_6 = arith.constant 0 : index
    %c0_7 = arith.constant 0 : index
    %5 = vector.load %arg3[%c0_6, %c0_7] : memref<1x128xf32, #tpu.memory_space<vmem>>, vector<1x128xf32>
    %6 = vector.broadcast %5 : vector<1x128xf32> to vector<256x128xf32>
    %7 = arith.mulf %4, %6 : vector<256x128xf32>
    %c0_8 = arith.constant 0 : index
    %c0_9 = arith.constant 0 : index
    %8 = vector.load %arg4[%c0_8, %c0_9] : memref<1x128xf32, #tpu.memory_space<vmem>>, vector<1x128xf32>
    %9 = vector.broadcast %8 : vector<1x128xf32> to vector<256x128xf32>
    %10 = arith.addf %7, %9 : vector<256x128xf32>
    %cst_10 = arith.constant 0.000000e+00 : f32
    %11 = vector.broadcast %cst_10 : f32 to vector<256x128xf32>
    %12 = arith.maximumf %10, %11 : vector<256x128xf32>
    %13 = arith.truncf %12 : vector<256x128xf32> to vector<256x128xbf16>
    %cst_11 = arith.constant 0.000000e+00 : bf16
    %14 = vector.broadcast %cst_11 : bf16 to vector<368x128xbf16>
    %c0_12 = arith.constant 0 : index
    %c0_13 = arith.constant 0 : index
    %15 = vector.load %arg16[%c0_12, %c0_13] : memref<368x128xbf16, #tpu.memory_space<vmem>>, vector<368x128xbf16>
    tpu.vector_store %arg16[%c0_12, %c0_13], %14 {strides = array<i32>} : memref<368x128xbf16, #tpu.memory_space<vmem>>, vector<368x128xbf16>,
    %16 = vector.extract_strided_slice %13 {offsets = [0, 0], sizes = [16, 128], strides = [1, 1]} : vector<256x128xbf16> to vector<16x128xbf16>
    %c38 = arith.constant 38 : index
    %c0_14 = arith.constant 0 : index
    %17 = vector.load %arg16[%c38, %c0_14] : memref<368x128xbf16, #tpu.memory_space<vmem>>, vector<16x128xbf16>
    tpu.vector_store %arg16[%c38, %c0_14], %16 {strides = array<i32>} : memref<368x128xbf16, #tpu.memory_space<vmem>>, vector<16x128xbf16>,
    %18 = vector.extract_strided_slice %13 {offsets = [16, 0], sizes = [16, 128], strides = [1, 1]} : vector<256x128xbf16> to vector<16x128xbf16>
    %c56 = arith.constant 56 : index
    %c0_15 = arith.constant 0 : index
    %19 = vector.load %arg16[%c56, %c0_15] : memref<368x128xbf16, #tpu.memory_space<vmem>>, vector<16x128xbf16>
    tpu.vector_store %arg16[%c56, %c0_15], %18 {strides = array<i32>} : memref<368x128xbf16, #tpu.memory_space<vmem>>, vector<16x128xbf16>,
    %20 = vector.extract_strided_slice %13 {offsets = [32, 0], sizes = [16, 128], strides = [1, 1]} : vector<256x128xbf16> to vector<16x128xbf16>
    %c74 = arith.constant 74 : index
    %c0_16 = arith.constant 0 : index
    %21 = vector.load %arg16[%c74, %c0_16] : memref<368x128xbf16, #tpu.memory_space<vmem>>, vector<16x128xbf16>
    tpu.vector_store %arg16[%c74, %c0_16], %20 {strides = array<i32>} : memref<368x128xbf16, #tpu.memory_space<vmem>>, vector<16x128xbf16>,
    %22 = vector.extract_strided_slice %13 {offsets = [48, 0], sizes = [16, 128], strides = [1, 1]} : vector<256x128xbf16> to vector<16x128xbf16>
    %c92 = arith.constant 92 : index
    %c0_17 = arith.constant 0 : index
    %23 = vector.load %arg16[%c92, %c0_17] : memref<368x128xbf16, #tpu.memory_space<vmem>>, vector<16x128xbf16>
    tpu.vector_store %arg16[%c92, %c0_17], %22 {strides = array<i32>} : memref<368x128xbf16, #tpu.memory_space<vmem>>, vector<16x128xbf16>,
    %24 = vector.extract_strided_slice %13 {offsets = [64, 0], sizes = [16, 128], strides = [1, 1]} : vector<256x128xbf16> to vector<16x128xbf16>
    %c110 = arith.constant 110 : index
    %c0_18 = arith.constant 0 : index
    %25 = vector.load %arg16[%c110, %c0_18] : memref<368x128xbf16, #tpu.memory_space<vmem>>, vector<16x128xbf16>
    tpu.vector_store %arg16[%c110, %c0_18], %24 {strides = array<i32>} : memref<368x128xbf16, #tpu.memory_space<vmem>>, vector<16x128xbf16>,
    %26 = vector.extract_strided_slice %13 {offsets = [80, 0], sizes = [16, 128], strides = [1, 1]} : vector<256x128xbf16> to vector<16x128xbf16>
    %c128 = arith.constant 128 : index
    %c0_19 = arith.constant 0 : index
    %27 = vector.load %arg16[%c128, %c0_19] : memref<368x128xbf16, #tpu.memory_space<vmem>>, vector<16x128xbf16>
    tpu.vector_store %arg16[%c128, %c0_19], %26 {strides = array<i32>} : memref<368x128xbf16, #tpu.memory_space<vmem>>, vector<16x128xbf16>,
    %28 = vector.extract_strided_slice %13 {offsets = [96, 0], sizes = [16, 128], strides = [1, 1]} : vector<256x128xbf16> to vector<16x128xbf16>
    %c146 = arith.constant 146 : index
    %c0_20 = arith.constant 0 : index
    %29 = vector.load %arg16[%c146, %c0_20] : memref<368x128xbf16, #tpu.memory_space<vmem>>, vector<16x128xbf16>
    tpu.vector_store %arg16[%c146, %c0_20], %28 {strides = array<i32>} : memref<368x128xbf16, #tpu.memory_space<vmem>>, vector<16x128xbf16>,
    %30 = vector.extract_strided_slice %13 {offsets = [112, 0], sizes = [16, 128], strides = [1, 1]} : vector<256x128xbf16> to vector<16x128xbf16>
    %c164 = arith.constant 164 : index
    %c0_21 = arith.constant 0 : index
    %31 = vector.load %arg16[%c164, %c0_21] : memref<368x128xbf16, #tpu.memory_space<vmem>>, vector<16x128xbf16>
    tpu.vector_store %arg16[%c164, %c0_21], %30 {strides = array<i32>} : memref<368x128xbf16, #tpu.memory_space<vmem>>, vector<16x128xbf16>,
    %32 = vector.extract_strided_slice %13 {offsets = [128, 0], sizes = [16, 128], strides = [1, 1]} : vector<256x128xbf16> to vector<16x128xbf16>
    %c182 = arith.constant 182 : index
    %c0_22 = arith.constant 0 : index
    %33 = vector.load %arg16[%c182, %c0_22] : memref<368x128xbf16, #tpu.memory_space<vmem>>, vector<16x128xbf16>
    tpu.vector_store %arg16[%c182, %c0_22], %32 {strides = array<i32>} : memref<368x128xbf16, #tpu.memory_space<vmem>>, vector<16x128xbf16>,
    %34 = vector.extract_strided_slice %13 {offsets = [144, 0], sizes = [16, 128], strides = [1, 1]} : vector<256x128xbf16> to vector<16x128xbf16>
    %c200 = arith.constant 200 : index
    %c0_23 = arith.constant 0 : index
    %35 = vector.load %arg16[%c200, %c0_23] : memref<368x128xbf16, #tpu.memory_space<vmem>>, vector<16x128xbf16>
    tpu.vector_store %arg16[%c200, %c0_23], %34 {strides = array<i32>} : memref<368x128xbf16, #tpu.memory_space<vmem>>, vector<16x128xbf16>,
    %36 = vector.extract_strided_slice %13 {offsets = [160, 0], sizes = [16, 128], strides = [1, 1]} : vector<256x128xbf16> to vector<16x128xbf16>
    %c218 = arith.constant 218 : index
    %c0_24 = arith.constant 0 : index
    %37 = vector.load %arg16[%c218, %c0_24] : memref<368x128xbf16, #tpu.memory_space<vmem>>, vector<16x128xbf16>
    tpu.vector_store %arg16[%c218, %c0_24], %36 {strides = array<i32>} : memref<368x128xbf16, #tpu.memory_space<vmem>>, vector<16x128xbf16>,
    %38 = vector.extract_strided_slice %13 {offsets = [176, 0], sizes = [16, 128], strides = [1, 1]} : vector<256x128xbf16> to vector<16x128xbf16>
    %c236 = arith.constant 236 : index
    %c0_25 = arith.constant 0 : index
    %39 = vector.load %arg16[%c236, %c0_25] : memref<368x128xbf16, #tpu.memory_space<vmem>>, vector<16x128xbf16>
    tpu.vector_store %arg16[%c236, %c0_25], %38 {strides = array<i32>} : memref<368x128xbf16, #tpu.memory_space<vmem>>, vector<16x128xbf16>,
    %40 = vector.extract_strided_slice %13 {offsets = [192, 0], sizes = [16, 128], strides = [1, 1]} : vector<256x128xbf16> to vector<16x128xbf16>
    %c254 = arith.constant 254 : index
    %c0_26 = arith.constant 0 : index
    %41 = vector.load %arg16[%c254, %c0_26] : memref<368x128xbf16, #tpu.memory_space<vmem>>, vector<16x128xbf16>
    tpu.vector_store %arg16[%c254, %c0_26], %40 {strides = array<i32>} : memref<368x128xbf16, #tpu.memory_space<vmem>>, vector<16x128xbf16>,
    %42 = vector.extract_strided_slice %13 {offsets = [208, 0], sizes = [16, 128], strides = [1, 1]} : vector<256x128xbf16> to vector<16x128xbf16>
    %c272 = arith.constant 272 : index
    %c0_27 = arith.constant 0 : index
    %43 = vector.load %arg16[%c272, %c0_27] : memref<368x128xbf16, #tpu.memory_space<vmem>>, vector<16x128xbf16>
    tpu.vector_store %arg16[%c272, %c0_27], %42 {strides = array<i32>} : memref<368x128xbf16, #tpu.memory_space<vmem>>, vector<16x128xbf16>,
    %44 = vector.extract_strided_slice %13 {offsets = [224, 0], sizes = [16, 128], strides = [1, 1]} : vector<256x128xbf16> to vector<16x128xbf16>
    %c290 = arith.constant 290 : index
    %c0_28 = arith.constant 0 : index
    %45 = vector.load %arg16[%c290, %c0_28] : memref<368x128xbf16, #tpu.memory_space<vmem>>, vector<16x128xbf16>
    tpu.vector_store %arg16[%c290, %c0_28], %44 {strides = array<i32>} : memref<368x128xbf16, #tpu.memory_space<vmem>>, vector<16x128xbf16>,
    %46 = vector.extract_strided_slice %13 {offsets = [240, 0], sizes = [16, 128], strides = [1, 1]} : vector<256x128xbf16> to vector<16x128xbf16>
    %c308 = arith.constant 308 : index
    %c0_29 = arith.constant 0 : index
    %47 = vector.load %arg16[%c308, %c0_29] : memref<368x128xbf16, #tpu.memory_space<vmem>>, vector<16x128xbf16>
    tpu.vector_store %arg16[%c308, %c0_29], %46 {strides = array<i32>} : memref<368x128xbf16, #tpu.memory_space<vmem>>, vector<16x128xbf16>,
    %c0_30 = arith.constant 0 : index
    %c0_31 = arith.constant 0 : index
    %48 = vector.load %arg16[%c0_30, %c0_31] : memref<368x128xbf16, #tpu.memory_space<vmem>>, vector<328x128xbf16>
    %c1 = arith.constant 1 : index
    %c0_32 = arith.constant 0 : index
    %49 = vector.load %arg16[%c1, %c0_32] : memref<368x128xbf16, #tpu.memory_space<vmem>>, vector<328x128xbf16>
    %c2 = arith.constant 2 : index
    %c0_33 = arith.constant 0 : index
    %50 = vector.load %arg16[%c2, %c0_33] : memref<368x128xbf16, #tpu.memory_space<vmem>>, vector<328x128xbf16>
    %c18 = arith.constant 18 : index
    %c0_34 = arith.constant 0 : index
    %51 = vector.load %arg16[%c18, %c0_34] : memref<368x128xbf16, #tpu.memory_space<vmem>>, vector<328x128xbf16>
    %c19 = arith.constant 19 : index
    %c0_35 = arith.constant 0 : index
    %52 = vector.load %arg16[%c19, %c0_35] : memref<368x128xbf16, #tpu.memory_space<vmem>>, vector<328x128xbf16>
    %c20 = arith.constant 20 : index
    %c0_36 = arith.constant 0 : index
    %53 = vector.load %arg16[%c20, %c0_36] : memref<368x128xbf16, #tpu.memory_space<vmem>>, vector<328x128xbf16>
    %c36 = arith.constant 36 : index
    %c0_37 = arith.constant 0 : index
    %54 = vector.load %arg16[%c36, %c0_37] : memref<368x128xbf16, #tpu.memory_space<vmem>>, vector<328x128xbf16>
    %c37 = arith.constant 37 : index
    %c0_38 = arith.constant 0 : index
    %55 = vector.load %arg16[%c37, %c0_38] : memref<368x128xbf16, #tpu.memory_space<vmem>>, vector<328x128xbf16>
    %c38_39 = arith.constant 38 : index
    %c0_40 = arith.constant 0 : index
    %56 = vector.load %arg16[%c38_39, %c0_40] : memref<368x128xbf16, #tpu.memory_space<vmem>>, vector<328x128xbf16>
    %57 = tpu.concatenate %48, %49, %50, %51, %52, %53, %54, %55, %56 in 1 : vector<328x128xbf16>, vector<328x128xbf16>, vector<328x128xbf16>, vector<328x128xbf16>, vector<328x128xbf16>, vector<328x128xbf16>, vector<328x128xbf16>, vector<328x128xbf16>, vector<328x128xbf16> -> vector<328x1152xbf16>
    %c0_41 = arith.constant 0 : index
    %c0_42 = arith.constant 0 : index
    %58 = vector.load %arg5[%c0_41, %c0_42] : memref<1152x128xbf16, #tpu.memory_space<vmem>>, vector<1152x128xbf16>
    %cst_43 = arith.constant dense<0.000000e+00> : vector<328x128xf32>
    %59 = tpu.matmul %57, %58, %cst_43 {dimension_numbers = #tpu.dot_dimension_numbers<[1], [0], [0], [1], [0, 0, 1, 1], [], []>} : vector<328x1152xbf16>, vector<1152x128xbf16>, vector<328x128xf32> -> vector<328x128xf32>
    %c0_44 = arith.constant 0 : index
    %c0_45 = arith.constant 0 : index
    %60 = vector.load %arg6[%c0_44, %c0_45] : memref<1x128xf32, #tpu.memory_space<vmem>>, vector<1x128xf32>
    %61 = vector.broadcast %60 : vector<1x128xf32> to vector<328x128xf32>
    %62 = arith.mulf %59, %61 : vector<328x128xf32>
    %c0_46 = arith.constant 0 : index
    %c0_47 = arith.constant 0 : index
    %63 = vector.load %arg7[%c0_46, %c0_47] : memref<1x128xf32, #tpu.memory_space<vmem>>, vector<1x128xf32>
    %64 = vector.broadcast %63 : vector<1x128xf32> to vector<328x128xf32>
    %65 = arith.addf %62, %64 : vector<328x128xf32>
    %cst_48 = arith.constant 0.000000e+00 : f32
    %66 = vector.broadcast %cst_48 : f32 to vector<328x128xf32>
    %67 = arith.maximumf %65, %66 : vector<328x128xf32>
    %68 = vector.extract_strided_slice %67 {offsets = [19, 0], sizes = [16, 128], strides = [1, 1]} : vector<328x128xf32> to vector<16x128xf32>
    %69 = vector.extract_strided_slice %67 {offsets = [37, 0], sizes = [16, 128], strides = [1, 1]} : vector<328x128xf32> to vector<16x128xf32>
    %70 = arith.addf %68, %69 : vector<16x128xf32>
    %71 = arith.truncf %70 : vector<16x128xf32> to vector<16x128xbf16>
    %cst_49 = arith.constant dense<0.000000e+00> : vector<8x128xf32>
    %72 = tpu.matmul %0, %71, %cst_49 {dimension_numbers = #tpu.dot_dimension_numbers<[1], [0], [0], [1], [0, 0, 1, 1], [], []>} : vector<8x16xbf16>, vector<16x128xbf16>, vector<8x128xf32> -> vector<8x128xf32>
    %73 = arith.truncf %72 : vector<8x128xf32> to vector<8x128xbf16>
    %74 = vector.extract_strided_slice %67 {offsets = [55, 0], sizes = [16, 128], strides = [1, 1]} : vector<328x128xf32> to vector<16x128xf32>
    %75 = vector.extract_strided_slice %67 {offsets = [73, 0], sizes = [16, 128], strides = [1, 1]} : vector<328x128xf32> to vector<16x128xf32>
    %76 = arith.addf %74, %75 : vector<16x128xf32>
    %77 = arith.truncf %76 : vector<16x128xf32> to vector<16x128xbf16>
    %cst_50 = arith.constant dense<0.000000e+00> : vector<8x128xf32>
    %78 = tpu.matmul %0, %77, %cst_50 {dimension_numbers = #tpu.dot_dimension_numbers<[1], [0], [0], [1], [0, 0, 1, 1], [], []>} : vector<8x16xbf16>, vector<16x128xbf16>, vector<8x128xf32> -> vector<8x128xf32>
    %79 = arith.truncf %78 : vector<8x128xf32> to vector<8x128xbf16>
    %80 = vector.extract_strided_slice %67 {offsets = [91, 0], sizes = [16, 128], strides = [1, 1]} : vector<328x128xf32> to vector<16x128xf32>
    %81 = vector.extract_strided_slice %67 {offsets = [109, 0], sizes = [16, 128], strides = [1, 1]} : vector<328x128xf32> to vector<16x128xf32>
    %82 = arith.addf %80, %81 : vector<16x128xf32>
    %83 = arith.truncf %82 : vector<16x128xf32> to vector<16x128xbf16>
    %cst_51 = arith.constant dense<0.000000e+00> : vector<8x128xf32>
    %84 = tpu.matmul %0, %83, %cst_51 {dimension_numbers = #tpu.dot_dimension_numbers<[1], [0], [0], [1], [0, 0, 1, 1], [], []>} : vector<8x16xbf16>, vector<16x128xbf16>, vector<8x128xf32> -> vector<8x128xf32>
    %85 = arith.truncf %84 : vector<8x128xf32> to vector<8x128xbf16>
    %86 = vector.extract_strided_slice %67 {offsets = [127, 0], sizes = [16, 128], strides = [1, 1]} : vector<328x128xf32> to vector<16x128xf32>
    %87 = vector.extract_strided_slice %67 {offsets = [145, 0], sizes = [16, 128], strides = [1, 1]} : vector<328x128xf32> to vector<16x128xf32>
    %88 = arith.addf %86, %87 : vector<16x128xf32>
    %89 = arith.truncf %88 : vector<16x128xf32> to vector<16x128xbf16>
    %cst_52 = arith.constant dense<0.000000e+00> : vector<8x128xf32>
    %90 = tpu.matmul %0, %89, %cst_52 {dimension_numbers = #tpu.dot_dimension_numbers<[1], [0], [0], [1], [0, 0, 1, 1], [], []>} : vector<8x16xbf16>, vector<16x128xbf16>, vector<8x128xf32> -> vector<8x128xf32>
    %91 = arith.truncf %90 : vector<8x128xf32> to vector<8x128xbf16>
    %92 = vector.extract_strided_slice %67 {offsets = [163, 0], sizes = [16, 128], strides = [1, 1]} : vector<328x128xf32> to vector<16x128xf32>
    %93 = vector.extract_strided_slice %67 {offsets = [181, 0], sizes = [16, 128], strides = [1, 1]} : vector<328x128xf32> to vector<16x128xf32>
    %94 = arith.addf %92, %93 : vector<16x128xf32>
    %95 = arith.truncf %94 : vector<16x128xf32> to vector<16x128xbf16>
    %cst_53 = arith.constant dense<0.000000e+00> : vector<8x128xf32>
    %96 = tpu.matmul %0, %95, %cst_53 {dimension_numbers = #tpu.dot_dimension_numbers<[1], [0], [0], [1], [0, 0, 1, 1], [], []>} : vector<8x16xbf16>, vector<16x128xbf16>, vector<8x128xf32> -> vector<8x128xf32>
    %97 = arith.truncf %96 : vector<8x128xf32> to vector<8x128xbf16>
    %98 = vector.extract_strided_slice %67 {offsets = [199, 0], sizes = [16, 128], strides = [1, 1]} : vector<328x128xf32> to vector<16x128xf32>
    %99 = vector.extract_strided_slice %67 {offsets = [217, 0], sizes = [16, 128], strides = [1, 1]} : vector<328x128xf32> to vector<16x128xf32>
    %100 = arith.addf %98, %99 : vector<16x128xf32>
    %101 = arith.truncf %100 : vector<16x128xf32> to vector<16x128xbf16>
    %cst_54 = arith.constant dense<0.000000e+00> : vector<8x128xf32>
    %102 = tpu.matmul %0, %101, %cst_54 {dimension_numbers = #tpu.dot_dimension_numbers<[1], [0], [0], [1], [0, 0, 1, 1], [], []>} : vector<8x16xbf16>, vector<16x128xbf16>, vector<8x128xf32> -> vector<8x128xf32>
    %103 = arith.truncf %102 : vector<8x128xf32> to vector<8x128xbf16>
    %104 = vector.extract_strided_slice %67 {offsets = [235, 0], sizes = [16, 128], strides = [1, 1]} : vector<328x128xf32> to vector<16x128xf32>
    %105 = vector.extract_strided_slice %67 {offsets = [253, 0], sizes = [16, 128], strides = [1, 1]} : vector<328x128xf32> to vector<16x128xf32>
    %106 = arith.addf %104, %105 : vector<16x128xf32>
    %107 = arith.truncf %106 : vector<16x128xf32> to vector<16x128xbf16>
    %cst_55 = arith.constant dense<0.000000e+00> : vector<8x128xf32>
    %108 = tpu.matmul %0, %107, %cst_55 {dimension_numbers = #tpu.dot_dimension_numbers<[1], [0], [0], [1], [0, 0, 1, 1], [], []>} : vector<8x16xbf16>, vector<16x128xbf16>, vector<8x128xf32> -> vector<8x128xf32>
    %109 = arith.truncf %108 : vector<8x128xf32> to vector<8x128xbf16>
    %110 = vector.extract_strided_slice %67 {offsets = [271, 0], sizes = [16, 128], strides = [1, 1]} : vector<328x128xf32> to vector<16x128xf32>
    %111 = vector.extract_strided_slice %67 {offsets = [289, 0], sizes = [16, 128], strides = [1, 1]} : vector<328x128xf32> to vector<16x128xf32>
    %112 = arith.addf %110, %111 : vector<16x128xf32>
    %113 = arith.truncf %112 : vector<16x128xf32> to vector<16x128xbf16>
    %cst_56 = arith.constant dense<0.000000e+00> : vector<8x128xf32>
    %114 = tpu.matmul %0, %113, %cst_56 {dimension_numbers = #tpu.dot_dimension_numbers<[1], [0], [0], [1], [0, 0, 1, 1], [], []>} : vector<8x16xbf16>, vector<16x128xbf16>, vector<8x128xf32> -> vector<8x128xf32>
    %115 = arith.truncf %114 : vector<8x128xf32> to vector<8x128xbf16>
    %116 = tpu.concatenate %73, %79, %85, %91, %97, %103, %109, %115 in 0 : vector<8x128xbf16>, vector<8x128xbf16>, vector<8x128xbf16>, vector<8x128xbf16>, vector<8x128xbf16>, vector<8x128xbf16>, vector<8x128xbf16>, vector<8x128xbf16> -> vector<64x128xbf16>
    %c0_57 = arith.constant 0 : index
    %c0_58 = arith.constant 0 : index
    %117 = vector.load %arg8[%c0_57, %c0_58] : memref<128x128xbf16, #tpu.memory_space<vmem>>, vector<128x128xbf16>
    %cst_59 = arith.constant dense<0.000000e+00> : vector<64x128xf32>
    %118 = tpu.matmul %116, %117, %cst_59 {dimension_numbers = #tpu.dot_dimension_numbers<[1], [0], [0], [1], [0, 0, 1, 1], [], []>} : vector<64x128xbf16>, vector<128x128xbf16>, vector<64x128xf32> -> vector<64x128xf32>
    %c0_60 = arith.constant 0 : index
    %c0_61 = arith.constant 0 : index
    %119 = vector.load %arg9[%c0_60, %c0_61] : memref<1x128xf32, #tpu.memory_space<vmem>>, vector<1x128xf32>
    %120 = vector.broadcast %119 : vector<1x128xf32> to vector<64x128xf32>
    %121 = arith.mulf %118, %120 : vector<64x128xf32>
    %c0_62 = arith.constant 0 : index
    %c0_63 = arith.constant 0 : index
    %122 = vector.load %arg10[%c0_62, %c0_63] : memref<1x128xf32, #tpu.memory_space<vmem>>, vector<1x128xf32>
    %123 = vector.broadcast %122 : vector<1x128xf32> to vector<64x128xf32>
    %124 = arith.addf %121, %123 : vector<64x128xf32>
    %125 = vector.extract_strided_slice %2 {offsets = [0, 0], sizes = [16, 128], strides = [1, 1]} : vector<256x128xbf16> to vector<16x128xbf16>
    %126 = vector.extract_strided_slice %2 {offsets = [16, 0], sizes = [16, 128], strides = [1, 1]} : vector<256x128xbf16> to vector<16x128xbf16>
    %127 = arith.addf %125, %126 : vector<16x128xbf16>
    %cst_64 = arith.constant dense<0.000000e+00> : vector<8x128xf32>
    %128 = tpu.matmul %0, %127, %cst_64 {dimension_numbers = #tpu.dot_dimension_numbers<[1], [0], [0], [1], [0, 0, 1, 1], [], []>} : vector<8x16xbf16>, vector<16x128xbf16>, vector<8x128xf32> -> vector<8x128xf32>
    %129 = arith.truncf %128 : vector<8x128xf32> to vector<8x128xbf16>
    %130 = vector.extract_strided_slice %2 {offsets = [32, 0], sizes = [16, 128], strides = [1, 1]} : vector<256x128xbf16> to vector<16x128xbf16>
    %131 = vector.extract_strided_slice %2 {offsets = [48, 0], sizes = [16, 128], strides = [1, 1]} : vector<256x128xbf16> to vector<16x128xbf16>
    %132 = arith.addf %130, %131 : vector<16x128xbf16>
    %cst_65 = arith.constant dense<0.000000e+00> : vector<8x128xf32>
    %133 = tpu.matmul %0, %132, %cst_65 {dimension_numbers = #tpu.dot_dimension_numbers<[1], [0], [0], [1], [0, 0, 1, 1], [], []>} : vector<8x16xbf16>, vector<16x128xbf16>, vector<8x128xf32> -> vector<8x128xf32>
    %134 = arith.truncf %133 : vector<8x128xf32> to vector<8x128xbf16>
    %135 = vector.extract_strided_slice %2 {offsets = [64, 0], sizes = [16, 128], strides = [1, 1]} : vector<256x128xbf16> to vector<16x128xbf16>
    %136 = vector.extract_strided_slice %2 {offsets = [80, 0], sizes = [16, 128], strides = [1, 1]} : vector<256x128xbf16> to vector<16x128xbf16>
    %137 = arith.addf %135, %136 : vector<16x128xbf16>
    %cst_66 = arith.constant dense<0.000000e+00> : vector<8x128xf32>
    %138 = tpu.matmul %0, %137, %cst_66 {dimension_numbers = #tpu.dot_dimension_numbers<[1], [0], [0], [1], [0, 0, 1, 1], [], []>} : vector<8x16xbf16>, vector<16x128xbf16>, vector<8x128xf32> -> vector<8x128xf32>
    %139 = arith.truncf %138 : vector<8x128xf32> to vector<8x128xbf16>
    %140 = vector.extract_strided_slice %2 {offsets = [96, 0], sizes = [16, 128], strides = [1, 1]} : vector<256x128xbf16> to vector<16x128xbf16>
    %141 = vector.extract_strided_slice %2 {offsets = [112, 0], sizes = [16, 128], strides = [1, 1]} : vector<256x128xbf16> to vector<16x128xbf16>
    %142 = arith.addf %140, %141 : vector<16x128xbf16>
    %cst_67 = arith.constant dense<0.000000e+00> : vector<8x128xf32>
    %143 = tpu.matmul %0, %142, %cst_67 {dimension_numbers = #tpu.dot_dimension_numbers<[1], [0], [0], [1], [0, 0, 1, 1], [], []>} : vector<8x16xbf16>, vector<16x128xbf16>, vector<8x128xf32> -> vector<8x128xf32>
    %144 = arith.truncf %143 : vector<8x128xf32> to vector<8x128xbf16>
    %145 = vector.extract_strided_slice %2 {offsets = [128, 0], sizes = [16, 128], strides = [1, 1]} : vector<256x128xbf16> to vector<16x128xbf16>
    %146 = vector.extract_strided_slice %2 {offsets = [144, 0], sizes = [16, 128], strides = [1, 1]} : vector<256x128xbf16> to vector<16x128xbf16>
    %147 = arith.addf %145, %146 : vector<16x128xbf16>
    %cst_68 = arith.constant dense<0.000000e+00> : vector<8x128xf32>
    %148 = tpu.matmul %0, %147, %cst_68 {dimension_numbers = #tpu.dot_dimension_numbers<[1], [0], [0], [1], [0, 0, 1, 1], [], []>} : vector<8x16xbf16>, vector<16x128xbf16>, vector<8x128xf32> -> vector<8x128xf32>
    %149 = arith.truncf %148 : vector<8x128xf32> to vector<8x128xbf16>
    %150 = vector.extract_strided_slice %2 {offsets = [160, 0], sizes = [16, 128], strides = [1, 1]} : vector<256x128xbf16> to vector<16x128xbf16>
    %151 = vector.extract_strided_slice %2 {offsets = [176, 0], sizes = [16, 128], strides = [1, 1]} : vector<256x128xbf16> to vector<16x128xbf16>
    %152 = arith.addf %150, %151 : vector<16x128xbf16>
    %cst_69 = arith.constant dense<0.000000e+00> : vector<8x128xf32>
    %153 = tpu.matmul %0, %152, %cst_69 {dimension_numbers = #tpu.dot_dimension_numbers<[1], [0], [0], [1], [0, 0, 1, 1], [], []>} : vector<8x16xbf16>, vector<16x128xbf16>, vector<8x128xf32> -> vector<8x128xf32>
    %154 = arith.truncf %153 : vector<8x128xf32> to vector<8x128xbf16>
    %155 = vector.extract_strided_slice %2 {offsets = [192, 0], sizes = [16, 128], strides = [1, 1]} : vector<256x128xbf16> to vector<16x128xbf16>
    %156 = vector.extract_strided_slice %2 {offsets = [208, 0], sizes = [16, 128], strides = [1, 1]} : vector<256x128xbf16> to vector<16x128xbf16>
    %157 = arith.addf %155, %156 : vector<16x128xbf16>
    %cst_70 = arith.constant dense<0.000000e+00> : vector<8x128xf32>
    %158 = tpu.matmul %0, %157, %cst_70 {dimension_numbers = #tpu.dot_dimension_numbers<[1], [0], [0], [1], [0, 0, 1, 1], [], []>} : vector<8x16xbf16>, vector<16x128xbf16>, vector<8x128xf32> -> vector<8x128xf32>
    %159 = arith.truncf %158 : vector<8x128xf32> to vector<8x128xbf16>
    %160 = vector.extract_strided_slice %2 {offsets = [224, 0], sizes = [16, 128], strides = [1, 1]} : vector<256x128xbf16> to vector<16x128xbf16>
    %161 = vector.extract_strided_slice %2 {offsets = [240, 0], sizes = [16, 128], strides = [1, 1]} : vector<256x128xbf16> to vector<16x128xbf16>
    %162 = arith.addf %160, %161 : vector<16x128xbf16>
    %cst_71 = arith.constant dense<0.000000e+00> : vector<8x128xf32>
    %163 = tpu.matmul %0, %162, %cst_71 {dimension_numbers = #tpu.dot_dimension_numbers<[1], [0], [0], [1], [0, 0, 1, 1], [], []>} : vector<8x16xbf16>, vector<16x128xbf16>, vector<8x128xf32> -> vector<8x128xf32>
    %164 = arith.truncf %163 : vector<8x128xf32> to vector<8x128xbf16>
    %165 = tpu.concatenate %129, %134, %139, %144, %149, %154, %159, %164 in 0 : vector<8x128xbf16>, vector<8x128xbf16>, vector<8x128xbf16>, vector<8x128xbf16>, vector<8x128xbf16>, vector<8x128xbf16>, vector<8x128xbf16>, vector<8x128xbf16> -> vector<64x128xbf16>
    %c0_72 = arith.constant 0 : index
    %c0_73 = arith.constant 0 : index
    %166 = vector.load %arg12[%c0_72, %c0_73] : memref<128x128xbf16, #tpu.memory_space<vmem>>, vector<128x128xbf16>
    %cst_74 = arith.constant dense<0.000000e+00> : vector<64x128xf32>
    %167 = tpu.matmul %165, %166, %cst_74 {dimension_numbers = #tpu.dot_dimension_numbers<[1], [0], [0], [1], [0, 0, 1, 1], [], []>} : vector<64x128xbf16>, vector<128x128xbf16>, vector<64x128xf32> -> vector<64x128xf32>
    %c0_75 = arith.constant 0 : index
    %c0_76 = arith.constant 0 : index
    %168 = vector.load %arg13[%c0_75, %c0_76] : memref<1x128xf32, #tpu.memory_space<vmem>>, vector<1x128xf32>
    %169 = vector.broadcast %168 : vector<1x128xf32> to vector<64x128xf32>
    %170 = arith.mulf %167, %169 : vector<64x128xf32>
    %c0_77 = arith.constant 0 : index
    %c0_78 = arith.constant 0 : index
    %171 = vector.load %arg14[%c0_77, %c0_78] : memref<1x128xf32, #tpu.memory_space<vmem>>, vector<1x128xf32>
    %172 = vector.broadcast %171 : vector<1x128xf32> to vector<64x128xf32>
    %173 = arith.addf %170, %172 : vector<64x128xf32>
    %174 = arith.addf %124, %173 : vector<64x128xf32>
    %cst_79 = arith.constant 0.000000e+00 : f32
    %175 = vector.broadcast %cst_79 : f32 to vector<64x128xf32>
    %176 = arith.maximumf %174, %175 : vector<64x128xf32>
    %177 = arith.truncf %176 : vector<64x128xf32> to vector<64x128xbf16>
    %c0_80 = arith.constant 0 : index
    %c0_81 = arith.constant 0 : index
    %c0_82 = arith.constant 0 : index
    %178 = vector.load %arg15[%c0_80, %c0_81, %c0_82] : memref<1x64x128xbf16, #tpu.memory_space<vmem>>, vector<1x64x128xbf16>
    %179 = vector.shape_cast %178 : vector<1x64x128xbf16> to vector<64x128xbf16>
    %180 = vector.shape_cast %177 : vector<64x128xbf16> to vector<1x64x128xbf16>
    tpu.vector_store %arg15[%c0_80, %c0_81, %c0_82], %180 {strides = array<i32>} : memref<1x64x128xbf16, #tpu.memory_space<vmem>>, vector<1x64x128xbf16>,
    return
  }
  func.func @transform_0(%arg0: i32) -> (i32, i32, i32) {
    %c0_i32 = arith.constant 0 : i32
    %c0_i32_0 = arith.constant 0 : i32
    %c0_i32_1 = arith.constant 0 : i32
    return %arg0, %c0_i32, %c0_i32_0 : i32, i32, i32
  }
  func.func @transform_1(%arg0: i32) -> (i32, i32) {
    %c0_i32 = arith.constant 0 : i32
    %c0_i32_0 = arith.constant 0 : i32
    %c0_i32_1 = arith.constant 0 : i32
    return %c0_i32, %c0_i32_0 : i32, i32
  }
  func.func @transform_2(%arg0: i32) -> (i32, i32) {
    %c0_i32 = arith.constant 0 : i32
    %c0_i32_0 = arith.constant 0 : i32
    %c0_i32_1 = arith.constant 0 : i32
    return %c0_i32, %c0_i32_0 : i32, i32
  }
  func.func @transform_3(%arg0: i32) -> (i32, i32) {
    %c0_i32 = arith.constant 0 : i32
    %c0_i32_0 = arith.constant 0 : i32
    %c0_i32_1 = arith.constant 0 : i32
    return %c0_i32, %c0_i32_0 : i32, i32
  }
  func.func @transform_4(%arg0: i32) -> (i32, i32) {
    %c0_i32 = arith.constant 0 : i32
    %c0_i32_0 = arith.constant 0 : i32
    %c0_i32_1 = arith.constant 0 : i32
    return %c0_i32, %c0_i32_0 : i32, i32
  }
  func.func @transform_5(%arg0: i32) -> (i32, i32) {
    %c0_i32 = arith.constant 0 : i32
    %c0_i32_0 = arith.constant 0 : i32
    %c0_i32_1 = arith.constant 0 : i32
    return %c0_i32, %c0_i32_0 : i32, i32
  }
  func.func @transform_6(%arg0: i32) -> (i32, i32) {
    %c0_i32 = arith.constant 0 : i32
    %c0_i32_0 = arith.constant 0 : i32
    %c0_i32_1 = arith.constant 0 : i32
    return %c0_i32, %c0_i32_0 : i32, i32
  }
  func.func @transform_7(%arg0: i32) -> (i32, i32) {
    %c0_i32 = arith.constant 0 : i32
    %c0_i32_0 = arith.constant 0 : i32
    %c0_i32_1 = arith.constant 0 : i32
    return %c0_i32, %c0_i32_0 : i32, i32
  }
  func.func @transform_8(%arg0: i32) -> (i32, i32) {
    %c0_i32 = arith.constant 0 : i32
    %c0_i32_0 = arith.constant 0 : i32
    %c0_i32_1 = arith.constant 0 : i32
    return %c0_i32, %c0_i32_0 : i32, i32
  }
  func.func @transform_9(%arg0: i32) -> (i32, i32) {
    %c0_i32 = arith.constant 0 : i32
    %c0_i32_0 = arith.constant 0 : i32
    %c0_i32_1 = arith.constant 0 : i32
    return %c0_i32, %c0_i32_0 : i32, i32
  }
  func.func @transform_10(%arg0: i32) -> (i32, i32) {
    %c0_i32 = arith.constant 0 : i32
    %c0_i32_0 = arith.constant 0 : i32
    %c0_i32_1 = arith.constant 0 : i32
    return %c0_i32, %c0_i32_0 : i32, i32
  }
  func.func @transform_11(%arg0: i32) -> (i32, i32) {
    %c0_i32 = arith.constant 0 : i32
    %c0_i32_0 = arith.constant 0 : i32
    %c0_i32_1 = arith.constant 0 : i32
    return %c0_i32, %c0_i32_0 : i32, i32
  }
  func.func @transform_12(%arg0: i32) -> (i32, i32) {
    %c0_i32 = arith.constant 0 : i32
    %c0_i32_0 = arith.constant 0 : i32
    %c0_i32_1 = arith.constant 0 : i32
    return %c0_i32, %c0_i32_0 : i32, i32
  }
  func.func @transform_13(%arg0: i32) -> (i32, i32) {
    %c0_i32 = arith.constant 0 : i32
    %c0_i32_0 = arith.constant 0 : i32
    %c0_i32_1 = arith.constant 0 : i32
    return %c0_i32, %c0_i32_0 : i32, i32
  }
  func.func @transform_14(%arg0: i32) -> (i32, i32, i32) {
    %c0_i32 = arith.constant 0 : i32
    %c0_i32_0 = arith.constant 0 : i32
    %c0_i32_1 = arith.constant 0 : i32
    return %arg0, %c0_i32, %c0_i32_0 : i32, i32, i32
  }
}

</mosaic_0001>

<bundles_post_ra>
// kernel: tpu_custom_call.1
= control target key start
LH: loop header
LB: loop body
LE: loop exit
PB: predicated region body
PF: predicated region fallthrough
CT: control target
= control target key end

     0   :  { %s8479_s0 = inlined_call_operand.hbm [shape: bf16[2,256,128], index: 0, kind: input, shape index: {}]   ;;  %s8480_s1 = inlined_call_operand.hbm [shape: bf16[128,128], index: 1, kind: input, shape index: {}]   ;;  %s8481_s2 = inlined_call_operand.vmem [shape: f32[1,128], index: 2, kind: input, shape index: {}]   ;;  %s8482_s3 = inlined_call_operand.vmem [shape: f32[1,128], index: 3, kind: input, shape index: {}]   ;;  %s8483_s4 = inlined_call_operand.hbm [shape: bf16[1152,128], index: 4, kind: input, shape index: {}]   ;;  %s8484_s5 = inlined_call_operand.vmem [shape: f32[1,128], index: 5, kind: input, shape index: {}]   ;;  %s8485_s6 = inlined_call_operand.vmem [shape: f32[1,128], index: 6, kind: input, shape index: {}]   ;;  %s8486_s7 = inlined_call_operand.hbm [shape: bf16[128,128], index: 7, kind: input, shape index: {}]   ;;  %s8487_s8 = inlined_call_operand.vmem [shape: f32[1,128], index: 8, kind: input, shape index: {}]   ;;  %s8488_s9 = inlined_call_operand.vmem [shape: f32[1,128], index: 9, kind: input, shape index: {}]   ;;  %s8489_s10 = inlined_call_operand.vmem [shape: bf16[8,16], index: 10, kind: input, shape index: {}]   ;;  %s8490_s11 = inlined_call_operand.hbm [shape: bf16[128,128], index: 11, kind: input, shape index: {}]   ;;  %s8491_s12 = inlined_call_operand.vmem [shape: f32[1,128], index: 12, kind: input, shape index: {}]   ;;  %s8492_s13 = inlined_call_operand.vmem [shape: f32[1,128], index: 13, kind: input, shape index: {}]   ;;  %s8493_s14 = inlined_call_operand.hbm [shape: bf16[2,64,128], index: 14, kind: output, shape index: {}]  }
   0x1   :  { %8538 = sst [smem:[#allocation62_spill]] %s8487_s8 }
   0x2   :  { %8539 = sst [smem:[#allocation63_spill]] %s8488_s9 }
   0x3   :  { %8540 = sst [smem:[#allocation64_spill]] %s8489_s10 }
   0x4   :  { %8541 = sst [smem:[#allocation65_spill]] %s8491_s12 }
   0x5   :  { %8542 = sst [smem:[#allocation66_spill]] %s8492_s13 }
   0x6   :  { %8543 = sst [smem:[#allocation67_spill]] %s8493_s14 }
   0x7   :  { %19 = vsyncpa [#allocation4], 0 }
   0x8   :  { %21 = vsyncpa [#allocation4 + $0x1], 0 }
   0x9   :  { %22 = vsyncpa [#allocation7], 0 }
   0xa   :  { %23 = vsyncpa [#allocation10], 0 }
   0xb   :  { %24 = vsyncpa [#allocation5], 0 }
   0xc   :  { %26 = vsyncpa [#allocation5 + $0x1], 0  ;;  %s6615_s29 = smov 0   ;;  %s6617_s30 = smov 0  }
   0xd   :  { %s6619_s15 = smov 0   ;;  %s6621_s16 = smov 0  }
   0xe LB: > { %8544 = sst [smem:[#allocation17_spill]] %s6513_s29  ;;  %s6636_s17 = sadd.s32 4294967295, %s6525_s16   ;;  %s6525_s16 = sphi %s6621_s16, %s8686_s16   ;;  %s6521_s15 = sphi %s6619_s15, %s8685_s15   ;;  %s6517_s30 = sphi %s6617_s30, %s8684_s30   ;;  %s6513_s29 = sphi %s6615_s29, %s8683_s29  }
   0xf   : > { %s5227_s18 = sadd.s32 4294967294, %s6525_s16   ;;  %p52_p0 = scmp.ne.s32.totalorder %s6517_s30, %s6513_s29 }
  0x10   : > { %p8497_p1 = scmp.eq.s32.totalorder %s6636_s17, 0  ;;  %p355_p3 = scmp.eq.s32.totalorder %s5227_s18, 1 }
  0x11   : > { %p5228_p5 = scmp.ge.s32.totalorder %s6525_s16, 1  ;;  %p362_p7 = scmp.lt.s32.totalorder %s6525_s16, 3 }
  0x12   : > { %p6645_p4 = por %p8497_p1, %p52_p0  ;;  %p6650_p6 = por %p355_p3, %p52_p0 }
  0x13   : > { %p6655_p8 = pnand %p5228_p5, %p362_p7  ;;  %s6527_s22 = smov [#allocation6]  }
  0x14   : > { %s8545_s19 = scalar_select %p6645_p4, 1, 0 }
  0x15   : > { %s8546_s20 = scalar_select %p6650_p6, 1, 0 }
  0x16   : > { %s8548_s21 = scalar_select %p6655_p8, 1, 0 }
  0x17   : > { %8547 = sst [smem:[#allocation18_spill]] %s8546_s20  ;;  %s374_s23 = sshll.u32 %s6527_s22, 4  ;;  %s6659_s23 = int_to_ptr.vmem [resolvable:$true] %s374_s23 }
  0x18   : > { %p6088_p9 = pneg %p6655_p8  ;;  %s6528_s25 = smov [#allocation9]  }
  0x19   : > { %s412_s26 = sshll.u32 %s6528_s25, 4  ;;  %s6529_s27 = smov [#allocation8]   ;;  %s6670_s26 = int_to_ptr.vmem [resolvable:$true] %s412_s26 }
  0x1a   : > { %p6666_p11 = pnand %p6088_p9, %p8497_p1  ;;  %s6672_s28 = sshll.u32 %s6529_s27, 4  ;;  %s394_s28 = int_to_ptr.vmem [resolvable:$true] %s6672_s28 }
  0x1b   : > { %s6309_s20 = scalar_lea.hbm %s8480_s1, 1024 }
  0x1c   : > { %p6310_p12 = scmp.ne.s32.totalorder %s8480_s1, %s6309_s20  ;;  %p6682_p13 = pneg %p6666_p11 }
  0x1d   : > { %p6316_p5 = scmp.lt.u32.totalorder %s6309_s20, %s8480_s1 }
  0x1e   : > { %p6312_p0 = pnand %p6682_p13, %p6310_p12 }
  0x20   : > { %p6313_p3 = pneg %p6312_p0 }
  0x22   : > { %p6318_p7 = pnand %p6316_p5, %p6313_p3 }
  0x24   : > { %6321 = shalt.err (!%p6318_p7)
}
  0x25   : > { %s6322_s14 = scalar_lea.vmem %s6659_s23, 1024  ;;  %p6330_p2 = scmp.lt.s32.totalorder %s6659_s23, %s6659_s23 }
  0x26   : > { %p6323_p9 = scmp.ne.s32.totalorder %s6659_s23, %s6322_s14  ;;  %p6331_p6 = scmp.lt.s32.totalorder %s6322_s14, %s6322_s14 }
  0x28   : > { %p6325_p10 = pnand %p6323_p9, %p6682_p13  ;;  %p6332_p12 = por %p6331_p6, %p6330_p2 }
  0x2a   : > { %p6326_p1 = pneg %p6325_p10 }
  0x2c   : > { %p6333_p0 = pnand %p6332_p12, %p6326_p1 }
  0x2e   : > { %6336 = shalt.err (!%p6333_p0)
}
  0x2f   : > { %s6530_s29 = smov 64   ;;  %s6531_s20 = smov 4  }
  0x30   : > { %6091 = dma.hbm_to_vmem [thread:$0]  (!%p6666_p11), %s8480_s1, 1024, %s6659_s23, [#allocation7], %s6530_s29, %s6530_s29, %s6531_s20  }
  0x31   : > { %s6337_s14 = scalar_lea.hbm %s8486_s7, 1024 }
  0x32   : > { %p6338_p1 = scmp.ne.s32.totalorder %s8486_s7, %s6337_s14  ;;  %p6344_p10 = scmp.lt.u32.totalorder %s6337_s14, %s8486_s7 }
  0x34   : > { %p6340_p2 = pnand %p6338_p1, %p6682_p13 }
  0x36   : > { %p6341_p6 = pneg %p6340_p2 }
  0x38   : > { %p6346_p3 = pnand %p6344_p10, %p6341_p6 }
  0x3a   : > { %6349 = shalt.err (!%p6346_p3)
}
  0x3b   : > { %s6350_s23 = scalar_lea.vmem %s6670_s26, 1024  ;;  %p6358_p12 = scmp.lt.s32.totalorder %s6670_s26, %s6670_s26 }
  0x3c   : > { %p6351_p5 = scmp.ne.s32.totalorder %s6670_s26, %s6350_s23  ;;  %p6359_p0 = scmp.lt.s32.totalorder %s6350_s23, %s6350_s23 }
  0x3e   : > { %p6353_p7 = pnand %p6351_p5, %p6682_p13  ;;  %p6360_p1 = por %p6359_p0, %p6358_p12 }
  0x40   : > { %p6354_p9 = pneg %p6353_p7 }
  0x42   : > { %p6361_p2 = pnand %p6360_p1, %p6354_p9 }
  0x44   : > { %6364 = shalt.err (!%p6361_p2)
}
  0x45   : > { %6097 = dma.hbm_to_vmem [thread:$0]  (!%p6666_p11), %s8486_s7, 1024, %s6670_s26, [#allocation10], %s6530_s29, %s6530_s29, %s6531_s20  }
  0x46   : > { %s6365_s18 = scalar_lea.hbm %s8483_s4, 9216 }
  0x47   : > { %p6366_p6 = scmp.ne.s32.totalorder %s8483_s4, %s6365_s18  ;;  %p6372_p5 = scmp.lt.u32.totalorder %s6365_s18, %s8483_s4 }
  0x49   : > { %p6368_p10 = pnand %p6366_p6, %p6682_p13 }
  0x4b   : > { %p6369_p3 = pneg %p6368_p10 }
  0x4d   : > { %p6374_p7 = pnand %p6372_p5, %p6369_p3 }
  0x4f   : > { %6377 = shalt.err (!%p6374_p7)
}
  0x50   : > { %s6378_s23 = scalar_lea.vmem %s394_s28, 9216  ;;  %p6386_p1 = scmp.lt.s32.totalorder %s394_s28, %s394_s28 }
  0x51   : > { %p6379_p9 = scmp.ne.s32.totalorder %s394_s28, %s6378_s23  ;;  %p6387_p2 = scmp.lt.s32.totalorder %s6378_s23, %s6378_s23 }
  0x53   : > { %p6381_p12 = pnand %p6379_p9, %p6682_p13  ;;  %p6388_p4 = por %p6387_p2, %p6386_p1 }
  0x55   : > { %p6382_p0 = pneg %p6381_p12 }
  0x57   : > { %p6389_p8 = pnand %p6388_p4, %p6382_p0 }
  0x59   : > { %6392 = shalt.err (!%p6389_p8)
}
  0x5a   : > { %6094 = dma.hbm_to_vmem [thread:$0]  (!%p6666_p11), %s8483_s4, 9216, %s394_s28, [#allocation7], %s6530_s29, %s6530_s29, %s6531_s20  }
  0x5b   : > { %s6532_s9 = smov [#allocation11]   ;;  %s6393_s22 = scalar_lea.hbm %s8490_s11, 1024 }
  0x5c   : > { %s434_s10 = sshll.u32 %s6532_s9, 4  ;;  %p6394_p4 = scmp.ne.s32.totalorder %s8490_s11, %s6393_s22  ;;  %s435_s10 = int_to_ptr.vmem [resolvable:$true] %s434_s10 }
  0x5d   : > { %p6400_p10 = scmp.lt.u32.totalorder %s6393_s22, %s8490_s11 }
  0x5e   : > { %p6396_p8 = pnand %p6394_p4, %p6682_p13 }
  0x60   : > { %p6397_p6 = pneg %p6396_p8 }
  0x62   : > { %p6402_p3 = pnand %p6400_p10, %p6397_p6 }
  0x64   : > { %6405 = shalt.err (!%p6402_p3)
}
  0x65   : > { %s6406_s28 = scalar_lea.vmem %s435_s10, 1024  ;;  %p6414_p12 = scmp.lt.s32.totalorder %s435_s10, %s435_s10 }
  0x66   : > { %p6407_p5 = scmp.ne.s32.totalorder %s435_s10, %s6406_s28  ;;  %p6415_p0 = scmp.lt.s32.totalorder %s6406_s28, %s6406_s28 }
  0x68   : > { %p6409_p7 = pnand %p6407_p5, %p6682_p13  ;;  %p6416_p1 = por %p6415_p0, %p6414_p12 }
  0x6a   : > { %p6410_p9 = pneg %p6409_p7 }
  0x6c   : > { %p6417_p2 = pnand %p6416_p1, %p6410_p9 }
  0x6e   : > { %6420 = shalt.err (!%p6417_p2)
}
  0x6f   : > { %6100 = dma.hbm_to_vmem [thread:$0]  (!%p6666_p11), %s8490_s11, 1024, %s435_s10, [#allocation10], %s6530_s29, %s6530_s29, %s6531_s20  }
  0x70   : > { %s6776_s13 = sadd.s32 1, %s6525_s16   ;;  %s39_s24 = sadd.s32 1, %s6521_s15 }
  0x71   : > { %s36_s9 = ssub.s32 %s6525_s16, %s6776_s13  ;;  %p46_p13 = scmp.ne.s32.totalorder %s6521_s15, %s6517_s30 }
  0x72   : > { %p37_p4 = scmp.eq.s32.totalorder %s36_s9, 0  ;;  %p47_p8 = scmp.eq.s32.totalorder %s6525_s16, 0 }
  0x73   : > { %p8551_p6 = scmp.eq.s32.totalorder %s6636_s17, 1  ;;  %p6113_p3 = scmp.lt.s32.totalorder %s6525_s16, 2 }
  0x74   : > { %s6792_s18 = scalar_select %p37_p4, %s6521_s15, %s39_s24  }
  0x75   : > { %p6786_p10 = por %p8551_p6, %p46_p13  ;;  %p48_p5 = por %p47_p8, %p46_p13 }
  0x76   : > { %s454_s22 = sand.u32 1, %s6521_s15   ;;  %s5401_s10 = sshll.u32 %s6525_s16, 11 }
  0x77   : > { %s5234_s25 = sshll.u32 %s454_s22, 7  ;;  %s6799_s23 = scalar_lea.hbm %s8479_s0, %s5401_s10 }
  0x78   : > { %s458_s28 = scalar_lea.vmem [#allocation3], %s5234_s25  ;;  %p6803_p11 = pnand %p6113_p3, %p48_p5 }
  0x79   : > { %s465_s26 = sshll.u32 %s458_s28, 4  ;;  %s6807_s24 = scalar_lea.sflag [#allocation4], %s454_s22  ;;  %s6801_s26 = int_to_ptr.vmem [resolvable:$true] %s465_s26 }
  0x7a   : > { %s6421_s9 = scalar_lea.hbm %s6799_s23, 2048  ;;  %p6423_p9 = pneg %p6803_p11 }
  0x7b   : > { %p6422_p7 = scmp.ne.s32.totalorder %s6799_s23, %s6421_s9  ;;  %s6426_s27 = scalar_lea.hbm %s8479_s0, 4096 }
  0x7c   : > { %p6427_p1 = scmp.lt.u32.totalorder %s6799_s23, %s8479_s0  ;;  %p6428_p2 = scmp.lt.u32.totalorder %s6426_s27, %s6421_s9 }
  0x7d   : > { %p6424_p12 = pnand %p6423_p9, %p6422_p7  ;;  %p6430_p4 = scmp.lt.u32.totalorder %s6421_s9, %s6799_s23 }
  0x7e   : > { %p6429_p13 = por %p6428_p2, %p6427_p1 }
  0x7f   : > { %p6425_p0 = pneg %p6424_p12 }
  0x80   : > { %p6431_p8 = por %p6430_p4, %p6429_p13 }
  0x82   : > { %p6432_p6 = pnand %p6431_p8, %p6425_p0 }
  0x84   : > { %6435 = shalt.err (!%p6432_p6)
}
  0x85   : > { %s6436_s22 = scalar_lea.vmem %s6801_s26, 2048  ;;  %s6533_s25 = smov [#allocation3]  }
  0x86   : > { %p6437_p3 = scmp.ne.s32.totalorder %s6801_s26, %s6436_s22  ;;  %s6441_s10 = sshll.u32 %s6533_s25, 4  ;;  %s6442_s10 = int_to_ptr.vmem [resolvable:$false] %s6441_s10 }
  0x87   : > { %s6443_s14 = scalar_lea.vmem %s6442_s10, 4096  ;;  %p6444_p12 = scmp.lt.s32.totalorder %s6801_s26, %s6442_s10 }
  0x88   : > { %p6439_p5 = pnand %p6437_p3, %p6423_p9  ;;  %p6445_p1 = scmp.lt.s32.totalorder %s6443_s14, %s6436_s22 }
  0x8a   : > { %p6440_p7 = pneg %p6439_p5  ;;  %p6446_p2 = por %p6445_p1, %p6444_p12 }
  0x8c   : > { %p6447_p13 = pnand %p6446_p2, %p6440_p7 }
  0x8e   : > { %6450 = shalt.err (!%p6447_p13)
}
  0x8f   : > { %6104 = dma.hbm_to_vmem [thread:$0]  (!%p6803_p11), %s6799_s23, 2048, %s6801_s26, %s6807_s24, %s6530_s29, %s6530_s29, %s6531_s20  }
  0x90   : > { %p8554_p9 = scmp.ne.s32.totalorder %s8548_s21, 0 }
  0x92   : > { %477 = sbr.rel (%p8554_p9) target bundleno = 1930 (0x78a), region = 76 }
  0x99   : > { %s6841_s9 = sand.u32 1, %s6517_s30   ;;  %p8555_p0 = scmp.ne.s32.totalorder %s8545_s19, 0 }
  0x9a   : > { %s5238_s27 = sshll.u32 %s6841_s9, 7  ;;  %s480_s28 = scalar_lea.sflag [#allocation4], %s6841_s9 }
  0x9b   : > { %s6845_s22 = scalar_lea.vmem [#allocation3], %s5238_s27 }
  0x9c   : > { %6496 = dma.done.wait (%p8555_p0), %s480_s28, 2048  }
  0x9d   : > { %6498 = vsyncadd (%p8555_p0), %s480_s28, 4294965248  ;;  %p8556_p11 = scmp.eq.s32.totalorder %s6636_s17, 0 }
  0x9f   : > { %6500 = dma.done.wait (%p8556_p11), [#allocation7], 10240   ;;  %p8557_p4 = pmov %p8556_p11 }
  0xa1   : > { %6502 = vsyncadd (%p8557_p4), [#allocation7], 4294957056  ;;  %p8558_p8 = pmov %p8557_p4 }
  0xa2   : > { %p8559_p6 = pmov %p8557_p4 }
  0xa3   : > { %6504 = dma.done.wait (%p8558_p8), [#allocation10], 2048  }
  0xa4   : > { %6506 = vsyncadd (%p8559_p6), [#allocation10], 4294965248  ;;  %v6534_v0 = vmov 0   ;;  %v6162_v1 = vld [vmem:[#allocation6] sm:$0xff]   ;;  %v6163_v2 = vld [vmem:[#allocation6 + $0x8] sm:$0xff]   ;;  %vm1381_vm1 = vcmask 1046528  }
  0xa5   : > { %1025 = vst [vmem:[#allocation2] sm:$0xff] %v6534_v0  ;;  %1026 = vst [vmem:[#allocation2 + $0x8] sm:$0xff] %v6534_v0  ;;  %2772 = vmatprep.subr.bf16.mxu1 %v6534_v0  ;;  %5543 = vmatprep.subr.bf16.mxu0 %v6162_v1  ;;  %v6164_v3 = vld [vmem:[#allocation6 + $0x10] sm:$0xff]   ;;  %v6165_v4 = vld [vmem:[#allocation6 + $0x18] sm:$0xff]   ;;  %vm1171_vm0 = vsmask.f32 7424 }
  0xa6   : > { %1027 = vst [vmem:[#allocation2 + $0x10] sm:$0xff] %v6534_v0  ;;  %1028 = vst [vmem:[#allocation2 + $0x18] sm:$0xff] %v6534_v0  ;;  %5544 = vmatpush3.bf16.msra.mxu0 %v6162_v1  ;;  %v546_v5 = vld [vmem:[%s6845_s22] sm:$0xf]  ;;  %v547_v6 = vld [vmem:[%s6845_s22 + $0x4] sm:$0xf] }
  0xa7   : > { %1029 = vst [vmem:[#allocation2 + $0x20] sm:$0xff] %v6534_v0  ;;  %1030 = vst [vmem:[#allocation2 + $0x28] sm:$0xff] %v6534_v0  ;;  %5545 = vmatprep.subr.bf16.mxu0 %v6163_v2  ;;  %v6884_v7 = vld [vmem:[%s6845_s22 + $0x8] sm:$0xf]  ;;  %v6887_v8 = vld [vmem:[%s6845_s22 + $0xc] sm:$0xf]  ;;  %v5244_v9 = vcombine.low %v546_v5, %v547_v6 }
  0xa8   : > { %1031 = vst [vmem:[#allocation2 + $0x30] sm:$0xff] %v6534_v0  ;;  %1032 = vst [vmem:[#allocation2 + $0x38] sm:$0xff] %v6534_v0  ;;  %v4471_v10 = vadd.bf16 %v6884_v7, %v546_v5  ;;  %v6891_v11 = vld [vmem:[%s6845_s22 + $0x10] sm:$0xf]  ;;  %v6894_v12 = vld [vmem:[%s6845_s22 + $0x14] sm:$0xf]  ;;  %v4472_v14 = vadd.bf16 %v6887_v8, %v547_v6  ;;  %v5245_v62 = vcombine.low %v6884_v7, %v6887_v8 }
  0xa9   : > { %1034 = vst [vmem:[#allocation2 + $0x48] sm:$0xff] %v6534_v0  ;;  %1035 = vst [vmem:[#allocation2 + $0x50] sm:$0xff] %v6534_v0  ;;  %v6166_v13 = vld [vmem:[#allocation6 + $0x20] sm:$0xff]   ;;  %v6898_v15 = vld [vmem:[%s6845_s22 + $0x18] sm:$0xf]  ;;  %5559 = vmatprep.mubr.bf16.mxu0 %v5244_v9  ;;  %v5246_v63 = vcombine.low %v6891_v11, %v6894_v12  ;;  %vm1579_vm4 = vcmask 1045504  }
  0xaa   : > { %1036 = vst [vmem:[#allocation2 + $0x58] sm:$0xff] %v6534_v0  ;;  %1037 = vst [vmem:[#allocation2 + $0x60] sm:$0xff] %v6534_v0  ;;  %5546 = vmatpush3.bf16.msra.mxu0 %v6163_v2  ;;  %v6901_v16 = vld [vmem:[%s6845_s22 + $0x1c] sm:$0xf]  ;;  %v6904_v17 = vld [vmem:[%s6845_s22 + $0x20] sm:$0xf]  ;;  %v6919_v23 = vcombine.low %v4471_v10, %v4472_v14 }
  0xab   : > { %1038 = vst [vmem:[#allocation2 + $0x68] sm:$0xff] %v6534_v0  ;;  %1039 = vst [vmem:[#allocation2 + $0x70] sm:$0xff] %v6534_v0  ;;  %5547 = vmatprep.subr.bf16.mxu0 %v6164_v3  ;;  %v6911_v20 = vld [vmem:[%s6845_s22 + $0x24] sm:$0xf]  ;;  %v6914_v21 = vld [vmem:[%s6845_s22 + $0x28] sm:$0xf]  ;;  %v5247_v5 = vcombine.low %v6898_v15, %v6901_v16 }
  0xac   : > { %1040 = vst [vmem:[#allocation2 + $0x78] sm:$0xff] %v6534_v0  ;;  %1041 = vst [vmem:[#allocation2 + $0x80] sm:$0xff] %v6534_v0  ;;  %v6917_v22 = vld [vmem:[%s6845_s22 + $0x2c] sm:$0xf]  ;;  %v6924_v25 = vld [vmem:[%s6845_s22 + $0x30] sm:$0xf]  ;;  %v5248_v7 = vcombine.low %v6904_v17, %v6911_v20 }
  0xad   : > { %1043 = vst [vmem:[#allocation2 + $0x90] sm:$0xff] %v6534_v0  ;;  %1044 = vst [vmem:[#allocation2 + $0x98] sm:$0xff] %v6534_v0  ;;  %v6927_v26 = vld [vmem:[%s6845_s22 + $0x34] sm:$0xf]  ;;  %v6930_v27 = vld [vmem:[%s6845_s22 + $0x38] sm:$0xf]  ;;  %v5249_v14 = vcombine.low %v6914_v21, %v6917_v22 }
  0xae   : > { %1045 = vst [vmem:[#allocation2 + $0xa0] sm:$0xff] %v6534_v0  ;;  %1046 = vst [vmem:[#allocation2 + $0xa8] sm:$0xff] %v6534_v0  ;;  %5548 = vmatpush3.bf16.msra.mxu0 %v6164_v3  ;;  %v6935_v29 = vld [vmem:[%s6845_s22 + $0x3c] sm:$0xf]  ;;  %v6940_v31 = vld [vmem:[%s6845_s22 + $0x40] sm:$0xf] }
  0xaf   : > { %1047 = vst [vmem:[#allocation2 + $0xb0] sm:$0xff] %v6534_v0  ;;  %8560 = vst [vmem:[#allocation19_spill] sm:$0xff] %v6891_v11  ;;  %5549 = vmatprep.subr.bf16.mxu0 %v6165_v4  ;;  %v6943_v32 = vld [vmem:[%s6845_s22 + $0x44] sm:$0xf]  ;;  %v6167_v33 = vld [vmem:[#allocation6 + $0x28] sm:$0xff]   ;;  %vm6536_vm5 = vmmov 0  }
  0xb0   : > { %8561 = vst [vmem:[#allocation20_spill] sm:$0xff] %v6894_v12  ;;  %8562 = vst [vmem:[#allocation21_spill] sm:$0xff] %v6898_v15  ;;  %v6948_v35 = vld [vmem:[%s6845_s22 + $0x48] sm:$0xf]  ;;  %v6951_v36 = vld [vmem:[%s6845_s22 + $0x4c] sm:$0xf] }
  0xb1   : > { %8563 = vst [vmem:[#allocation22_spill] sm:$0xff] %v6901_v16  ;;  %8564 = vst [vmem:[#allocation23_spill] sm:$0xff] %v6904_v17  ;;  %v6954_v37 = vld [vmem:[%s6845_s22 + $0x50] sm:$0xf]  ;;  %v6961_v40 = vld [vmem:[%s6845_s22 + $0x54] sm:$0xf] }
  0xb2   : > { %8565 = vst [vmem:[#allocation24_spill] sm:$0xff] %v6911_v20  ;;  %8566 = vst [vmem:[#allocation25_spill] sm:$0xff] %v6914_v21  ;;  %5550 = vmatpush3.bf16.msra.mxu0 %v6165_v4  ;;  %v6964_v41 = vld [vmem:[%s6845_s22 + $0x58] sm:$0xf]  ;;  %v6967_v42 = vld [vmem:[%s6845_s22 + $0x5c] sm:$0xf] }
  0xb3   : > { %8567 = vst [vmem:[#allocation26_spill] sm:$0xff] %v6917_v22  ;;  %8568 = vst [vmem:[#allocation27_spill] sm:$0xff] %v6919_v23  ;;  %5551 = vmatprep.subr.bf16.mxu0 %v6166_v13  ;;  %v6974_v45 = vld [vmem:[%s6845_s22 + $0x60] sm:$0xf]  ;;  %v6977_v46 = vld [vmem:[%s6845_s22 + $0x64] sm:$0xf] }
  0xb4   : > { %8569 = vst [vmem:[#allocation28_spill] sm:$0xff] %v6924_v25  ;;  %8570 = vst [vmem:[#allocation29_spill] sm:$0xff] %v6927_v26  ;;  %v6980_v47 = vld [vmem:[%s6845_s22 + $0x68] sm:$0xf]  ;;  %v6983_v48 = vld [vmem:[%s6845_s22 + $0x6c] sm:$0xf] }
  0xb5   : > { %8571 = vst [vmem:[#allocation30_spill] sm:$0xff] %v6930_v27  ;;  %8572 = vst [vmem:[#allocation31_spill] sm:$0xff] %v6935_v29  ;;  %v6988_v50 = vld [vmem:[%s6845_s22 + $0x70] sm:$0xf]  ;;  %v6991_v51 = vld [vmem:[%s6845_s22 + $0x74] sm:$0xf] }
  0xb6   : > { %8573 = vst [vmem:[#allocation32_spill] sm:$0xff] %v6940_v31  ;;  %8574 = vst [vmem:[#allocation33_spill] sm:$0xff] %v6943_v32  ;;  %v6996_v53 = vld [vmem:[%s6845_s22 + $0x78] sm:$0xf]  ;;  %v6999_v54 = vld [vmem:[%s6845_s22 + $0x7c] sm:$0xf]  ;;  %5552 = vmatpush3.bf16.msra.mxu0 %v6166_v13 }
  0xb7   : > { %8575 = vst [vmem:[#allocation34_spill] sm:$0xff] %v6948_v35  ;;  %8576 = vst [vmem:[#allocation35_spill] sm:$0xff] %v6951_v36  ;;  %5553 = vmatprep.subr.bf16.mxu0 %v6167_v33  ;;  %v6168_v57 = vld [vmem:[#allocation6 + $0x30] sm:$0xff]   ;;  %v6188_v58 = vld [vmem:[#allocation8 + $0x80] sm:$0xff]   ;;  %vm1457_vm2 = vsmask.f32 6400 }
  0xb8   : > { %8577 = vst [vmem:[#allocation36_spill] sm:$0xff] %v6954_v37  ;;  %8578 = vst [vmem:[#allocation37_spill] sm:$0xff] %v6961_v40  ;;  %2773 = vmatpush1.bf16.msra.mxu1 %v6188_v58  ;;  %v6190_v59 = vld [vmem:[#allocation8 + $0x88] sm:$0xff]   ;;  %v6169_v60 = vld [vmem:[#allocation6 + $0x38] sm:$0xff]   ;;  %vm1725_vm3 = vsmask.f32 5376 }
  0xb9   : > { %8579 = vst [vmem:[#allocation38_spill] sm:$0xff] %v6964_v41  ;;  %8580 = vst [vmem:[#allocation39_spill] sm:$0xff] %v6967_v42  ;;  %2774 = vmatprep.subr.bf16.mxu1 %v6534_v0  ;;  %v6192_v61 = vld [vmem:[#allocation8 + $0x90] sm:$0xff]   ;;  %v6186_v1 = vld [vmem:[#allocation8] sm:$0xff]   ;;  %vm1937_vm6 = vcmask 1044480   ;;  %s8630_s14 = sld [smem:[#allocation64_spill]] }
  0xba   : > { %8581 = vst [vmem:[#allocation40_spill] sm:$0xff] %v6974_v45  ;;  %8582 = vst [vmem:[#allocation41_spill] sm:$0xff] %v6977_v46  ;;  %5554 = vmatpush3.bf16.msra.mxu0 %v6167_v33  ;;  %v6194_v2 = vld [vmem:[#allocation8 + $0x98] sm:$0xff]   ;;  %v6187_v3 = vld [vmem:[#allocation8 + $0x8] sm:$0xff]   ;;  %vm3716_vm7 = vcmask 130048   ;;  %vm4295_vm9 = vcmask 1043456  }
  0xbb   : > { %8583 = vst [vmem:[#allocation42_spill] sm:$0xff] %v6980_v47  ;;  %8584 = vst [vmem:[#allocation43_spill] sm:$0xff] %v6983_v48  ;;  %5555 = vmatprep.subr.bf16.mxu0 %v6168_v57  ;;  %v6196_v4 = vld [vmem:[#allocation8 + $0xa0] sm:$0xff]   ;;  %v6189_v6 = vld [vmem:[#allocation8 + $0x10] sm:$0xff]   ;;  %vm3777_vm8 = vsmask.f32 4352 }
  0xbc   : > { %8585 = vst [vmem:[#allocation44_spill] sm:$0xff] %v6988_v50  ;;  %8586 = vst [vmem:[#allocation45_spill] sm:$0xff] %v6991_v51  ;;  %2775 = vmatpush1.bf16.msra.mxu1 %v6190_v59  ;;  %v6198_v8 = vld [vmem:[#allocation8 + $0xa8] sm:$0xff]   ;;  %v6191_v9 = vld [vmem:[#allocation8 + $0x18] sm:$0xff]   ;;  %s8674_s22 = sld [smem:[#allocation62_spill]]  ;;  %s8675_s29 = sld [smem:[#allocation65_spill]] }
  0xbd   : > { %8587 = vst [vmem:[#allocation46_spill] sm:$0xff] %v6996_v53  ;;  %8588 = vst [vmem:[#allocation47_spill] sm:$0xff] %v6999_v54  ;;  %2776 = vmatprep.subr.bf16.mxu1 %v6534_v0  ;;  %v6200_v10 = vld [vmem:[#allocation8 + $0xb0] sm:$0xff]   ;;  %v6193_v13 = vld [vmem:[#allocation8 + $0x20] sm:$0xff]   ;;  %s8676_s26 = sld [smem:[#allocation63_spill]]  ;;  %s8677_s25 = sld [smem:[#allocation66_spill]] }
  0xbe   : > { %5556 = vmatpush3.bf16.msra.mxu0 %v6168_v57  ;;  %v6202_v33 = vld [vmem:[#allocation8 + $0xb8] sm:$0xff]   ;;  %v5250_v57 = vcombine.low %v6924_v25, %v6927_v26  ;;  %v6195_v58 = vld [vmem:[#allocation8 + $0x28] sm:$0xff]   ;;  %v6204_v59 = vld [vmem:[#allocation8 + $0xc0] sm:$0xff]   ;;  %s5243_s10 = sshll.u32 %s6841_s9, 5  ;;  %s5410_s28 = sshll.u32 %s6636_s17, 9 }
  0xbf   : > { %5557 = vmatprep.subr.bf16.mxu0 %v6169_v60  ;;  %v6219_v34 = vld [vmem:[#allocation8 + $0x108] sm:$0xff]   ;;  %s8678_s21 = sld [smem:[#allocation67_spill]]  ;;  %s5103_s20 = scalar_lea.sflag [#allocation5], %s6841_s9 }
  0xc0   : > { %2777 = vmatpush1.bf16.msra.mxu1 %v6192_v61  ;;  %v5251_v61 = vcombine.low %v6930_v27, %v6935_v29  ;;  %s6537_s23 = smov [#allocation12]  }
  0xc1   : > { %2778 = vmatprep.subr.bf16.mxu1 %v6534_v0 }
  0xc2   : > { %5558 = vmatpush3.bf16.msra.mxu0 %v6169_v60  ;;  %v6197_v60 = vld [vmem:[#allocation8 + $0x30] sm:$0xff]  }
  0xc3   : > { %2576 = vmatprep.subr.bf16.mxu0 %v6534_v0 }
  0xc4   : > { %2779 = vmatpush1.bf16.msra.mxu1 %v6194_v2  ;;  %v6201_v2 = vld [vmem:[#allocation8 + $0x40] sm:$0xff]  }
  0xc5   : > { %5560 = vmatmul.mubr.bf16.vlgmr.msra.gmra.mrb[0].mxu0 %v5245_v62  ;;  %2780 = vmatprep.subr.bf16.mxu1 %v6534_v0  ;;  %v6206_v62 = vld [vmem:[#allocation8 + $0xc8] sm:$0xff]  }
  0xc6   : > { %5563 = vmatprep.mubr.bf16.mxu0 %v5246_v63  ;;  %2577 = vmatpush1.bf16.msra.mxu0 %v6186_v1  ;;  %v5252_v63 = vcombine.low %v6940_v31, %v6943_v32  ;;  %v6199_v1 = vld [vmem:[#allocation8 + $0x38] sm:$0xff]  }
  0xc7   : > { %2578 = vmatprep.subr.bf16.mxu0 %v6534_v0 }
  0xc8   : > { %2781 = vmatpush1.bf16.msra.mxu1 %v6196_v4  ;;  %v5254_v4 = vcombine.low %v6954_v37, %v6961_v40 }
  0xc9   : > { %2782 = vmatprep.subr.bf16.mxu1 %v6534_v0 }
  0xca   : > { %2579 = vmatpush1.bf16.msra.mxu0 %v6187_v3  ;;  %v5253_v3 = vcombine.low %v6948_v35, %v6951_v36 }
  0xcb   : > { %2580 = vmatprep.subr.bf16.mxu0 %v6534_v0 }
  0xcc   : > { %2783 = vmatpush1.bf16.msra.mxu1 %v6198_v8  ;;  %v5256_v8 = vcombine.low %v6974_v45, %v6977_v46 }
  0xcd   : > { %5564 = vmatmul.mubr.bf16.gmra.mrb[4].mxu0 %v5247_v5  ;;  %2784 = vmatprep.subr.bf16.mxu1 %v6534_v0  ;;  %v6203_v5 = vld [vmem:[#allocation8 + $0x48] sm:$0xff]  }
  0xce   : > { %5567 = vmatprep.mubr.bf16.mxu0 %v5248_v7  ;;  %2581 = vmatpush1.bf16.msra.mxu0 %v6189_v6  ;;  %v6205_v6 = vld [vmem:[#allocation8 + $0x50] sm:$0xff]   ;;  %v5255_v7 = vcombine.low %v6964_v41, %v6967_v42 }
  0xcf   : > { %2582 = vmatprep.subr.bf16.mxu0 %v6534_v0 }
  0xd0   : > { %2785 = vmatpush1.bf16.msra.mxu1 %v6200_v10  ;;  %v5258_v10 = vcombine.low %v6988_v50, %v6991_v51  ;;  %v6243_v51 = vld [vmem:[#allocation8 + $0x1e8] sm:$0xff]  }
  0xd1   : > { %2786 = vmatprep.subr.bf16.mxu1 %v6534_v0 }
  0xd2   : > { %2583 = vmatpush1.bf16.msra.mxu0 %v6191_v9  ;;  %v5257_v9 = vcombine.low %v6980_v47, %v6983_v48 }
  0xd3   : > { %2584 = vmatprep.subr.bf16.mxu0 %v6534_v0 }
  0xd4   : > { %2787 = vmatpush1.bf16.msra.mxu1 %v6202_v33  ;;  %v6208_v33 = vld [vmem:[#allocation8 + $0xd0] sm:$0xff]  }
  0xd5   : > { %5568 = vmatmul.mubr.bf16.gmra.mrb[8].mxu0 %v5249_v14  ;;  %2788 = vmatprep.subr.bf16.mxu1 %v6534_v0  ;;  %v6207_v14 = vld [vmem:[#allocation8 + $0x58] sm:$0xff]  }
  0xd6   : > { %5571 = vmatprep.mubr.bf16.mxu0 %v5250_v57  ;;  %2585 = vmatpush1.bf16.msra.mxu0 %v6193_v13  ;;  %v5259_v13 = vcombine.low %v6996_v53, %v6999_v54  ;;  %v6209_v57 = vld [vmem:[#allocation8 + $0x60] sm:$0xff]  }
  0xd7   : > { %2586 = vmatprep.subr.bf16.mxu0 %v6534_v0 }
  0xd8   : > { %2789 = vmatpush1.bf16.msra.mxu1 %v6204_v59  ;;  %v6211_v59 = vld [vmem:[#allocation8 + $0x68] sm:$0xff]  }
  0xd9   : > { %2790 = vmatprep.subr.bf16.mxu1 %v6534_v0 }
  0xda   : > { %2587 = vmatpush1.bf16.msra.mxu0 %v6195_v58  ;;  %v6210_v58 = vld [vmem:[#allocation8 + $0xd8] sm:$0xff]  }
  0xdb   : > { %2588 = vmatprep.subr.bf16.mxu0 %v6534_v0 }
  0xdc   : > { %2791 = vmatpush1.bf16.msra.mxu1 %v6206_v62  ;;  %v6214_v62 = vld [vmem:[#allocation8 + $0xe8] sm:$0xff]  }
  0xdd   : > { %5572 = vmatmul.mubr.bf16.gmra.mrb[12].mxu0 %v5251_v61  ;;  %2792 = vmatprep.subr.bf16.mxu1 %v6534_v0  ;;  %v6213_v61 = vld [vmem:[#allocation8 + $0x70] sm:$0xff]  }
  0xde   : > { %5575 = vmatprep.mubr.bf16.mxu0 %v5252_v63  ;;  %2589 = vmatpush1.bf16.msra.mxu0 %v6197_v60  ;;  %v6212_v60 = vld [vmem:[#allocation8 + $0xe0] sm:$0xff]   ;;  %v7065_v63 = vrot.slane %v6534_v0, 1 }
  0xdf   : > { %2590 = vmatprep.subr.bf16.mxu0 %v6534_v0 }
  0xe0   : > { %2793 = vmatpush1.bf16.msra.mxu1 %v6208_v33 }
  0xe1   : > { %2794 = vmatprep.subr.bf16.mxu1 %v6534_v0 }
  0xe2   : > { %2591 = vmatpush1.bf16.msra.mxu0 %v6199_v1  ;;  %v6215_v1 = vld [vmem:[#allocation8 + $0x78] sm:$0xff]  }
  0xe3   : > { %2592 = vmatprep.subr.bf16.mxu0 %v6534_v0 }
  0xe4   : > { %2795 = vmatpush1.bf16.msra.mxu1 %v6210_v58 }
  0xe5   : > { %5576 = vmatmul.mubr.bf16.gmra.mrb[16].mxu0 %v5253_v3  ;;  %2796 = vmatprep.subr.bf16.mxu1 %v6534_v0  ;;  %v6217_v3 = vld [vmem:[#allocation8 + $0xf8] sm:$0xff]  }
  0xe6   : > { %5579 = vmatprep.mubr.bf16.mxu0 %v5254_v4  ;;  %2593 = vmatpush1.bf16.msra.mxu0 %v6201_v2  ;;  %v6216_v2 = vld [vmem:[#allocation8 + $0xf0] sm:$0xff]   ;;  %v6222_v4 = vld [vmem:[#allocation8 + $0x180] sm:$0xff]  }
  0xe7   : > { %2594 = vmatprep.subr.bf16.mxu0 %v6534_v0 }
  0xe8   : > { %2797 = vmatpush1.bf16.msra.mxu1 %v6212_v60 }
  0xe9   : > { %2798 = vmatprep.subr.bf16.mxu1 %v6534_v0 }
  0xea   : > { %2595 = vmatpush1.bf16.msra.mxu0 %v6203_v5  ;;  %v7076_v5 = vld [vmem:[%s8481_s2] ss:$0 sm:$0xff] }
  0xeb   : > { %2596 = vmatprep.subr.bf16.mxu0 %v6534_v0 }
  0xec   : > { %2799 = vmatpush1.bf16.msra.mxu1 %v6214_v62  ;;  %v6225_v62 = vld [vmem:[#allocation8 + $0x190] sm:$0xff]  }
  0xed   : > { %5580 = vmatmul.mubr.bf16.gmra.mrb[20].mxu0 %v5255_v7  ;;  %2800 = vmatprep.subr.bf16.mxu1 %v6534_v0 }
  0xee   : > { %5583 = vmatprep.mubr.bf16.mxu0 %v5256_v8  ;;  %2597 = vmatpush1.bf16.msra.mxu0 %v6205_v6  ;;  %v6224_v6 = vld [vmem:[#allocation8 + $0x188] sm:$0xff]  }
  0xef   : > { %2598 = vmatprep.subr.bf16.mxu0 %v6534_v0  ;;  %v7081_v8 = vld [vmem:[%s8482_s3] ss:$0 sm:$0xff] }
  0xf0   : > { %2801 = vmatpush1.bf16.msra.mxu1 %v6216_v2 }
  0xf1   : > { %2802 = vmatprep.subr.bf16.mxu1 %v6534_v0 }
  0xf2   : > { %2599 = vmatpush1.bf16.msra.mxu0 %v6207_v14 }
  0xf3   : > { %2600 = vmatprep.subr.bf16.mxu0 %v6534_v0 }
  0xf4   : > { %2803 = vmatpush1.bf16.msra.mxu1 %v6217_v3 }
  0xf5   : > { %5584 = vmatmul.mubr.bf16.gmra.mrb[24].mxu0 %v5257_v9  ;;  %2968 = vmatprep.subr.bf16.mxu1 %v6534_v0 }
  0xf6   : > { %5587 = vmatprep.mubr.bf16.mxu0 %v5258_v10  ;;  %2601 = vmatpush1.bf16.msra.mxu0 %v6209_v57 }
  0xf7   : > { %2602 = vmatprep.subr.bf16.mxu0 %v6534_v0 }
  0xfa   : > { %2603 = vmatpush1.bf16.msra.mxu0 %v6211_v59 }
  0xfb   : > { %2604 = vmatprep.subr.bf16.mxu0 %v6534_v0 }
  0xfd   : > { %5588 = vmatmul.mubr.bf16.gmra.mrb[28].mxu0 %v5259_v13 }
  0xfe   : > { %2605 = vmatpush1.bf16.msra.mxu0 %v6213_v61  ;;  %2608 = vmatprep.mubr.bf16.mxu0 %v7065_v63 }
  0xff   : > { %2606 = vmatprep.subr.bf16.mxu0 %v6534_v0 }
 0x102   : > { %2607 = vmatpush1.bf16.msra.mxu0 %v6215_v1 }
 0x103   : > { %3164 = vmatprep.subr.bf16.mxu0 %v6534_v0 }
 0x105   : > { %2609 = vmatmul.mubr.bf16.vlgmr.msra.gmra.mrb[32].mxu0 %v6534_v0 }
 0x106   : > { %3165 = vmatpush1.bf16.msra.mxu0 %v6222_v4  ;;  %v6226_v4 = vld [vmem:[#allocation8 + $0x198] sm:$0xff]  }
 0x107   : > { %3166 = vmatprep.subr.bf16.mxu0 %v6534_v0 }
 0x10a   : > { %3167 = vmatpush1.bf16.msra.mxu0 %v6224_v6 }
 0x10b   : > { %3168 = vmatprep.subr.bf16.mxu0 %v6534_v0 }
 0x10e   : > { %3169 = vmatpush1.bf16.msra.mxu0 %v6225_v62 }
 0x10f   : > { %3170 = vmatprep.subr.bf16.mxu0 %v6534_v0 }
 0x112   : > { %3171 = vmatpush1.bf16.msra.mxu0 %v6226_v4  ;;  %v6229_v4 = vld [vmem:[#allocation8 + $0x1a8] sm:$0xff]  }
 0x113   : > { %3172 = vmatprep.subr.bf16.mxu0 %v6534_v0 }
 0x198   : > { %v5561_v7 = vpop.f32.mrb[0].mxu0 }
 0x199   : > { %v908_v9 = vmul.f32 %v5561_v7, %v7076_v5  ;;  %v772_v10 = vpop.f32.mrb[1].mxu0 }
 0x19a   : > { %v906_v13 = vmul.f32 %v7076_v5, %v772_v10  ;;  %v5562_v14 = vpop.f32.mrb[2].mxu0 }
 0x19b   : > { %v947_v33 = vadd.f32 %v7081_v8, %v908_v9  ;;  %v909_v57 = vmul.f32 %v5562_v14, %v7076_v5  ;;  %v775_v58 = vpop.f32.mrb[3].mxu0 }
 0x19c   : > { %v945_v59 = vadd.f32 %v7081_v8, %v906_v13  ;;  %v907_v60 = vmul.f32 %v7076_v5, %v775_v58 }
 0x19d   : > { %v948_v61 = vadd.f32 %v7081_v8, %v909_v57  ;;  %v979_v2 = vmax.f32 %v947_v33, 0.0 }
 0x19e   : > { %v946_v1 = vadd.f32 %v7081_v8, %v907_v60  ;;  %v977_v7 = vmax.f32 %v945_v59, 0.0 }
 0x19f   : > { %v980_v3 = vmax.f32 %v948_v61, 0.0 }
 0x1a0   : > { %v978_v9 = vmax.f32 %v946_v1, 0.0  ;;  %v5565_v10 = vpop.f32.mrb[4].mxu0 }
 0x1a1   : > { %v1010_v6 = vpack.c.bf16 %v980_v3, %v979_v2  ;;  %v912_v13 = vmul.f32 %v5565_v10, %v7076_v5  ;;  %v788_v14 = vpop.f32.mrb[5].mxu0 }
 0x1a2   : > { %v1009_v58 = vpack.c.bf16 %v978_v9, %v977_v7  ;;  %v910_v55 = vmul.f32 %v7076_v5, %v788_v14  ;;  %v5566_v57 = vpop.f32.mrb[6].mxu0  ;;  %v6228_v7 = vld [vmem:[#allocation8 + $0x1a0] sm:$0xff]  }
 0x1a3   : > { %v1054_v56 = vrot.slane %v1010_v6, 4  ;;  %v951_v60 = vadd.f32 %v7081_v8, %v912_v13  ;;  %v913_v33 = vmul.f32 %v5566_v57, %v7076_v5  ;;  %v791_v61 = vpop.f32.mrb[7].mxu0  ;;  %v7103_v13 = vld [vmem:[#allocation2 + $0x8] sm:$0xfe]  ;;  %3173 = vmatpush1.bf16.msra.mxu0 %v6228_v7 }
 0x1a4   : > { %v1049_v59 = vrot.slane %v1009_v58, 5  ;;  %v949_v62 = vadd.f32 %v7081_v8, %v910_v55  ;;  %v911_v1 = vmul.f32 %v7076_v5, %v791_v61  ;;  %v1142_v58 = vld [vmem:[#allocation2] sm:$0xfe]  ;;  %3174 = vmatprep.subr.bf16.mxu0 %v6534_v0 }
 0x1a5   : > { %1056 = vst [vmem:[#allocation2 + $0x20] ss:$-4 sps:$4 sm:$0xff] %v1054_v56   ;;  %v983_v2 = vmax.f32 %v951_v60, 0.0  ;;  %v952_v3 = vadd.f32 %v7081_v8, %v913_v33  ;;  %v1382_v49 = vrot.slane %v1142_v58, 1 }
 0x1a6   : > { %1051 = vst [vmem:[#allocation2 + $0x10] sm:$0xf8] %v1049_v59  ;;  %1052 = vst [vmem:[#allocation2 + $0x18] sm:$0x7] %v1049_v59  ;;  %v981_v9 = vmax.f32 %v949_v62, 0.0  ;;  %v950_v10 = vadd.f32 %v7081_v8, %v911_v1  ;;  %v1447_v62 = vrot.slane %v7103_v13, 1 }
 0x1a7   : > { %v984_v6 = vmax.f32 %v952_v3, 0.0  ;;  %3175 = vmatpush1.bf16.msra.mxu0 %v6229_v4 }
 0x1a8   : > { %v982_v55 = vmax.f32 %v950_v10, 0.0  ;;  %v5569_v14 = vpop.f32.mrb[8].mxu0  ;;  %3176 = vmatprep.subr.bf16.mxu0 %v6534_v0 }
 0x1a9   : > { %v1012_v56 = vpack.c.bf16 %v984_v6, %v983_v2  ;;  %v916_v57 = vmul.f32 %v5569_v14, %v7076_v5  ;;  %v804_v60 = vpop.f32.mrb[9].mxu0 }
 0x1aa   : > { %v1011_v33 = vpack.c.bf16 %v982_v55, %v981_v9  ;;  %v914_v61 = vmul.f32 %v7076_v5, %v804_v60  ;;  %v5570_v59 = vpop.f32.mrb[10].mxu0 }
 0x1ab   : > { %v1064_v1 = vrot.slane %v1012_v56, 2  ;;  %v955_v3 = vadd.f32 %v7081_v8, %v916_v57  ;;  %v917_v7 = vmul.f32 %v5570_v59, %v7076_v5  ;;  %v807_v10 = vpop.f32.mrb[11].mxu0  ;;  %v6230_v57 = vld [vmem:[#allocation8 + $0x1b0] sm:$0xff]  }
 0x1ac   : > { %v1059_v52 = vrot.slane %v1011_v33, 3  ;;  %v953_v2 = vadd.f32 %v7081_v8, %v914_v61  ;;  %v915_v6 = vmul.f32 %v7076_v5, %v807_v10  ;;  %v1384_v61 = vsel %vm1381_vm1, %v1382_v49, %v7065_v63  ;;  %3177 = vmatpush1.bf16.msra.mxu0 %v6230_v57 }
 0x1ad   : > { %1066 = vst [vmem:[#allocation2 + $0x28] sm:$0xc0] %v1064_v1  ;;  %1067 = vst [vmem:[#allocation2 + $0x30] sm:$0x3f] %v1064_v1  ;;  %v987_v9 = vmax.f32 %v955_v3, 0.0  ;;  %v956_v55 = vadd.f32 %v7081_v8, %v917_v7  ;;  %v7115_v14 = vld [vmem:[#allocation2 + $0x10] sm:$0xff] }
 0x1ae   : > { %v7117_v56 = vld [vmem:[#allocation2 + $0x18] sm:$0xff]  ;;  %1061 = vst [vmem:[#allocation2 + $0x20] sm:$0xe0] %v1059_v52  ;;  %1062 = vst [vmem:[#allocation2 + $0x28] sm:$0x1f] %v1059_v52  ;;  %v985_v4 = vmax.f32 %v953_v2, 0.0  ;;  %v954_v58 = vadd.f32 %v7081_v8, %v915_v6 }
 0x1af   : > { %v7121_v60 = vrot.slane %v7115_v14, 1  ;;  %v8501_v0 = vshll.u32 %v7115_v14, 16  ;;  %v988_v33 = vmax.f32 %v956_v55, 0.0  ;;  %v1387_v59 = vrot.slane %v7117_v56, 1  ;;  %v6218_v6 = vld [vmem:[#allocation8 + $0x100] sm:$0xff]   ;;  %v7135_v55 = vld [vmem:[#allocation2] sm:$0xff] }
 0x1b0   : > { %v7128_v1 = vshll.u32 %v7117_v56, 16  ;;  %v986_v3 = vmax.f32 %v954_v58, 0.0  ;;  %v5573_v7 = vpop.f32.mrb[12].mxu0  ;;  %v8500_v2 = vshrl.u32 %v7115_v14, 16  ;;  %3178 = vmatprep.subr.bf16.mxu0 %v7135_v55 }
 0x1b1   : > { %v1448_v52 = vsel %vm1381_vm1, %v1447_v62, %v7121_v60  ;;  %v1190_v10 = vrot.slane %v8501_v0, 1  ;;  %v7138_v49 = vpack.c.bf16 %v988_v33, %v987_v9  ;;  %v920_v57 = vmul.f32 %v5573_v7, %v7076_v5  ;;  %v820_v58 = vpop.f32.mrb[13].mxu0  ;;  %v6232_v7 = vld [vmem:[#allocation8 + $0x1b8] sm:$0xff]  }
 0x1b2   : > { %2804 = vmatprep.mubr.bf16.mxu1 %v1448_v52  ;;  %v7145_v62 = vsel %vm1381_vm1, %v7121_v60, %v1387_v59  ;;  %v1198_v43 = vrot.slane %v7128_v1, 1  ;;  %v1013_v44 = vpack.c.bf16 %v986_v3, %v985_v4  ;;  %v918_v9 = vmul.f32 %v7076_v5, %v820_v58  ;;  %v5574_v33 = vpop.f32.mrb[14].mxu0  ;;  %3179 = vmatpush1.bf16.msra.mxu0 %v6232_v7 }
 0x1b3   : > { %2805 = vmatmul.mubr.bf16.vlgmr.msra.gmra.mrb[0].mxu1 %v1384_v61  ;;  %v1191_v38 = vsel %vm1171_vm0, %v7065_v63, %v1190_v10  ;;  %v1194_v52 = vor.u32 %v8500_v2, %v1190_v10  ;;  %1073 = vst [vmem:[#allocation2 + $0x40] sm:$0xff] %v7138_v49  ;;  %v959_v39 = vadd.f32 %v7081_v8, %v920_v57  ;;  %v823_v61 = vpop.f32.mrb[15].mxu0  ;;  %v6223_v2 = vld [vmem:[#allocation8 + $0x120] sm:$0xff]   ;;  %v8596_v32 = vshrl.u32 %v7138_v49, 16 }
 0x1b4   : > { %2614 = vmatprep.mubr.bf16.mxu0 %v1191_v38  ;;  %2810 = vmatprep.mubr.bf16.mxu1 %v7145_v62  ;;  %v921_v4 = vmul.f32 %v5574_v33, %v7076_v5  ;;  %v1069_v3 = vrot.slane %v1013_v44, 1  ;;  %v957_v30 = vadd.f32 %v7081_v8, %v918_v9  ;;  %v919_v10 = vmul.f32 %v7076_v5, %v823_v61 }
 0x1b5   : > { %2615 = vmatmul.mubr.bf16.gmra.mrb[36].mxu0 %v7135_v55  ;;  %v1199_v58 = vsel %vm1171_vm0, %v1194_v52, %v1198_v43  ;;  %2969 = vmatpush1.bf16.msra.mxu1 %v6218_v6  ;;  %v991_v24 = vmax.f32 %v959_v39, 0.0  ;;  %v7162_v38 = vld [vmem:[#allocation2 + $0x20] sm:$0xff]  ;;  %v6233_v6 = vld [vmem:[#allocation8 + $0x1c0] sm:$0xff]   ;;  %v7172_v61 = vshrl.u32 %v7117_v56, 16  ;;  %v1386_v28 = vsel %vm1381_vm1, %v7065_v63, %v7121_v60  ;;  %v7189_v60 = vld [vmem:[#allocation2 + $0x28] sm:$0xff] }
 0x1b6   : > { %v960_v57 = vadd.f32 %v7081_v8, %v921_v4  ;;  %2622 = vmatprep.mubr.bf16.mxu0 %v1199_v58  ;;  %2970 = vmatprep.subr.bf16.mxu1 %v7135_v55  ;;  %1071 = vst [vmem:[#allocation2 + $0x30] sm:$0x80] %v1069_v3  ;;  %1072 = vst [vmem:[#allocation2 + $0x38] sm:$0x7f] %v1069_v3  ;;  %v989_v44 = vmax.f32 %v957_v30, 0.0  ;;  %v958_v9 = vadd.f32 %v7081_v8, %v919_v10  ;;  %v6220_v30 = vld [vmem:[#allocation8 + $0x110] sm:$0xff]  }
 0x1b7   : > { %v8502_v33 = vrot.slane %v7162_v38, 1  ;;  %v7168_v52 = vshll.u32 %v7162_v38, 16  ;;  %3180 = vmatprep.subr.bf16.mxu0 %v7135_v55  ;;  %v1490_v36 = vrot.slane %v8596_v32, 1 }
 0x1b8   : > { %v992_v39 = vmax.f32 %v960_v57, 0.0  ;;  %v990_v4 = vmax.f32 %v958_v9, 0.0  ;;  %v5577_v3 = vpop.f32.mrb[16].mxu0  ;;  %3181 = vmatpush1.bf16.msra.mxu0 %v6233_v6 }
 0x1b9   : > { %v1206_v58 = vrot.slane %v7168_v52, 1  ;;  %2971 = vmatpush1.bf16.msra.mxu1 %v6219_v34  ;;  %v924_v7 = vmul.f32 %v5577_v3, %v7076_v5  ;;  %v836_v18 = vpop.f32.mrb[17].mxu0  ;;  %v7185_v9 = vsel %vm1381_vm1, %v1387_v59, %v8502_v33  ;;  %3182 = vmatprep.subr.bf16.mxu0 %v7135_v55 }
 0x1ba   : > { %v1016_v10 = vpack.c.bf16 %v992_v39, %v991_v24  ;;  %2972 = vmatprep.subr.bf16.mxu1 %v7135_v55  ;;  %v1015_v57 = vpack.c.bf16 %v990_v4, %v989_v44  ;;  %v1202_v24 = vor.u32 %v7172_v61, %v1198_v43  ;;  %v5578_v34 = vpop.f32.mrb[18].mxu0  ;;  %v6235_v39 = vld [vmem:[#allocation8 + $0x1c8] sm:$0xff]  }
 0x1bb   : > { %2811 = vmatmul.mubr.bf16.gmra.mrb[4].mxu1 %v1386_v28  ;;  %v963_v44 = vadd.f32 %v7081_v8, %v924_v7  ;;  %v922_v28 = vmul.f32 %v7076_v5, %v836_v18  ;;  %v925_v4 = vmul.f32 %v5578_v34, %v7076_v5  ;;  %v839_v3 = vpop.f32.mrb[19].mxu0 }
 0x1bc   : > { %v1080_v63 = vrot.slane %v1016_v10, 6  ;;  %2818 = vmatprep.mubr.bf16.mxu1 %v7185_v9  ;;  %v1075_v59 = vrot.slane %v1015_v57, 7  ;;  %v1207_v43 = vsel %vm1171_vm0, %v1202_v24, %v1206_v58  ;;  %v923_v6 = vmul.f32 %v7076_v5, %v839_v3  ;;  %v6221_v10 = vld [vmem:[#allocation8 + $0x118] sm:$0xff]   ;;  %3183 = vmatpush1.bf16.msra.mxu0 %v6235_v39 }
 0x1bd   : > { %2623 = vmatmul.mubr.bf16.gmra.mrb[40].mxu0 %v7115_v14  ;;  %2973 = vmatpush1.bf16.msra.mxu1 %v6220_v30  ;;  %v995_v7 = vmax.f32 %v963_v44, 0.0  ;;  %v961_v18 = vadd.f32 %v7081_v8, %v922_v28  ;;  %v964_v34 = vadd.f32 %v7081_v8, %v925_v4  ;;  %v7203_v24 = vshrl.u32 %v7162_v38, 16  ;;  %v6237_v28 = vld [vmem:[#allocation8 + $0x1d0] sm:$0xff]   ;;  %v7212_v0 = vld [vmem:[#allocation2 + $0x30] sm:$0xff] }
 0x1be   : > { %1082 = vst [vmem:[#allocation2 + $0x50] sm:$0xfc] %v1080_v63  ;;  %1083 = vst [vmem:[#allocation2 + $0x58] sm:$0x3] %v1080_v63  ;;  %2630 = vmatprep.mubr.bf16.mxu0 %v1207_v43  ;;  %2974 = vmatprep.subr.bf16.mxu1 %v7135_v55  ;;  %v7206_v30 = vshll.u32 %v7189_v60, 16  ;;  %v962_v63 = vadd.f32 %v7081_v8, %v923_v6  ;;  %v8589_v39 = vrot.slane %v7189_v60, 1 }
 0x1bf   : > { %1077 = vst [vmem:[#allocation2 + $0x48] sm:$0xfe] %v1075_v59  ;;  %1078 = vst [vmem:[#allocation2 + $0x50] sm:$0x1] %v1075_v59  ;;  %v993_v44 = vmax.f32 %v961_v18, 0.0  ;;  %v996_v3 = vmax.f32 %v964_v34, 0.0  ;;  %3184 = vmatprep.subr.bf16.mxu0 %v7135_v55  ;;  %v1210_v4 = vor.u32 %v7203_v24, %v1206_v58 }
 0x1c0   : > { %v1214_v59 = vrot.slane %v7206_v30, 1  ;;  %v994_v43 = vmax.f32 %v962_v63, 0.0  ;;  %v5581_v19 = vpop.f32.mrb[20].mxu0  ;;  %v8590_v58 = vrot.slane %v7162_v38, 1  ;;  %3185 = vmatpush1.bf16.msra.mxu0 %v6237_v28  ;;  %v1474_v40 = vrot.slane %v7203_v24, 1 }
 0x1c1   : > { %2975 = vmatpush1.bf16.msra.mxu1 %v6221_v10  ;;  %v1018_v33 = vpack.c.bf16 %v996_v3, %v995_v7  ;;  %v928_v57 = vmul.f32 %v5581_v19, %v7076_v5  ;;  %v852_v6 = vpop.f32.mrb[21].mxu0  ;;  %3186 = vmatprep.subr.bf16.mxu0 %v7135_v55 }
 0x1c2   : > { %2976 = vmatprep.subr.bf16.mxu1 %v7135_v55  ;;  %v7222_v18 = vsel %vm1381_vm1, %v8590_v58, %v8589_v39  ;;  %v1017_v34 = vpack.c.bf16 %v994_v43, %v993_v44  ;;  %v926_v10 = vmul.f32 %v7076_v5, %v852_v6  ;;  %v5582_v63 = vpop.f32.mrb[22].mxu0  ;;  %v1215_v50 = vsel %vm1171_vm0, %v1210_v4, %v1214_v59  ;;  %v6227_v6 = vld [vmem:[#allocation8 + $0x128] sm:$0xff]  }
 0x1c3   : > { %2819 = vmatmul.mubr.bf16.gmra.mrb[8].mxu1 %v7145_v62  ;;  %v1090_v7 = vrot.slane %v1018_v33, 4  ;;  %v967_v19 = vadd.f32 %v7081_v8, %v928_v57  ;;  %v929_v3 = vmul.f32 %v5582_v63, %v7076_v5  ;;  %v855_v23 = vpop.f32.mrb[23].mxu0  ;;  %v6239_v62 = vld [vmem:[#allocation8 + $0x1d8] sm:$0xff]   ;;  %v7231_v39 = vshll.u32 %v7212_v0, 16  ;;  %v6231_v63 = vld [vmem:[#allocation8 + $0x130] sm:$0xff]  }
 0x1c4   : > { %2826 = vmatprep.mubr.bf16.mxu1 %v7222_v18  ;;  %v1085_v44 = vrot.slane %v1017_v34, 5  ;;  %v965_v43 = vadd.f32 %v7081_v8, %v926_v10  ;;  %v927_v28 = vmul.f32 %v7076_v5, %v855_v23  ;;  %3187 = vmatpush1.bf16.msra.mxu0 %v6239_v62  ;;  %v7241_v34 = vshrl.u32 %v7189_v60, 16 }
 0x1c5   : > { %2631 = vmatmul.mubr.bf16.gmra.mrb[44].mxu0 %v7117_v56  ;;  %2977 = vmatpush1.bf16.msra.mxu1 %v6223_v2  ;;  %1092 = vst [vmem:[#allocation2 + $0x68] ss:$-4 sps:$4 sm:$0xff] %v1090_v7   ;;  %v999_v33 = vmax.f32 %v967_v19, 0.0  ;;  %v968_v57 = vadd.f32 %v7081_v8, %v929_v3  ;;  %v8506_v56 = vrot.slane %v7212_v0, 1  ;;  %v1222_v10 = vrot.slane %v7231_v39, 1  ;;  %v7245_v7 = vld [vmem:[#allocation2 + $0x38] sm:$0xff] }
 0x1c6   : > { %2638 = vmatprep.mubr.bf16.mxu0 %v1215_v50  ;;  %2978 = vmatprep.subr.bf16.mxu1 %v7135_v55  ;;  %1087 = vst [vmem:[#allocation2 + $0x58] sm:$0xf8] %v1085_v44  ;;  %1088 = vst [vmem:[#allocation2 + $0x60] sm:$0x7] %v1085_v44  ;;  %v997_v4 = vmax.f32 %v965_v43, 0.0  ;;  %v966_v2 = vadd.f32 %v7081_v8, %v927_v28  ;;  %v6241_v50 = vld [vmem:[#allocation8 + $0x1e0] sm:$0xff]  }
 0x1c7   : > { %v1000_v58 = vmax.f32 %v968_v57, 0.0  ;;  %3188 = vmatprep.subr.bf16.mxu0 %v7135_v55  ;;  %v8591_v62 = vrot.slane %v7189_v60, 1  ;;  %v1218_v57 = vor.u32 %v7241_v34, %v1214_v59  ;;  %v7265_v59 = vshll.u32 %v7245_v7, 16 }
 0x1c8   : > { %v5585_v23 = vpop.f32.mrb[24].mxu0  ;;  %v998_v3 = vmax.f32 %v966_v2, 0.0  ;;  %3189 = vmatpush1.bf16.msra.mxu0 %v6241_v50  ;;  %v1767_v37 = vrot.slane %v7231_v39, 3 }
 0x1c9   : > { %2979 = vmatpush1.bf16.msra.mxu1 %v6227_v6  ;;  %v1020_v19 = vpack.c.bf16 %v1000_v58, %v999_v33  ;;  %v932_v44 = vmul.f32 %v5585_v23, %v7076_v5  ;;  %v868_v43 = vpop.f32.mrb[25].mxu0  ;;  %v7255_v6 = vsel %vm1381_vm1, %v8591_v62, %v8506_v56  ;;  %v1223_v62 = vsel %vm1171_vm0, %v1218_v57, %v1222_v10 }
 0x1ca   : > { %2980 = vmatprep.subr.bf16.mxu1 %v7135_v55  ;;  %v930_v28 = vmul.f32 %v7076_v5, %v868_v43  ;;  %v5586_v33 = vpop.f32.mrb[26].mxu0  ;;  %v1019_v2 = vpack.c.bf16 %v998_v3, %v997_v4  ;;  %v6234_v4 = vld [vmem:[#allocation8 + $0x138] sm:$0xff]   ;;  %3190 = vmatprep.subr.bf16.mxu0 %v7135_v55 }
 0x1cb   : > { %2827 = vmatmul.mubr.bf16.gmra.mrb[12].mxu1 %v7185_v9  ;;  %v1100_v58 = vrot.slane %v1020_v19, 2  ;;  %v971_v23 = vadd.f32 %v7081_v8, %v932_v44  ;;  %v933_v9 = vmul.f32 %v5586_v33, %v7076_v5  ;;  %v871_v53 = vpop.f32.mrb[27].mxu0  ;;  %v7273_v44 = vshrl.u32 %v7212_v0, 16 }
 0x1cc   : > { %2834 = vmatprep.mubr.bf16.mxu1 %v7255_v6  ;;  %v969_v43 = vadd.f32 %v7081_v8, %v930_v28  ;;  %v931_v56 = vmul.f32 %v7076_v5, %v871_v53  ;;  %v1095_v19 = vrot.slane %v1019_v2, 3  ;;  %3191 = vmatpush1.bf16.msra.mxu0 %v6243_v51  ;;  %v1230_v33 = vrot.slane %v7265_v59, 1 }
 0x1cd   : > { %2639 = vmatmul.mubr.bf16.gmra.mrb[48].mxu0 %v7162_v38  ;;  %2981 = vmatpush1.bf16.msra.mxu1 %v6231_v63  ;;  %1102 = vst [vmem:[#allocation2 + $0x70] sm:$0xc0] %v1100_v58  ;;  %1103 = vst [vmem:[#allocation2 + $0x78] sm:$0x3f] %v1100_v58  ;;  %v1003_v3 = vmax.f32 %v971_v23, 0.0  ;;  %v972_v50 = vadd.f32 %v7081_v8, %v933_v9  ;;  %v1395_v38 = vrot.slane %v7245_v7, 1 }
 0x1ce   : > { %2646 = vmatprep.mubr.bf16.mxu0 %v1223_v62  ;;  %2982 = vmatprep.subr.bf16.mxu1 %v7135_v55  ;;  %v1001_v57 = vmax.f32 %v969_v43, 0.0  ;;  %v970_v28 = vadd.f32 %v7081_v8, %v931_v56  ;;  %1097 = vst [vmem:[#allocation2 + $0x68] sm:$0xe0] %v1095_v19  ;;  %1098 = vst [vmem:[#allocation2 + $0x70] sm:$0x1f] %v1095_v19  ;;  %v1226_v63 = vor.u32 %v7273_v44, %v1222_v10  ;;  %v6236_v23 = vld [vmem:[#allocation8 + $0x140] sm:$0xff]  }
 0x1cf   : > { %v1004_v53 = vmax.f32 %v972_v50, 0.0  ;;  %3192 = vmatprep.subr.bf16.mxu0 %v7135_v55  ;;  %v8592_v51 = vrot.slane %v7212_v0, 1  ;;  %v7291_v50 = vld [vmem:[#allocation8 + $0x1f0] sm:$0xff]   ;;  %v7372_v45 = vld [vmem:[#allocation2 + $0x58] sm:$0xff]  ;;  %v1764_v48 = vrot.slane %v7273_v44, 2 }
 0x1d0   : > { %v1002_v58 = vmax.f32 %v970_v28, 0.0  ;;  %v5589_v2 = vpop.f32.mrb[28].mxu0  ;;  %3193 = vmatpush1.bf16.msra.mxu0 %v7291_v50  ;;  %v7393_v46 = vshll.u32 %v7372_v45, 16 }
 0x1d1   : > { %2983 = vmatpush1.bf16.msra.mxu1 %v6234_v4  ;;  %v7280_v9 = vpack.c.bf16 %v1004_v53, %v1003_v3  ;;  %v936_v56 = vmul.f32 %v5589_v2, %v7076_v5  ;;  %v884_v62 = vpop.f32.mrb[29].mxu0  ;;  %v7288_v10 = vsel %vm1381_vm1, %v8592_v51, %v1395_v38  ;;  %v1231_v53 = vsel %vm1171_vm0, %v1226_v63, %v1230_v33 }
 0x1d2   : > { %2984 = vmatprep.subr.bf16.mxu1 %v7135_v55  ;;  %v1021_v43 = vpack.c.bf16 %v1002_v58, %v1001_v57  ;;  %v934_v4 = vmul.f32 %v7076_v5, %v884_v62  ;;  %v5590_v19 = vpop.f32.mrb[30].mxu0  ;;  %v6238_v62 = vld [vmem:[#allocation8 + $0x148] sm:$0xff]   ;;  %v1397_v51 = vrot.slane %v7138_v49, 1  ;;  %3194 = vmatprep.subr.bf16.mxu0 %v7135_v55 }
 0x1d3   : > { %2835 = vmatmul.mubr.bf16.gmra.mrb[16].mxu1 %v7222_v18  ;;  %1109 = vst [vmem:[#allocation2 + $0x88] sm:$0xff] %v7280_v9  ;;  %v975_v3 = vadd.f32 %v7081_v8, %v936_v56  ;;  %v937_v28 = vmul.f32 %v5590_v19, %v7076_v5  ;;  %v887_v18 = vpop.f32.mrb[31].mxu0  ;;  %v7305_v19 = vshrl.u32 %v7245_v7, 16 }
 0x1d4   : > { %2842 = vmatprep.mubr.bf16.mxu1 %v7288_v10  ;;  %v1105_v2 = vrot.slane %v1021_v43, 1  ;;  %v973_v57 = vadd.f32 %v7081_v8, %v934_v4  ;;  %v935_v58 = vmul.f32 %v7076_v5, %v887_v18  ;;  %v7314_v18 = vld [vmem:[#allocation2 + $0x48] sm:$0xff] }
 0x1d5   : > { %2647 = vmatmul.mubr.bf16.gmra.mrb[52].mxu0 %v7189_v60  ;;  %2985 = vmatpush1.bf16.msra.mxu1 %v6236_v23  ;;  %v1007_v54 = vmax.f32 %v975_v3, 0.0  ;;  %v976_v56 = vadd.f32 %v7081_v8, %v937_v28  ;;  %v8508_v60 = vshll.u32 %v7138_v49, 16  ;;  %v7310_v23 = vld [vmem:[#allocation8 + $0x1f8] sm:$0xff]   ;;  %v1234_v4 = vor.u32 %v7305_v19, %v1230_v33  ;;  %v6240_v28 = vld [vmem:[#allocation8 + $0x150] sm:$0xff]  }
 0x1d6   : > { %2654 = vmatprep.mubr.bf16.mxu0 %v1231_v53  ;;  %2986 = vmatprep.subr.bf16.mxu1 %v7135_v55  ;;  %1107 = vst [vmem:[#allocation2 + $0x78] sm:$0x80] %v1105_v2  ;;  %1108 = vst [vmem:[#allocation2 + $0x80] sm:$0x7f] %v1105_v2  ;;  %v1005_v63 = vmax.f32 %v973_v57, 0.0  ;;  %v974_v5 = vadd.f32 %v7081_v8, %v935_v58  ;;  %v1398_v8 = vsel %vm1381_vm1, %v1395_v38, %v1397_v51 }
 0x1d7   : > { %v1008_v43 = vmax.f32 %v976_v56, 0.0  ;;  %v1238_v2 = vrot.slane %v8508_v60, 1  ;;  %3195 = vmatpush1.bf16.msra.mxu0 %v7310_v23  ;;  %v1737_v38 = vrot.slane %v7172_v61, 2  ;;  %v1740_v56 = vrot.slane %v7128_v1, 3 }
 0x1d8   : > { %v1006_v3 = vmax.f32 %v974_v5, 0.0  ;;  %v1399_v5 = vrot.slane %v7314_v18, 1  ;;  %v1773_v42 = vrot.slane %v7305_v19, 2 }
 0x1d9   : > { %2987 = vmatpush1.bf16.msra.mxu1 %v6238_v62  ;;  %v1024_v53 = vpack.c.bf16 %v1008_v43, %v1007_v54  ;;  %v1239_v58 = vsel %vm1171_vm0, %v1234_v4, %v1238_v2  ;;  %v7325_v54 = vshll.u32 %v7314_v18, 16  ;;  %v8509_v43 = vshrl.u32 %v7138_v49, 16 }
 0x1da   : > { %2988 = vmatprep.subr.bf16.mxu1 %v7135_v55  ;;  %v1023_v57 = vpack.c.bf16 %v1006_v3, %v1005_v63  ;;  %v1459_v63 = vshrl.u32 %v7103_v13, 16  ;;  %v8593_v4 = vshll.u32 %v7115_v14, 16 }
 0x1db   : > { %2843 = vmatmul.mubr.bf16.gmra.mrb[20].mxu1 %v7255_v6  ;;  %v1116_v33 = vrot.slane %v1024_v53, 6  ;;  %v6242_v6 = vld [vmem:[#allocation8 + $0x158] sm:$0xff]  }
 0x1dc   : > { %2850 = vmatprep.mubr.bf16.mxu1 %v1398_v8  ;;  %v1111_v62 = vrot.slane %v1023_v57, 7  ;;  %v1467_v3 = vrot.slane %v8593_v4, 2  ;;  %v7338_v57 = vor.u32 %v1740_v56, %v1737_v38  ;;  %v1242_v4 = vor.u32 %v8509_v43, %v1238_v2  ;;  %v6246_v56 = vld [vmem:[#allocation8 + $0x168] sm:$0xff]  }
 0x1dd   : > { %2655 = vmatmul.mubr.bf16.gmra.mrb[56].mxu0 %v7212_v0  ;;  %2989 = vmatpush1.bf16.msra.mxu1 %v6240_v28  ;;  %1118 = vst [vmem:[#allocation2 + $0x98] sm:$0xfc] %v1116_v33  ;;  %1119 = vst [vmem:[#allocation2 + $0xa0] sm:$0x3] %v1116_v33  ;;  %v1462_v0 = vshll.u32 %v7103_v13, 16  ;;  %v8594_v28 = vshrl.u32 %v7115_v14, 16 }
 0x1de   : > { %2662 = vmatprep.mubr.bf16.mxu0 %v1239_v58  ;;  %2990 = vmatprep.subr.bf16.mxu1 %v7135_v55  ;;  %1113 = vst [vmem:[#allocation2 + $0x90] sm:$0xfe] %v1111_v62  ;;  %1114 = vst [vmem:[#allocation2 + $0x98] sm:$0x1] %v1111_v62  ;;  %v1246_v33 = vrot.slane %v7325_v54, 1  ;;  %v6244_v58 = vld [vmem:[#allocation8 + $0x160] sm:$0xff]   ;;  %v7344_v62 = vsel %vm1381_vm1, %v1397_v51, %v1399_v5 }
 0x1df   : > { %v1466_v53 = vrot.slane %v8594_v28, 1  ;;  %v1461_v13 = vrot.slane %v1459_v63, 1  ;;  %v1464_v60 = vrot.slane %v1462_v0, 2  ;;  %v7348_v14 = vld [vmem:[#allocation2 + $0x50] sm:$0xff]  ;;  %v1746_v2 = vrot.slane %v7203_v24, 2 }
 0x1e0   : > { %v7357_v51 = vshll.u32 %v7348_v14, 16  ;;  %v1749_v63 = vrot.slane %v7168_v52, 3  ;;  %v1401_v0 = vrot.slane %v7348_v14, 1  ;;  %v1776_v24 = vrot.slane %v7265_v59, 3 }
 0x1e1   : > { %2991 = vmatpush1.bf16.msra.mxu1 %v6242_v6  ;;  %v1468_v38 = vor.u32 %v1467_v3, %v1466_v53  ;;  %v1247_v6 = vsel %vm1171_vm0, %v1242_v4, %v1246_v33  ;;  %v1465_v3 = vor.u32 %v1464_v60, %v1461_v13  ;;  %v6248_v53 = vld [vmem:[#allocation8 + $0x170] sm:$0xff]   ;;  %v7366_v4 = vshrl.u32 %v7348_v14, 16 }
 0x1e2   : > { %2992 = vmatprep.subr.bf16.mxu1 %v7135_v55  ;;  %v7370_v43 = vsel %vm1381_vm1, %v1399_v5, %v1401_v0  ;;  %v7386_v5 = vld [vmem:[#allocation2 + $0x60] sm:$0xff] }
 0x1e3   : > { %2851 = vmatmul.mubr.bf16.gmra.mrb[24].mxu1 %v7288_v10  ;;  %v7354_v10 = vshrl.u32 %v7314_v18, 16  ;;  %v7375_v60 = vsel %vm1457_vm2, %v1465_v3, %v1468_v38  ;;  %v1470_v3 = vrot.slane %v7172_v61, 1  ;;  %v1475_v61 = vrot.slane %v7168_v52, 2 }
 0x1e4   : > { %2858 = vmatprep.mubr.bf16.mxu1 %v7344_v62  ;;  %v1262_v52 = vrot.slane %v7393_v46, 1 }
 0x1e5   : > { %2663 = vmatmul.mubr.bf16.gmra.mrb[60].mxu0 %v7245_v7  ;;  %2993 = vmatpush1.bf16.msra.mxu1 %v6244_v58  ;;  %v1250_v28 = vor.u32 %v7354_v10, %v1246_v33  ;;  %v1254_v58 = vrot.slane %v7357_v51, 1  ;;  %v7568_v15 = vld [vmem:[#allocation2 + $0x90] sm:$0xff] }
 0x1e6   : > { %2670 = vmatprep.mubr.bf16.mxu0 %v1247_v6  ;;  %2994 = vmatprep.subr.bf16.mxu1 %v7135_v55  ;;  %v1750_v6 = vor.u32 %v1749_v63, %v1746_v2  ;;  %v6249_v2 = vld [vmem:[#allocation8 + $0x178] sm:$0xff]   ;;  %v1758_v63 = vrot.slane %v7206_v30, 3 }
 0x1e7   : > { %v1255_v33 = vsel %vm1171_vm0, %v1250_v28, %v1254_v58  ;;  %v1471_v28 = vrot.slane %v7128_v1, 2  ;;  %v1258_v47 = vor.u32 %v7366_v4, %v1254_v58  ;;  %v7401_v1 = vshrl.u32 %v7372_v45, 16 }
 0x1e8   : > { %v7381_v13 = vsel %vm1725_vm3, %v7338_v57, %v1750_v6  ;;  %v7404_v58 = vshll.u32 %v7386_v5, 16 }
 0x1e9   : > { %2995 = vmatpush1.bf16.msra.mxu1 %v6246_v56  ;;  %v1755_v56 = vrot.slane %v7241_v34, 2  ;;  %v1472_v41 = vor.u32 %v1471_v28, %v1470_v3  ;;  %v1478_v28 = vrot.slane %v7241_v34, 1  ;;  %v1482_v34 = vrot.slane %v7273_v44, 1 }
 0x1ea   : > { %2996 = vmatprep.subr.bf16.mxu1 %v7135_v55  ;;  %v1809_v32 = vrot.slane %v7401_v1, 2 }
 0x1eb   : > { %2859 = vmatmul.mubr.bf16.gmra.mrb[28].mxu1 %v1398_v8  ;;  %v1403_v8 = vrot.slane %v7372_v45, 1 }
 0x1ec   : > { %2866 = vmatprep.mubr.bf16.mxu1 %v7370_v43 }
 0x1ed   : > { %2671 = vmatmul.mubr.bf16.gmra.mrb[64].mxu0 %v7138_v49  ;;  %2997 = vmatpush1.bf16.msra.mxu1 %v6248_v53  ;;  %v1759_v53 = vor.u32 %v1758_v63, %v1755_v56  ;;  %v7411_v56 = vsel %vm1457_vm2, %v1468_v38, %v1472_v41  ;;  %v1476_v63 = vor.u32 %v1475_v61, %v1474_v40  ;;  %v7449_v61 = vld [vmem:[#allocation2 + $0x68] sm:$0xff] }
 0x1ee   : > { %2678 = vmatprep.mubr.bf16.mxu0 %v1255_v33  ;;  %2998 = vmatprep.subr.bf16.mxu1 %v7135_v55  ;;  %v1768_v33 = vor.u32 %v1767_v37, %v1764_v48  ;;  %v1479_v37 = vrot.slane %v7206_v30, 2  ;;  %v7423_v48 = vsel %vm1381_vm1, %v1401_v0, %v1403_v8  ;;  %v7428_v38 = vor.u32 %v1776_v24, %v1773_v42 }
 0x1ef   : > { %v7408_v31 = vsel %vm1725_vm3, %v1750_v6, %v1759_v53  ;;  %v7426_v40 = vsel %vm1457_vm2, %v1472_v41, %v1476_v63  ;;  %v1405_v6 = vrot.slane %v7386_v5, 1  ;;  %v1483_v30 = vrot.slane %v7231_v39, 2  ;;  %8595 = vst [vmem:[#allocation48_spill] sm:$0xff] %v7449_v61 }
 0x1f0   : > { %v7416_v3 = vsel %vm1725_vm3, %v1759_v53, %v1768_v33  ;;  %v7438_v41 = vshrl.u32 %v7386_v5, 16  ;;  %v7442_v42 = vsel %vm1725_vm3, %v1768_v33, %v7428_v38  ;;  %v1266_v0 = vor.u32 %v7401_v1, %v1262_v52 }
 0x1f1   : > { %2999 = vmatpush1.bf16.msra.mxu1 %v6249_v2  ;;  %v1480_v2 = vor.u32 %v1479_v37, %v1478_v28  ;;  %v1484_v39 = vor.u32 %v1483_v30, %v1482_v34  ;;  %v1791_v53 = vrot.slane %v7354_v10, 2  ;;  %v1486_v24 = vrot.slane %v7305_v19, 1 }
 0x1f2   : > { %5835 = vmatprep.subr.bf16.mxu1 %v7135_v55  ;;  %v1263_v55 = vsel %vm1171_vm0, %v1258_v47, %v1262_v52  ;;  %v1794_v47 = vrot.slane %v7325_v54, 3  ;;  %v1487_v28 = vrot.slane %v7265_v59, 2  ;;  %v7455_v33 = vsel %vm1381_vm1, %v1403_v8, %v1405_v6  ;;  %v7460_v52 = vld [vmem:[#allocation2 + $0x70] sm:$0xff] }
 0x1f3   : > { %2867 = vmatmul.mubr.bf16.gmra.mrb[32].mxu1 %v7344_v62  ;;  %v1270_v62 = vrot.slane %v7404_v58, 1  ;;  %v7446_v44 = vsel %vm1457_vm2, %v1476_v63, %v1480_v2  ;;  %v7463_v63 = vsel %vm1457_vm2, %v1480_v2, %v1484_v39  ;;  %v1803_v19 = vrot.slane %v7357_v51, 3 }
 0x1f4   : > { %2874 = vmatprep.mubr.bf16.mxu1 %v7423_v48  ;;  %v7465_v34 = vor.u32 %v1794_v47, %v1791_v53  ;;  %v1488_v30 = vor.u32 %v1487_v28, %v1486_v24  ;;  %v8526_v8 = vrot.slane %v7449_v61, 1  ;;  %v7472_v35 = vshll.u32 %v7449_v61, 16 }
 0x1f5   : > { %2679 = vmatmul.mubr.bf16.gmra.mrb[68].mxu0 %v7314_v18  ;;  %v7458_v37 = vor.u32 %v7438_v41, %v1270_v62  ;;  %v1271_v59 = vsel %vm1171_vm0, %v1266_v0, %v1270_v62  ;;  %v8597_v24 = vshll.u32 %v7138_v49, 16  ;;  %v7485_v62 = vshrl.u32 %v7449_v61, 16 }
 0x1f6   : > { %2686 = vmatprep.mubr.bf16.mxu0 %v1263_v55  ;;  %v1800_v55 = vrot.slane %v7366_v4, 2  ;;  %v7479_v53 = vsel %vm1457_vm2, %v1484_v39, %v1488_v30  ;;  %v7488_v0 = vshll.u32 %v7460_v52, 16  ;;  %v7493_v39 = vld [vmem:[#allocation2 + $0x78] sm:$0xff]  ;;  %v7504_v2 = vsel %vm1381_vm1, %v1405_v6, %v8526_v8  ;;  %v7519_v6 = vld [vmem:[#allocation2 + $0x80] sm:$0xff]  ;;  %v2610_v8 = vpop.f32.mrb[32].mxu0 }
 0x1f7   : > { %v1491_v28 = vrot.slane %v8597_v24, 2  ;;  %v1495_v24 = vrot.slane %v7325_v54, 2  ;;  %v7507_v25 = vshrl.u32 %v7460_v52, 16  ;;  %v1818_v26 = vrot.slane %v7438_v41, 2 }
 0x1f8   : > { %v1804_v47 = vor.u32 %v1803_v19, %v1800_v55  ;;  %v1494_v19 = vrot.slane %v7354_v10, 1  ;;  %v1821_v10 = vrot.slane %v7404_v58, 3  ;;  %v1498_v54 = vrot.slane %v7366_v4, 1 }
 0x1f9   : > { %v1492_v55 = vor.u32 %v1491_v28, %v1490_v36  ;;  %v7517_v28 = vshll.u32 %v7493_v39, 16  ;;  %v1827_v4 = vrot.slane %v7485_v62, 2  ;;  %v1830_v17 = vrot.slane %v7472_v35, 3 }
 0x1fa   : > { %v7497_v49 = vsel %vm1725_vm3, %v7465_v34, %v1804_v47  ;;  %v1496_v36 = vor.u32 %v1495_v24, %v1494_v19  ;;  %v1822_v24 = vor.u32 %v1821_v10, %v1818_v26  ;;  %v7531_v21 = vshrl.u32 %v7493_v39, 16 }
 0x1fb   : > { %2875 = vmatmul.mubr.bf16.gmra.mrb[36].mxu1 %v7370_v43  ;;  %v1812_v43 = vrot.slane %v7393_v46, 3  ;;  %v7511_v29 = vsel %vm1457_vm2, %v1488_v30, %v1492_v55  ;;  %v2611_v30 = vpop.f32.mrb[33].mxu0  ;;  %v1502_v8 = vrot.slane %v7401_v1, 1  ;;  %v1831_v10 = vor.u32 %v1830_v17, %v1827_v4 }
 0x1fc   : > { %2882 = vmatprep.mubr.bf16.mxu1 %v7455_v33  ;;  %v7526_v19 = vsel %vm1457_vm2, %v1492_v55, %v1496_v36  ;;  %v2612_v20 = vpop.f32.mrb[34].mxu0  ;;  %v1836_v30 = vrot.slane %v7507_v25, 2  ;;  %v1511_v11 = vrot.slane %v7472_v35, 2  ;;  %v1519_v12 = vrot.slane %v7517_v28, 2 }
 0x1fd   : > { %2687 = vmatmul.mubr.bf16.gmra.mrb[72].mxu0 %v7348_v14  ;;  %v1813_v27 = vor.u32 %v1812_v43, %v1809_v32  ;;  %v1499_v43 = vrot.slane %v7357_v51, 2  ;;  %v7537_v51 = vshrl.u32 %v7519_v6, 16  ;;  %v2613_v55 = vpop.f32.mrb[35].mxu0  ;;  %v7556_v17 = vsel %vm1725_vm3, %v1822_v24, %v1831_v10 }
 0x1fe   : > { %2694 = vmatprep.mubr.bf16.mxu0 %v1271_v59  ;;  %v1278_v59 = vrot.slane %v7472_v35, 1  ;;  %8598 = vst [vmem:[#allocation49_spill] sm:$0xff] %v7556_v17  ;;  %v1510_v55 = vrot.slane %v7485_v62, 1  ;;  %v1518_v35 = vrot.slane %v7531_v21, 1 }
 0x1ff   : > { %v7522_v32 = vsel %vm1725_vm3, %v1804_v47, %v1813_v27  ;;  %v1500_v22 = vor.u32 %v1499_v43, %v1498_v54  ;;  %v1503_v47 = vrot.slane %v7393_v46, 2  ;;  %v7540_v26 = vsel %vm1725_vm3, %v1813_v27, %v1822_v24 }
 0x200   : > { %v1839_v46 = vrot.slane %v7488_v0, 3  ;;  %v1279_v54 = vsel %vm1171_vm0, %v7458_v37, %v1278_v59  ;;  %v7553_v27 = vshll.u32 %v7519_v6, 16  ;;  %v1507_v43 = vrot.slane %v7404_v58, 2 }
 0x201   : > { %v7545_v20 = vsel %vm1457_vm2, %v1496_v36, %v1500_v22  ;;  %v1504_v1 = vor.u32 %v1503_v47, %v1502_v8  ;;  %v1848_v8 = vrot.slane %v7517_v28, 3  ;;  %v1286_v47 = vrot.slane %v7488_v0, 1 }
 0x202   : > { %v1840_v4 = vor.u32 %v1839_v46, %v1836_v30  ;;  %v1282_v24 = vor.u32 %v7485_v62, %v1278_v59  ;;  %v1854_v30 = vrot.slane %v7537_v51, 2  ;;  %v1515_v59 = vrot.slane %v7488_v0, 2 }
 0x203   : > { %2883 = vmatmul.mubr.bf16.gmra.mrb[40].mxu1 %v7423_v48  ;;  %v1506_v48 = vrot.slane %v7438_v41, 1  ;;  %v7560_v36 = vsel %vm1457_vm2, %v1500_v22, %v1504_v1  ;;  %v1845_v41 = vrot.slane %v7531_v21, 2  ;;  %v7601_v0 = vshrl.u32 %v7568_v15, 16 }
 0x204   : > { %2890 = vmatprep.mubr.bf16.mxu1 %v7504_v2  ;;  %8599 = vst [vmem:[#allocation50_spill] sm:$0xff] %v7560_v36  ;;  %v7571_v58 = vsel %vm1725_vm3, %v1831_v10, %v1840_v4  ;;  %v8603_v10 = vrot.slane %v7460_v52, 1 }
 0x205   : > { %2695 = vmatmul.mubr.bf16.gmra.mrb[76].mxu0 %v7372_v45  ;;  %v1508_v37 = vor.u32 %v1507_v43, %v1506_v48  ;;  %8600 = vst [vmem:[#allocation51_spill] sm:$0xff] %v7571_v58  ;;  %v1849_v22 = vor.u32 %v1848_v8, %v1845_v41  ;;  %v1857_v48 = vrot.slane %v7553_v27, 3  ;;  %v1514_v43 = vrot.slane %v7507_v25, 1 }
 0x206   : > { %2702 = vmatprep.mubr.bf16.mxu0 %v1279_v54  ;;  %v1512_v54 = vor.u32 %v1511_v11, %v1510_v55  ;;  %v8604_v41 = vrot.slane %v7449_v61, 1  ;;  %v7591_v11 = vshll.u32 %v7568_v15, 16  ;;  %v8611_v58 = vshrl.u32 %v7280_v9, 16 }
 0x207   : > { %v7575_v46 = vsel %vm1457_vm2, %v1504_v1, %v1508_v37  ;;  %v7581_v62 = vsel %vm1725_vm3, %v1840_v4, %v1849_v22  ;;  %v7596_v55 = vor.u32 %v1857_v48, %v1854_v30  ;;  %v7598_v4 = vld [vmem:[#allocation2 + $0x98] sm:$0xff] }
 0x208   : > { %8601 = vst [vmem:[#allocation52_spill] sm:$0xff] %v7575_v46  ;;  %8602 = vst [vmem:[#allocation53_spill] sm:$0xff] %v7581_v62  ;;  %v1410_v1 = vsel %vm1381_vm1, %v8604_v41, %v8603_v10  ;;  %v7594_v8 = vsel %vm1457_vm2, %v1508_v37, %v1512_v54  ;;  %v1287_v10 = vsel %vm1171_vm0, %v1282_v24, %v1286_v47  ;;  %v1411_v37 = vrot.slane %v7493_v39, 1 }
 0x209   : > { %8605 = vst [vmem:[#allocation54_spill] sm:$0xff] %v7594_v8  ;;  %8606 = vst [vmem:[#allocation55_spill] sm:$0xff] %v7596_v55  ;;  %v7609_v30 = vshrl.u32 %v7598_v4, 16  ;;  %v7613_v48 = vsel %vm1725_vm3, %v1849_v22, %v7596_v55  ;;  %v1872_v41 = vrot.slane %v7601_v0, 2  ;;  %v1875_v16 = vrot.slane %v7591_v11, 3 }
 0x20a   : > { %8607 = vst [vmem:[#allocation56_spill] sm:$0xff] %v7613_v48  ;;  %v7621_v24 = vshll.u32 %v7598_v4, 16  ;;  %v1522_v8 = vrot.slane %v7537_v51, 1  ;;  %v1523_v62 = vrot.slane %v7553_v27, 2  ;;  %v1308_v46 = vshll.u32 %v7280_v9, 16 }
 0x20b   : > { %2891 = vmatmul.mubr.bf16.gmra.mrb[44].mxu1 %v7455_v33  ;;  %v1516_v33 = vor.u32 %v1515_v59, %v1514_v43  ;;  %v1520_v59 = vor.u32 %v1519_v12, %v1518_v35  ;;  %v1290_v12 = vor.u32 %v7507_v25, %v1286_v47  ;;  %v1881_v35 = vrot.slane %v7609_v30, 2 }
 0x20c   : > { %2898 = vmatprep.mubr.bf16.mxu1 %v1410_v1  ;;  %v1884_v55 = vrot.slane %v7621_v24, 3  ;;  %v1526_v36 = vrot.slane %v8611_v58, 1 }
 0x20d   : > { %2703 = vmatmul.mubr.bf16.gmra.mrb[80].mxu0 %v7386_v5  ;;  %v7616_v43 = vsel %vm1457_vm2, %v1512_v54, %v1516_v33  ;;  %v7627_v22 = vsel %vm1457_vm2, %v1516_v33, %v1520_v59  ;;  %v1524_v54 = vor.u32 %v1523_v62, %v1522_v8  ;;  %v1294_v33 = vrot.slane %v7517_v28, 1 }
 0x20e   : > { %2710 = vmatprep.mubr.bf16.mxu0 %v1287_v10  ;;  %8608 = vst [vmem:[#allocation57_spill] sm:$0xff] %v7616_v43  ;;  %8609 = vst [vmem:[#allocation58_spill] sm:$0xff] %v7627_v22  ;;  %v7629_v10 = vor.u32 %v1875_v16, %v1872_v41  ;;  %v8610_v43 = vrot.slane %v7460_v52, 1  ;;  %v7641_v16 = vld [vmem:[#allocation2 + $0xa0] sm:$0xff]  ;;  %v7646_v47 = vor.u32 %v1884_v55, %v1881_v35  ;;  %v1527_v62 = vrot.slane %v1308_v46, 2 }
 0x20f   : > { %v7644_v25 = vsel %vm1457_vm2, %v1520_v59, %v1524_v54  ;;  %v1530_v8 = vrot.slane %v7601_v0, 1  ;;  %v1534_v41 = vrot.slane %v7609_v30, 1  ;;  %v1535_v55 = vrot.slane %v7621_v24, 2 }
 0x210   : > { %v1412_v48 = vsel %vm1381_vm1, %v8610_v43, %v1411_v37  ;;  %8612 = vst [vmem:[#allocation59_spill] sm:$0xff] %v7644_v25  ;;  %8613 = vst [vmem:[#allocation60_spill] sm:$0xff] %v7646_v47  ;;  %v1531_v43 = vrot.slane %v7591_v11, 2  ;;  %v7656_v28 = vsel %vm1725_vm3, %v7629_v10, %v7646_v47  ;;  %v1528_v58 = vor.u32 %v1527_v62, %v1526_v36 }
 0x211   : > { %8614 = vst [vmem:[#allocation61_spill] sm:$0xff] %v7656_v28  ;;  %v1539_v35 = vshrl.u32 %v7641_v16, 16  ;;  %v1542_v25 = vshll.u32 %v7641_v16, 16  ;;  %v1413_v22 = vrot.slane %v7519_v6, 1  ;;  %v1298_v36 = vor.u32 %v7531_v21, %v1294_v33 }
 0x212   : > { %v1532_v59 = vor.u32 %v1531_v43, %v1530_v8  ;;  %v1302_v62 = vrot.slane %v7553_v27, 1  ;;  %v1415_v21 = vrot.slane %v7280_v9, 1 }
 0x213   : > { %2899 = vmatmul.mubr.bf16.gmra.mrb[48].mxu1 %v7504_v2  ;;  %v1295_v2 = vsel %vm1171_vm0, %v1290_v12, %v1294_v33  ;;  %v1536_v12 = vor.u32 %v1535_v55, %v1534_v41  ;;  %v1541_v47 = vrot.slane %v1539_v35, 1  ;;  %v1544_v28 = vrot.slane %v1542_v25, 2 }
 0x214   : > { %2906 = vmatprep.mubr.bf16.mxu1 %v1412_v48  ;;  %v7666_v17 = vsel %vm1457_vm2, %v1528_v58, %v1532_v59  ;;  %v1303_v25 = vsel %vm1171_vm0, %v1298_v36, %v1302_v62  ;;  %v1306_v27 = vor.u32 %v7537_v51, %v1302_v62  ;;  %v1416_v33 = vsel %vm1381_vm1, %v1413_v22, %v1415_v21 }
 0x215   : > { %2711 = vmatmul.mubr.bf16.gmra.mrb[84].mxu0 %v7449_v61  ;;  %v7663_v61 = vsel %vm1457_vm2, %v1524_v54, %v1528_v58  ;;  %v7671_v8 = vsel %vm1457_vm2, %v1532_v59, %v1536_v12  ;;  %v7673_v43 = vor.u32 %v1544_v28, %v1541_v47  ;;  %v1417_v47 = vrot.slane %v7568_v15, 1 }
 0x216   : > { %2718 = vmatprep.mubr.bf16.mxu0 %v1295_v2  ;;  %v1414_v2 = vsel %vm1381_vm1, %v1411_v37, %v1413_v22  ;;  %v8615_v41 = vshrl.u32 %v7280_v9, 16  ;;  %v1318_v58 = vrot.slane %v7591_v11, 1  ;;  %v1326_v59 = vrot.slane %v7621_v24, 1  ;;  %v1141_v11 = vld [vmem:[#allocation2 + $0xa0] sm:$0x1f] }
 0x217   : > { %v7678_v54 = vsel %vm1457_vm2, %v1536_v12, %v7673_v43  ;;  %v1418_v51 = vsel %vm1381_vm1, %v1415_v21, %v1417_v47  ;;  %v1449_v12 = vrot.slane %v7641_v16, 1  ;;  %v1332_v36 = vshll.u32 %v1141_v11, 16 }
 0x218   : > { %v1322_v22 = vor.u32 %v7601_v0, %v1318_v58  ;;  %v1330_v62 = vor.u32 %v7609_v30, %v1326_v59 }
 0x21a   : > { %v1327_v35 = vsel %vm1171_vm0, %v1322_v22, %v1326_v59  ;;  %v1147_v22 = vld [vmem:[#allocation2 + $0x8] sm:$0xfc] }
 0x21b   : > { %2907 = vmatmul.mubr.bf16.gmra.mrb[52].mxu1 %v1410_v1  ;;  %v1310_v1 = vrot.slane %v1308_v46, 1  ;;  %v1580_v59 = vrot.slane %v1147_v22, 2  ;;  %v6286_v22 = vld [vmem:[#allocation8 + $0x1a8] sm:$0xff]  }
 0x21c   : > { %2914 = vmatprep.mubr.bf16.mxu1 %v1414_v2 }
 0x21d   : > { %2719 = vmatmul.mubr.bf16.gmra.mrb[88].mxu0 %v7460_v52  ;;  %v1311_v37 = vsel %vm1171_vm0, %v1306_v27, %v1310_v1  ;;  %v1314_v28 = vor.u32 %v8615_v41, %v1310_v1  ;;  %v1336_v27 = vshrl.u32 %v1141_v11, 16 }
 0x21e   : > { %2726 = vmatprep.mubr.bf16.mxu0 %v1303_v25  ;;  %v1145_v25 = vld [vmem:[#allocation2 + $0xa8] sm:$0x1f] }
 0x21f   : > { %v1319_v46 = vsel %vm1171_vm0, %v1314_v28, %v1318_v58  ;;  %v1451_v21 = vrot.slane %v1145_v25, 1  ;;  %v1421_v28 = vrot.slane %v1141_v11, 1 }
 0x223   : > { %2915 = vmatmul.mubr.bf16.gmra.mrb[56].mxu1 %v1412_v48  ;;  %v1419_v48 = vrot.slane %v7598_v4, 1 }
 0x224   : > { %2922 = vmatprep.mubr.bf16.mxu1 %v1416_v33 }
 0x225   : > { %2727 = vmatmul.mubr.bf16.gmra.mrb[92].mxu0 %v7493_v39  ;;  %v1420_v55 = vsel %vm1381_vm1, %v1417_v47, %v1419_v48  ;;  %v1450_v0 = vsel %vm1381_vm1, %v1419_v48, %v1449_v12 }
 0x226   : > { %2734 = vmatprep.mubr.bf16.mxu0 %v1311_v37  ;;  %v1452_v37 = vsel %vm1381_vm1, %v1449_v12, %v1451_v21 }
 0x22b   : > { %2923 = vmatmul.mubr.bf16.gmra.mrb[60].mxu1 %v1414_v2  ;;  %v1334_v2 = vrot.slane %v1332_v36, 1 }
 0x22c   : > { %2930 = vmatprep.mubr.bf16.mxu1 %v1418_v51 }
 0x22d   : > { %2735 = vmatmul.mubr.bf16.gmra.mrb[96].mxu0 %v7519_v6  ;;  %v1335_v24 = vsel %vm1171_vm0, %v1330_v62, %v1334_v2  ;;  %v1338_v30 = vor.u32 %v1336_v27, %v1334_v2  ;;  %v7710_v62 = vld [vmem:[#allocation2 + $0x18] sm:$0xff] }
 0x22e   : > { %2742 = vmatprep.mubr.bf16.mxu0 %v1319_v46  ;;  %v1140_v46 = vld [vmem:[#allocation2 + $0xa0] sm:$0xf]  ;;  %v1664_v11 = vrot.slane %v7710_v62, 2 }
 0x233   : > { %2931 = vmatmul.mubr.bf16.gmra.mrb[64].mxu1 %v1416_v33 }
 0x234   : > { %2938 = vmatprep.mubr.bf16.mxu1 %v1420_v55 }
 0x235   : > { %2743 = vmatmul.mubr.bf16.gmra.mrb[100].mxu0 %v7280_v9  ;;  %v1148_v9 = vld [vmem:[#allocation2 + $0x10] sm:$0xfc] }
 0x236   : > { %2750 = vmatprep.mubr.bf16.mxu0 %v1327_v35  ;;  %v1727_v33 = vshrl.u32 %v1148_v9, 16  ;;  %v1730_v1 = vshll.u32 %v1148_v9, 16  ;;  %v6275_v35 = vld [vmem:[#allocation2 + $0x10] sm:$0xff]  ;;  %v1663_v36 = vrot.slane %v1148_v9, 2  ;;  %v6278_v9 = vld [vmem:[#allocation8 + $0x180] sm:$0xff]  }
 0x237   : > { %v1581_v12 = vrot.slane %v6275_v35, 2 }
 0x238   : > { %v1729_v47 = vrot.slane %v1727_v33, 2  ;;  %v1732_v41 = vrot.slane %v1730_v1, 3  ;;  %v6281_v33 = vld [vmem:[#allocation8 + $0x188] sm:$0xff]   ;;  %v6282_v1 = vld [vmem:[#allocation8 + $0x190] sm:$0xff]  }
 0x239   : > { %v1584_v25 = vsel %vm1579_vm4, %v1581_v12, %v1664_v11 }
 0x23a   : > { %v1733_v58 = vor.u32 %v1732_v41, %v1729_v47  ;;  %v6284_v47 = vld [vmem:[#allocation8 + $0x198] sm:$0xff]  }
 0x23b   : > { %2939 = vmatmul.mubr.bf16.gmra.mrb[68].mxu1 %v1418_v51  ;;  %v1422_v51 = vsel %vm1381_vm1, %v1419_v48, %v1421_v28  ;;  %v1582_v48 = vsel %vm1579_vm4, %v1580_v59, %v1581_v12  ;;  %v6287_v59 = vld [vmem:[#allocation8 + $0x1b0] sm:$0xff]   ;;  %v6289_v12 = vld [vmem:[#allocation8 + $0x1c0] sm:$0xff]  }
 0x23c   : > { %2946 = vmatprep.mubr.bf16.mxu1 %v1450_v0  ;;  %v1665_v0 = vsel %vm1579_vm4, %v1663_v36, %v1664_v11  ;;  %v6290_v36 = vld [vmem:[#allocation2 + $0x40] sm:$0xff] }
 0x23d   : > { %2751 = vmatmul.mubr.bf16.gmra.mrb[104].mxu0 %v7568_v15 }
 0x23e   : > { %2758 = vmatprep.mubr.bf16.mxu0 %v1335_v24 }
 0x243   : > { %2947 = vmatmul.mubr.bf16.gmra.mrb[72].mxu1 %v1420_v55  ;;  %v1742_v55 = vsel %vm1725_vm3, %v1733_v58, %v7338_v57  ;;  %v7716_v57 = vld [vmem:[#allocation2 + $0x20] sm:$0xff] }
 0x244   : > { %2954 = vmatprep.mubr.bf16.mxu1 %v1452_v37  ;;  %v1666_v2 = vrot.slane %v7716_v57, 2  ;;  %v7736_v37 = vld [vmem:[#allocation2 + $0x30] sm:$0xff] }
 0x245   : > { %2759 = vmatmul.mubr.bf16.gmra.mrb[108].mxu0 %v7598_v4 }
 0x246   : > { %2765 = vmatprep.mubr.bf16.mxu0 %v1338_v30  ;;  %v1667_v24 = vsel %vm1579_vm4, %v1664_v11, %v1666_v2  ;;  %v1670_v30 = vrot.slane %v7736_v37, 2  ;;  %v1593_v11 = vrot.slane %v6290_v36, 2 }
 0x24b   : > { %2955 = vmatmul.mubr.bf16.gmra.mrb[76].mxu1 %v1422_v51 }
 0x24c   : > { %2961 = vmatprep.mubr.bf16.mxu1 %v1451_v21  ;;  %v7722_v21 = vld [vmem:[#allocation2] sm:$0xff] }
 0x24d   : > { %2766 = vmatmul.mubr.bf16.gmra.mrb[112].mxu0 %v1140_v46  ;;  %v1672_v46 = vrot.slane %v7245_v7, 2 }
 0x24e   : > { %3196 = vmatprep.mubr.bf16.mxu0 %v1742_v55 }
 0x253   : > { %2962 = vmatmul.mubr.bf16.gmra.mrb[80].mxu1 %v1421_v28 }
 0x254   : > { %3000 = vmatprep.mubr.bf16.mxu1 %v1582_v48  ;;  %v6291_v48 = vld [vmem:[#allocation8 + $0x1c8] sm:$0xff]  }
 0x255   : > { %3197 = vmatmul.mubr.bf16.vlgmr.msra.gmra.mrb[116].mxu0 %v1665_v0  ;;  %v1594_v0 = vsel %vm1579_vm4, %v1672_v46, %v1593_v11 }
 0x256   : > { %3202 = vmatprep.mubr.bf16.mxu0 %v7381_v13  ;;  %v7726_v13 = vld [vmem:[#allocation2 + $0x28] sm:$0xff] }
 0x257   : > { %v1668_v27 = vrot.slane %v7726_v13, 2 }
 0x259   : > { %v1671_v28 = vsel %vm1579_vm4, %v1668_v27, %v1670_v30 }
 0x25b   : > { %3001 = vmatmul.mubr.bf16.vlgmr.msra.gmra.mrb[84].mxu1 %v7375_v60  ;;  %v1669_v60 = vsel %vm1579_vm4, %v1666_v2, %v1668_v27 }
 0x25c   : > { %3006 = vmatprep.mubr.bf16.mxu1 %v1584_v25  ;;  %5851 = vmatpush1.bf16.msra.mxu1 %v6278_v9  ;;  %v6292_v25 = vld [vmem:[#allocation8 + $0x1d0] sm:$0xff]  }
 0x25d   : > { %3203 = vmatmul.mubr.bf16.gmra.mrb[120].mxu0 %v1667_v24  ;;  %5836 = vmatprep.subr.bf16.mxu1 %v7722_v21 }
 0x25e   : > { %3210 = vmatprep.mubr.bf16.mxu0 %v7408_v31  ;;  %v7734_v31 = vld [vmem:[#allocation2 + $0x40] sm:$0xff] }
 0x25f   : > { %v1783_v41 = vshll.u32 %v7734_v31, 16  ;;  %v1674_v7 = vrot.slane %v7734_v31, 2 }
 0x260   : > { %5852 = vmatpush1.bf16.msra.mxu1 %v6281_v33  ;;  %v6293_v33 = vld [vmem:[#allocation8 + $0x1d8] sm:$0xff]  }
 0x261   : > { %5837 = vmatprep.subr.bf16.mxu1 %v7722_v21  ;;  %v1785_v51 = vrot.slane %v1783_v41, 3  ;;  %v6294_v41 = vld [vmem:[#allocation8 + $0x1e0] sm:$0xff]  }
 0x263   : > { %3007 = vmatmul.mubr.bf16.gmra.mrb[4].mxu1 %v7411_v56  ;;  %v1780_v56 = vshrl.u32 %v7734_v31, 16 }
 0x264   : > { %3014 = vmatprep.mubr.bf16.mxu1 %v1667_v24  ;;  %5853 = vmatpush1.bf16.msra.mxu1 %v6282_v1  ;;  %v6535_v24 = vmov 0.0  }
 0x265   : > { %3211 = vmatmul.mubr.bf16.gmra.mrb[124].mxu0 %v1669_v60  ;;  %5838 = vmatprep.subr.bf16.mxu1 %v7722_v21  ;;  %v1782_v58 = vrot.slane %v1780_v56, 2 }
 0x266   : > { %3218 = vmatprep.mubr.bf16.mxu0 %v7416_v3  ;;  %v6285_v3 = vld [vmem:[#allocation8 + $0x1a0] sm:$0xff]   ;;  %5691 = vmatprep.subr.bf16.mxu0 %v6535_v24 }
 0x267   : > { %v1786_v55 = vor.u32 %v1785_v51, %v1782_v58 }
 0x268   : > { %5854 = vmatpush1.bf16.msra.mxu1 %v6284_v47 }
 0x269   : > { %5839 = vmatprep.subr.bf16.mxu1 %v7722_v21  ;;  %v1787_v35 = vsel %vm1725_vm3, %v7428_v38, %v1786_v55  ;;  %v1796_v38 = vsel %vm1725_vm3, %v1786_v55, %v7465_v34 }
 0x26b   : > { %3015 = vmatmul.mubr.bf16.gmra.mrb[8].mxu1 %v7426_v40  ;;  %v1673_v40 = vsel %vm1579_vm4, %v1670_v30, %v1672_v46 }
 0x26c   : > { %3022 = vmatprep.mubr.bf16.mxu1 %v1669_v60  ;;  %5855 = vmatpush1.bf16.msra.mxu1 %v6285_v3  ;;  %v6295_v3 = vld [vmem:[#allocation8 + $0x1e8] sm:$0xff]  }
 0x26d   : > { %3219 = vmatmul.mubr.bf16.gmra.mrb[128].mxu0 %v1671_v28  ;;  %5840 = vmatprep.subr.bf16.mxu1 %v7722_v21 }
 0x26e   : > { %3226 = vmatprep.mubr.bf16.mxu0 %v7442_v42  ;;  %v6288_v42 = vld [vmem:[#allocation8 + $0x1b8] sm:$0xff]  }
 0x270   : > { %5856 = vmatpush1.bf16.msra.mxu1 %v6286_v22 }
 0x271   : > { %5841 = vmatprep.subr.bf16.mxu1 %v7722_v21 }
 0x273   : > { %3023 = vmatmul.mubr.bf16.gmra.mrb[12].mxu1 %v7446_v44  ;;  %v1675_v44 = vsel %vm1579_vm4, %v1672_v46, %v1674_v7 }
 0x274   : > { %3030 = vmatprep.mubr.bf16.mxu1 %v1671_v28  ;;  %5857 = vmatpush1.bf16.msra.mxu1 %v6287_v59  ;;  %v1680_v28 = vrot.slane %v7372_v45, 2  ;;  %v8617_v59 = vld [vmem:[#allocation48_spill] sm:$0xff] }
 0x275   : > { %3227 = vmatmul.mubr.bf16.gmra.mrb[132].mxu0 %v1673_v40  ;;  %5842 = vmatprep.subr.bf16.mxu1 %v7722_v21 }
 0x276   : > { %3234 = vmatprep.mubr.bf16.mxu0 %v1787_v35 }
 0x278   : > { %5858 = vmatpush1.bf16.msra.mxu1 %v6288_v42  ;;  %v8618_v42 = vld [vmem:[#allocation50_spill] sm:$0xff] }
 0x279   : > { %5843 = vmatprep.subr.bf16.mxu1 %v7722_v21 }
 0x27b   : > { %3031 = vmatmul.mubr.bf16.gmra.mrb[16].mxu1 %v7463_v63  ;;  %v1676_v63 = vrot.slane %v7314_v18, 2 }
 0x27c   : > { %3038 = vmatprep.mubr.bf16.mxu1 %v1673_v40  ;;  %5859 = vmatpush1.bf16.msra.mxu1 %v6289_v12  ;;  %v8616_v40 = vld [vmem:[#allocation49_spill] sm:$0xff] }
 0x27d   : > { %3235 = vmatmul.mubr.bf16.gmra.mrb[136].mxu0 %v1675_v44  ;;  %5844 = vmatprep.subr.bf16.mxu1 %v7722_v21  ;;  %v1677_v2 = vsel %vm1579_vm4, %v1674_v7, %v1676_v63 }
 0x27e   : > { %3242 = vmatprep.mubr.bf16.mxu0 %v1796_v38  ;;  %v1686_v38 = vrot.slane %v7460_v52, 2 }
 0x280   : > { %5860 = vmatpush1.bf16.msra.mxu1 %v6291_v48 }
 0x281   : > { %5845 = vmatprep.subr.bf16.mxu1 %v7722_v21 }
 0x283   : > { %3039 = vmatmul.mubr.bf16.gmra.mrb[20].mxu1 %v7479_v53  ;;  %v1678_v53 = vrot.slane %v7348_v14, 2 }
 0x284   : > { %3046 = vmatprep.mubr.bf16.mxu1 %v1594_v0  ;;  %5861 = vmatpush1.bf16.msra.mxu1 %v6292_v25  ;;  %v7816_v25 = vld [vmem:[#allocation2 + $0x88] sm:$0xff] }
 0x285   : > { %3243 = vmatmul.mubr.bf16.gmra.mrb[140].mxu0 %v1677_v2  ;;  %5846 = vmatprep.subr.bf16.mxu1 %v7722_v21  ;;  %v1679_v56 = vsel %vm1579_vm4, %v1676_v63, %v1678_v53  ;;  %v1681_v46 = vsel %vm1579_vm4, %v1678_v53, %v1680_v28  ;;  %v8621_v2 = vld [vmem:[#allocation53_spill] sm:$0xff]  ;;  %v1861_v52 = vshrl.u32 %v7816_v25, 16  ;;  %v1864_v53 = vshll.u32 %v7816_v25, 16 }
 0x286   : > { %v2806_v34 = vpop.f32.mrb[0].mxu1  ;;  %3250 = vmatprep.mubr.bf16.mxu0 %v7497_v49  ;;  %v1596_v49 = vsel %vm1579_vm4, %v1593_v11, %v1676_v63  ;;  %v8620_v63 = vld [vmem:[#allocation52_spill] sm:$0xff] }
 0x287   : > { %v2807_v9 = vpop.f32.mrb[1].mxu1 }
 0x288   : > { %v2808_v18 = vpop.f32.mrb[2].mxu1  ;;  %v7768_v27 = vpop.f32.mrb[36].mxu0  ;;  %5862 = vmatpush1.bf16.msra.mxu1 %v6293_v33  ;;  %v1688_v9 = vrot.slane %v7493_v39, 2  ;;  %v1690_v39 = vrot.slane %v7519_v6, 2 }
 0x289   : > { %v2809_v60 = vpop.f32.mrb[3].mxu1  ;;  %v2618_v1 = vpop.f32.mrb[37].mxu0  ;;  %5847 = vmatprep.subr.bf16.mxu1 %v7722_v21 }
 0x28a   : > { %v7772_v30 = vpop.f32.mrb[38].mxu0  ;;  %v8622_v1 = vld [vmem:[#allocation54_spill] sm:$0xff] }
 0x28b   : > { %3047 = vmatmul.mubr.bf16.gmra.mrb[24].mxu1 %v7511_v29  ;;  %v2621_v47 = vpop.f32.mrb[39].mxu0 }
 0x28c   : > { %3054 = vmatprep.mubr.bf16.mxu1 %v1596_v49  ;;  %5863 = vmatpush1.bf16.msra.mxu1 %v6294_v41  ;;  %v1689_v49 = vsel %vm1579_vm4, %v1686_v38, %v1688_v9  ;;  %v1863_v47 = vrot.slane %v1861_v52, 2  ;;  %v8623_v41 = vld [vmem:[#allocation56_spill] sm:$0xff] }
 0x28d   : > { %3251 = vmatmul.mubr.bf16.gmra.mrb[144].mxu0 %v1679_v56  ;;  %5848 = vmatprep.subr.bf16.mxu1 %v7722_v21 }
 0x28e   : > { %3258 = vmatprep.mubr.bf16.mxu0 %v7522_v32  ;;  %v1682_v32 = vrot.slane %v7386_v5, 2  ;;  %v1684_v5 = vrot.slane %v8617_v59, 2  ;;  %v1692_v59 = vrot.slane %v7816_v25, 2 }
 0x290   : > { %v7779_v14 = vpop.f32.mrb[40].mxu0  ;;  %5864 = vmatpush1.bf16.msra.mxu1 %v6295_v3  ;;  %v1685_v44 = vsel %vm1579_vm4, %v1682_v32, %v1684_v5  ;;  %v1687_v0 = vsel %vm1579_vm4, %v1684_v5, %v1686_v38 }
 0x291   : > { %v2626_v29 = vpop.f32.mrb[41].mxu0  ;;  %5849 = vmatprep.subr.bf16.mxu1 %v7722_v21 }
 0x292   : > { %v7783_v58 = vpop.f32.mrb[42].mxu0 }
 0x293   : > { %v2629_v51 = vpop.f32.mrb[43].mxu0  ;;  %3055 = vmatmul.mubr.bf16.gmra.mrb[28].mxu1 %v7526_v19 }
 0x294   : > { %3062 = vmatprep.mubr.bf16.mxu1 %v1679_v56  ;;  %5865 = vmatpush1.bf16.msra.mxu1 %v7291_v50  ;;  %v1683_v50 = vsel %vm1579_vm4, %v1680_v28, %v1682_v32  ;;  %v1866_v56 = vrot.slane %v1864_v53, 3  ;;  %v8624_v32 = vld [vmem:[#allocation57_spill] sm:$0xff] }
 0x295   : > { %3259 = vmatmul.mubr.bf16.gmra.mrb[148].mxu0 %v1681_v46  ;;  %5850 = vmatprep.subr.bf16.mxu1 %v7722_v21 }
 0x296   : > { %3266 = vmatprep.mubr.bf16.mxu0 %v7540_v26  ;;  %v1867_v29 = vor.u32 %v1866_v56, %v1863_v47 }
 0x298   : > { %v7790_v45 = vpop.f32.mrb[44].mxu0  ;;  %5866 = vmatpush1.bf16.msra.mxu1 %v7310_v23 }
 0x299   : > { %v2634_v22 = vpop.f32.mrb[45].mxu0  ;;  %5591 = vmatprep.subr.bf16.mxu1 %v6535_v24 }
 0x29a   : > { %v7795_v19 = vpop.f32.mrb[46].mxu0  ;;  %v1691_v22 = vsel %vm1579_vm4, %v1688_v9, %v1690_v39  ;;  %v8627_v9 = vld [vmem:[#allocation59_spill] sm:$0xff] }
 0x29b   : > { %v2637_v55 = vpop.f32.mrb[47].mxu0  ;;  %3063 = vmatmul.mubr.bf16.gmra.mrb[32].mxu1 %v7545_v20  ;;  %v8619_v20 = vld [vmem:[#allocation51_spill] sm:$0xff] }
 0x29c   : > { %3070 = vmatprep.mubr.bf16.mxu1 %v1681_v46  ;;  %v8625_v55 = vld [vmem:[#allocation55_spill] sm:$0xff] }
 0x29d   : > { %3267 = vmatmul.mubr.bf16.gmra.mrb[152].mxu0 %v1683_v50 }
 0x29e   : > { %3274 = vmatprep.mubr.bf16.mxu0 %v8616_v40 }
 0x2a0   : > { %v7800_v26 = vpop.f32.mrb[48].mxu0 }
 0x2a1   : > { %v2642_v35 = vpop.f32.mrb[49].mxu0 }
 0x2a2   : > { %v7803_v23 = vpop.f32.mrb[50].mxu0 }
 0x2a3   : > { %v2645_v7 = vpop.f32.mrb[51].mxu0  ;;  %3071 = vmatmul.mubr.bf16.gmra.mrb[36].mxu1 %v8618_v42  ;;  %v1693_v42 = vsel %vm1579_vm4, %v1690_v39, %v1692_v59 }
 0x2a4   : > { %3078 = vmatprep.mubr.bf16.mxu1 %v1683_v50  ;;  %v1868_v50 = vsel %vm1725_vm3, %v8625_v55, %v1867_v29  ;;  %v8626_v7 = vld [vmem:[#allocation58_spill] sm:$0xff] }
 0x2a5   : > { %3275 = vmatmul.mubr.bf16.gmra.mrb[156].mxu0 %v1685_v44 }
 0x2a6   : > { %3282 = vmatprep.mubr.bf16.mxu0 %v8619_v20  ;;  %v6296_v20 = vld [vmem:[#allocation2 + $0x88] sm:$0xff] }
 0x2a7   : > { %v1611_v38 = vrot.slane %v6296_v20, 2 }
 0x2a8   : > { %v7808_v12 = vpop.f32.mrb[52].mxu0 }
 0x2a9   : > { %v2650_v36 = vpop.f32.mrb[53].mxu0 }
 0x2aa   : > { %v7811_v11 = vpop.f32.mrb[54].mxu0 }
 0x2ab   : > { %v2653_v48 = vpop.f32.mrb[55].mxu0  ;;  %3079 = vmatmul.mubr.bf16.gmra.mrb[40].mxu1 %v8620_v63 }
 0x2ac   : > { %3086 = vmatprep.mubr.bf16.mxu1 %v1685_v44  ;;  %v1877_v44 = vsel %vm1725_vm3, %v1867_v29, %v7629_v10  ;;  %v8628_v10 = vld [vmem:[#allocation61_spill] sm:$0xff] }
 0x2ad   : > { %3283 = vmatmul.mubr.bf16.gmra.mrb[160].mxu0 %v1687_v0 }
 0x2ae   : > { %3290 = vmatprep.mubr.bf16.mxu0 %v8621_v2 }
 0x2b0   : > { %v7818_v34 = vpop.f32.mrb[56].mxu0 }
 0x2b1   : > { %v2658_v18 = vpop.f32.mrb[57].mxu0 }
 0x2b2   : > { %v7823_v33 = vpop.f32.mrb[58].mxu0  ;;  %v1612_v18 = vsel %vm1579_vm4, %v1690_v39, %v1611_v38 }
 0x2b3   : > { %v2661_v60 = vpop.f32.mrb[59].mxu0  ;;  %3087 = vmatmul.mubr.bf16.gmra.mrb[44].mxu1 %v8622_v1 }
 0x2b4   : > { %3094 = vmatprep.mubr.bf16.mxu1 %v1687_v0  ;;  %v1694_v0 = vrot.slane %v7568_v15, 2  ;;  %v7858_v60 = vrot.slane %v7598_v4, 2 }
 0x2b5   : > { %3291 = vmatmul.mubr.bf16.gmra.mrb[164].mxu0 %v1689_v49 }
 0x2b6   : > { %3298 = vmatprep.mubr.bf16.mxu0 %v8623_v41  ;;  %v1695_v52 = vsel %vm1579_vm4, %v1692_v59, %v1694_v0  ;;  %v1614_v47 = vsel %vm1579_vm4, %v1611_v38, %v1694_v0  ;;  %v1697_v56 = vsel %vm1579_vm4, %v1694_v0, %v7858_v60  ;;  %v7887_v38 = vld [vmem:[#allocation2 + $0xa0] sm:$0xff] }
 0x2b7   : > { %v1888_v0 = vshrl.u32 %v7887_v38, 16 }
 0x2b8   : > { %v7828_v28 = vpop.f32.mrb[60].mxu0 }
 0x2b9   : > { %v2666_v3 = vpop.f32.mrb[61].mxu0 }
 0x2ba   : > { %v7831_v51 = vpop.f32.mrb[62].mxu0 }
 0x2bb   : > { %v2669_v46 = vpop.f32.mrb[63].mxu0  ;;  %3095 = vmatmul.mubr.bf16.gmra.mrb[48].mxu1 %v8624_v32 }
 0x2bc   : > { %3102 = vmatprep.mubr.bf16.mxu1 %v1689_v49 }
 0x2bd   : > { %3299 = vmatmul.mubr.bf16.gmra.mrb[168].mxu0 %v1691_v22 }
 0x2be   : > { %3306 = vmatprep.mubr.bf16.mxu0 %v1868_v50  ;;  %v1146_v50 = vld [vmem:[#allocation2 + $0xa8] sm:$0x3f] }
 0x2bf   : > { %v1548_v59 = vshrl.u32 %v1146_v50, 16 }
 0x2c0   : > { %v7837_v40 = vpop.f32.mrb[64].mxu0 }
 0x2c1   : > { %v2674_v6 = vpop.f32.mrb[65].mxu0 }
 0x2c2   : > { %v7840_v5 = vpop.f32.mrb[66].mxu0  ;;  %v1551_v6 = vshll.u32 %v1146_v50, 16 }
 0x2c3   : > { %v2677_v35 = vpop.f32.mrb[67].mxu0  ;;  %3103 = vmatmul.mubr.bf16.gmra.mrb[52].mxu1 %v8626_v7 }
 0x2c4   : > { %3110 = vmatprep.mubr.bf16.mxu1 %v1691_v22  ;;  %v1619_v35 = vrot.slane %v1146_v50, 2 }
 0x2c5   : > { %3307 = vmatmul.mubr.bf16.gmra.mrb[172].mxu0 %v1693_v42  ;;  %v1550_v42 = vrot.slane %v1548_v59, 1 }
 0x2c6   : > { %3314 = vmatprep.mubr.bf16.mxu0 %v1877_v44  ;;  %v1553_v44 = vrot.slane %v1551_v6, 2 }
 0x2c8   : > { %v7846_v36 = vpop.f32.mrb[68].mxu0 }
 0x2c9   : > { %v2682_v48 = vpop.f32.mrb[69].mxu0 }
 0x2ca   : > { %v7848_v63 = vpop.f32.mrb[70].mxu0  ;;  %v1554_v48 = vor.u32 %v1553_v44, %v1550_v42  ;;  %v1698_v42 = vrot.slane %v7887_v38, 2 }
 0x2cb   : > { %v2685_v2 = vpop.f32.mrb[71].mxu0  ;;  %3111 = vmatmul.mubr.bf16.gmra.mrb[56].mxu1 %v8627_v9 }
 0x2cc   : > { %3118 = vmatprep.mubr.bf16.mxu1 %v1612_v18  ;;  %v1891_v2 = vshll.u32 %v7887_v38, 16 }
 0x2cd   : > { %3315 = vmatmul.mubr.bf16.gmra.mrb[176].mxu0 %v1695_v52 }
 0x2ce   : > { %3322 = vmatprep.mubr.bf16.mxu0 %v8628_v10  ;;  %v1555_v10 = vsel %vm1457_vm2, %v7673_v43, %v1554_v48  ;;  %v8629_v43 = vld [vmem:[#allocation60_spill] sm:$0xff] }
 0x2d0   : > { %v7855_v53 = vpop.f32.mrb[72].mxu0 }
 0x2d1   : > { %v2690_v1 = vpop.f32.mrb[73].mxu0 }
 0x2d2   : > { %v7860_v49 = vpop.f32.mrb[74].mxu0 }
 0x2d3   : > { %v2693_v15 = vpop.f32.mrb[75].mxu0  ;;  %3119 = vmatmul.mubr.bf16.gmra.mrb[60].mxu1 %v7663_v61  ;;  %v1617_v61 = vrot.slane %v7641_v16, 2 }
 0x2d4   : > { %3126 = vmatprep.mubr.bf16.mxu1 %v1614_v47  ;;  %v1893_v15 = vrot.slane %v1891_v2, 3 }
 0x2d5   : > { %3323 = vmatmul.mubr.bf16.gmra.mrb[180].mxu0 %v1697_v56  ;;  %v1618_v55 = vsel %vm1579_vm4, %v7858_v60, %v1617_v61 }
 0x2d6   : > { %5693 = vmatprep.mubr.msk.bf16.mxu0 %vm6536_vm5, %v6535_v24 }
 0x2d8   : > { %v7868_v41 = vpop.f32.mrb[76].mxu0 }
 0x2d9   : > { %v2698_v4 = vpop.f32.mrb[77].mxu0 }
 0x2da   : > { %v7870_v39 = vpop.f32.mrb[78].mxu0  ;;  %v1900_v4 = vshll.u32 %v7722_v21, 16 }
 0x2db   : > { %v2701_v3 = vpop.f32.mrb[79].mxu0  ;;  %3127 = vmatmul.mubr.bf16.gmra.mrb[64].mxu1 %v7666_v17 }
 0x2dc   : > { %3134 = vmatprep.mubr.bf16.mxu1 %v1697_v56  ;;  %v1897_v56 = vshrl.u32 %v7722_v21, 16  ;;  %v1902_v6 = vrot.slane %v1900_v4, 3  ;;  %v1700_v4 = vrot.slane %v7722_v21, 2 }
 0x2de   : > { %v1899_v59 = vrot.slane %v1897_v56, 2 }
 0x2e0   : > { %v7874_v29 = vpop.f32.mrb[80].mxu0  ;;  %v1903_v44 = vor.u32 %v1902_v6, %v1899_v59 }
 0x2e1   : > { %v2706_v46 = vpop.f32.mrb[81].mxu0 }
 0x2e2   : > { %v7876_v32 = vpop.f32.mrb[82].mxu0 }
 0x2e3   : > { %v2709_v22 = vpop.f32.mrb[83].mxu0  ;;  %3135 = vmatmul.mubr.bf16.gmra.mrb[68].mxu1 %v7671_v8  ;;  %v1620_v8 = vsel %vm1579_vm4, %v1617_v61, %v1619_v35 }
 0x2e4   : > { %3142 = vmatprep.mubr.bf16.mxu1 %v1618_v55  ;;  %v7903_v22 = vld [vmem:[#allocation2 + $0xb0] sm:$0x7f] }
 0x2e8   : > { %v7881_v17 = vpop.f32.mrb[84].mxu0 }
 0x2e9   : > { %v2714_v7 = vpop.f32.mrb[85].mxu0 }
 0x2ea   : > { %v7883_v16 = vpop.f32.mrb[86].mxu0  ;;  %v1909_v7 = vshll.u32 %v7903_v22, 16 }
 0x2eb   : > { %v2717_v20 = vpop.f32.mrb[87].mxu0  ;;  %3143 = vmatmul.mubr.bf16.gmra.mrb[72].mxu1 %v7678_v54  ;;  %v1890_v54 = vrot.slane %v1888_v0, 2 }
 0x2ec   : > { %3150 = vmatprep.mubr.bf16.mxu1 %v1620_v8  ;;  %v6250_v8 = vld [vmem:[#allocation8 + $0x200] sm:$0xff]  }
 0x2ed   : > { %v1894_v47 = vor.u32 %v1893_v15, %v1890_v54  ;;  %v6251_v15 = vld [vmem:[#allocation8 + $0x208] sm:$0xff]  }
 0x2ef   : > { %v1895_v50 = vsel %vm1725_vm3, %v8629_v43, %v1894_v47  ;;  %v1904_v54 = vsel %vm1725_vm3, %v1894_v47, %v1903_v44  ;;  %v1701_v47 = vsel %vm1579_vm4, %v1698_v42, %v1700_v4 }
 0x2f0   : > { %v7891_v9 = vpop.f32.mrb[88].mxu0 }
 0x2f1   : > { %v2722_v18 = vpop.f32.mrb[89].mxu0 }
 0x2f2   : > { %v7893_v52 = vpop.f32.mrb[90].mxu0  ;;  %v1911_v18 = vrot.slane %v1909_v7, 3 }
 0x2f3   : > { %v2725_v1 = vpop.f32.mrb[91].mxu0  ;;  %3151 = vmatmul.mubr.bf16.gmra.mrb[76].mxu1 %v1555_v10  ;;  %v1699_v10 = vsel %vm1579_vm4, %v7858_v60, %v1698_v42 }
 0x2f4   : > { %3157 = vmatprep.mubr.bf16.mxu1 %v1619_v35  ;;  %v1906_v35 = vshrl.u32 %v7903_v22, 16 }
 0x2f6   : > { %v1908_v2 = vrot.slane %v1906_v35, 2  ;;  %v6253_v35 = vld [vmem:[#allocation8 + $0x218] sm:$0xff]  }
 0x2f8   : > { %v7899_v3 = vpop.f32.mrb[92].mxu0  ;;  %v1912_v56 = vor.u32 %v1911_v18, %v1908_v2  ;;  %v6255_v18 = vld [vmem:[#allocation8 + $0x228] sm:$0xff]  }
 0x2f9   : > { %v2730_v61 = vpop.f32.mrb[93].mxu0 }
 0x2fa   : > { %v7901_v46 = vpop.f32.mrb[94].mxu0  ;;  %v1913_v60 = vsel %vm1725_vm3, %v1903_v44, %v1912_v56 }
 0x2fb   : > { %v2733_v55 = vpop.f32.mrb[95].mxu0  ;;  %3158 = vmatmul.mubr.bf16.gmra.mrb[88].mxu1 %v1554_v48 }
 0x2fc   : > { %3330 = vmatprep.mubr.bf16.mxu1 %v1895_v50  ;;  %v6252_v55 = vld [vmem:[#allocation8 + $0x210] sm:$0xff]   ;;  %v1168_v50 = vld [vmem:[#allocation2 + $0xb0] sm:$0x3f] }
 0x2fd   : > { %v1702_v21 = vrot.slane %v1168_v50, 2 }
 0x300   : > { %v7910_v20 = vpop.f32.mrb[96].mxu0 }
 0x301   : > { %v2738_v0 = vpop.f32.mrb[97].mxu0 }
 0x302   : > { %v7912_v48 = vpop.f32.mrb[98].mxu0  ;;  %v6254_v0 = vld [vmem:[#allocation8 + $0x220] sm:$0xff]  }
 0x303   : > { %v2741_v1 = vpop.f32.mrb[99].mxu0  ;;  %3331 = vmatmul.mubr.bf16.vlgmr.msra.gmra.mrb[68].mxu1 %v1699_v10 }
 0x304   : > { %3338 = vmatprep.mubr.bf16.mxu1 %v1904_v54  ;;  %5592 = vmatpush3.bf16.msra.mxu1 %v6250_v8  ;;  %v1703_v8 = vsel %vm1579_vm4, %v1700_v4, %v1702_v21  ;;  %v6256_v1 = vld [vmem:[#allocation8 + $0x230] sm:$0xff]  }
 0x305   : > { %5593 = vmatprep.subr.bf16.mxu1 %v6535_v24 }
 0x308   : > { %v7919_v61 = vpop.f32.mrb[100].mxu0  ;;  %5594 = vmatpush3.bf16.msra.mxu1 %v6251_v15 }
 0x309   : > { %v2746_v43 = vpop.f32.mrb[101].mxu0  ;;  %5595 = vmatprep.subr.bf16.mxu1 %v6535_v24 }
 0x30a   : > { %v7923_v59 = vpop.f32.mrb[102].mxu0  ;;  %v6257_v43 = vld [vmem:[#allocation8 + $0x238] sm:$0xff]  }
 0x30b   : > { %v2749_v6 = vpop.f32.mrb[103].mxu0  ;;  %3339 = vmatmul.mubr.bf16.gmra.mrb[72].mxu1 %v1701_v47 }
 0x30c   : > { %5596 = vmatpush3.bf16.msra.mxu1 %v6252_v55  ;;  %3346 = vmatprep.mubr.bf16.mxu1 %v1913_v60  ;;  %v1170_v55 = vld [vmem:[#allocation2 + $0x10] sm:$0xf8]  ;;  %v1939_v60 = vrot.slane %v7710_v62, 3 }
 0x30d   : > { %5597 = vmatprep.subr.bf16.mxu1 %v6535_v24 }
 0x310   : > { %v7927_v7 = vpop.f32.mrb[104].mxu0  ;;  %5598 = vmatpush3.bf16.msra.mxu1 %v6253_v35 }
 0x311   : > { %v2754_v44 = vpop.f32.mrb[105].mxu0  ;;  %5599 = vmatprep.subr.bf16.mxu1 %v6535_v24 }
 0x312   : > { %v7931_v2 = vpop.f32.mrb[106].mxu0 }
 0x313   : > { %v2757_v42 = vpop.f32.mrb[107].mxu0  ;;  %3347 = vmatmul.mubr.bf16.gmra.mrb[76].mxu1 %v1703_v8 }
 0x314   : > { %5600 = vmatpush3.bf16.msra.mxu1 %v6254_v0  ;;  %3353 = vmatprep.mubr.bf16.mxu1 %v1912_v56  ;;  %v1938_v56 = vrot.slane %v1170_v55, 3  ;;  %v1941_v0 = vrot.slane %v7716_v57, 3 }
 0x315   : > { %5601 = vmatprep.subr.bf16.mxu1 %v6535_v24 }
 0x316   : > { %v1940_v35 = vsel %vm1937_vm6, %v1938_v56, %v1939_v60 }
 0x318   : > { %v7934_v10 = vpop.f32.mrb[108].mxu0  ;;  %5602 = vmatpush3.bf16.msra.mxu1 %v6255_v18 }
 0x319   : > { %v2762_v54 = vpop.f32.mrb[109].mxu0  ;;  %5603 = vmatprep.subr.bf16.mxu1 %v6535_v24 }
 0x31a   : > { %v2763_v15 = vpop.f32.mrb[110].mxu0 }
 0x31b   : > { %v2764_v4 = vpop.f32.mrb[111].mxu0  ;;  %3354 = vmatmul.mubr.bf16.gmra.mrb[92].mxu1 %v1702_v21  ;;  %v1942_v15 = vsel %vm1937_vm6, %v1939_v60, %v1941_v0 }
 0x31c   : > { %5604 = vmatpush3.bf16.msra.mxu1 %v6256_v1  ;;  %5607 = vmatprep.mubr.msk.bf16.mxu1 %vm6536_vm5, %v6535_v24 }
 0x31d   : > { %5605 = vmatprep.subr.bf16.mxu1 %v6535_v24 }
 0x320   : > { %v2767_v50 = vpop.f32.mrb[112].mxu0  ;;  %5606 = vmatpush3.bf16.msra.mxu1 %v6257_v43  ;;  %v1943_v43 = vrot.slane %v7726_v13, 3 }
 0x321   : > { %v2768_v47 = vpop.f32.mrb[113].mxu0 }
 0x322   : > { %v2769_v6 = vpop.f32.mrb[114].mxu0 }
 0x323   : > { %v2770_v8 = vpop.f32.mrb[115].mxu0  ;;  %5608 = vmatmul.mubr.bf16.vlgmr.msra.gmra.mrb[96].mxu1 %v1940_v35 }
 0x324   : > { %5611 = vmatprep.mubr.msk.bf16.mxu1 %vm6536_vm5, %v6535_v24  ;;  %v1944_v8 = vsel %vm1937_vm6, %v1941_v0, %v1943_v43 }
 0x326   : > { %v2963_v21 = vpop.f32.mrb[80].mxu1 }
 0x327   : > { %v2964_v44 = vpop.f32.mrb[81].mxu1 }
 0x328   : > { %v2965_v42 = vpop.f32.mrb[82].mxu1  ;;  %v3198_v18 = vpop.f32.mrb[116].mxu0  ;;  %v1945_v44 = vrot.slane %v7736_v37, 3 }
 0x329   : > { %v2966_v1 = vpop.f32.mrb[83].mxu1  ;;  %v3199_v62 = vpop.f32.mrb[117].mxu0 }
 0x32a   : > { %v3200_v54 = vpop.f32.mrb[118].mxu0 }
 0x32b   : > { %v3201_v4 = vpop.f32.mrb[119].mxu0  ;;  %5612 = vmatmul.mubr.bf16.gmra.mrb[100].mxu1 %v1942_v15 }
 0x32c   : > { %5615 = vmatprep.mubr.msk.bf16.mxu1 %vm6536_vm5, %v6535_v24 }
 0x32e   : > { %v3002_v55 = vpop.f32.mrb[84].mxu1 }
 0x32f   : > { %v3003_v56 = vpop.f32.mrb[85].mxu1  ;;  %v1946_v55 = vsel %vm1937_vm6, %v1943_v43, %v1945_v44 }
 0x330   : > { %v3004_v50 = vpop.f32.mrb[86].mxu1  ;;  %v3204_v47 = vpop.f32.mrb[120].mxu0 }
 0x331   : > { %v3005_v57 = vpop.f32.mrb[87].mxu1  ;;  %v3206_v6 = vpop.f32.mrb[121].mxu0 }
 0x332   : > { %v3207_v35 = vpop.f32.mrb[122].mxu0 }
 0x333   : > { %v3209_v21 = vpop.f32.mrb[123].mxu0  ;;  %5616 = vmatmul.mubr.bf16.gmra.mrb[104].mxu1 %v1944_v8 }
 0x334   : > { %5619 = vmatprep.mubr.msk.bf16.mxu1 %vm6536_vm5, %v6535_v24 }
 0x336   : > { %v3008_v60 = vpop.f32.mrb[4].mxu1 }
 0x337   : > { %v5867_v42 = vadd.f32 %v3008_v60, %v7768_v27  ;;  %v3010_v18 = vpop.f32.mrb[5].mxu1  ;;  %v6297_v27 = vld [vmem:[#allocation2 + $0x38] sm:$0xff] }
 0x338   : > { %v3011_v13 = vpop.f32.mrb[6].mxu1  ;;  %v3212_v1 = vpop.f32.mrb[124].mxu0  ;;  %v1947_v57 = vrot.slane %v6297_v27, 3 }
 0x339   : > { %v5870_v62 = vadd.f32 %v3011_v13, %v7772_v30  ;;  %v3013_v54 = vpop.f32.mrb[7].mxu1  ;;  %v3214_v15 = vpop.f32.mrb[125].mxu0  ;;  %v7955_v4 = vadd.f32 %v5867_v42, %v3204_v47 }
 0x33a   : > { %v3215_v0 = vpop.f32.mrb[126].mxu0  ;;  %v1949_v54 = vrot.slane %v7734_v31, 3 }
 0x33b   : > { %v3217_v56 = vpop.f32.mrb[127].mxu0  ;;  %5620 = vmatmul.mubr.bf16.gmra.mrb[108].mxu1 %v1946_v55  ;;  %v7958_v50 = vadd.f32 %v5870_v62, %v3207_v35  ;;  %v1948_v35 = vsel %vm1937_vm6, %v1945_v44, %v1947_v57 }
 0x33c   : > { %5623 = vmatprep.mubr.msk.bf16.mxu1 %vm6536_vm5, %v6535_v24 }
 0x33e   : > { %v3016_v37 = vpop.f32.mrb[8].mxu1 }
 0x33f   : > { %v5873_v6 = vadd.f32 %v3016_v37, %v7779_v14  ;;  %v3018_v30 = vpop.f32.mrb[9].mxu1 }
 0x340   : > { %v3019_v8 = vpop.f32.mrb[10].mxu1  ;;  %v3220_v21 = vpop.f32.mrb[128].mxu0 }
 0x341   : > { %v5876_v47 = vadd.f32 %v3019_v8, %v7783_v58  ;;  %v3021_v60 = vpop.f32.mrb[11].mxu1  ;;  %v3222_v42 = vpop.f32.mrb[129].mxu0  ;;  %v7964_v43 = vadd.f32 %v5873_v6, %v3212_v1 }
 0x342   : > { %v3223_v18 = vpop.f32.mrb[130].mxu0 }
 0x343   : > { %v3225_v13 = vpop.f32.mrb[131].mxu0  ;;  %5624 = vmatmul.mubr.bf16.gmra.mrb[112].mxu1 %v1948_v35  ;;  %v7967_v62 = vadd.f32 %v5876_v47, %v3215_v0  ;;  %v1950_v0 = vsel %vm1937_vm6, %v1947_v57, %v1949_v54 }
 0x344   : > { %5627 = vmatprep.mubr.msk.bf16.mxu1 %vm6536_vm5, %v6535_v24 }
 0x346   : > { %v3024_v14 = vpop.f32.mrb[12].mxu1 }
 0x347   : > { %v5879_v15 = vadd.f32 %v3024_v14, %v7790_v45  ;;  %v3026_v58 = vpop.f32.mrb[13].mxu1  ;;  %v6298_v45 = vld [vmem:[#allocation2 + $0x48] sm:$0xff] }
 0x348   : > { %v3027_v55 = vpop.f32.mrb[14].mxu1  ;;  %v3228_v56 = vpop.f32.mrb[132].mxu0  ;;  %v1951_v47 = vrot.slane %v6298_v45, 3 }
 0x349   : > { %v5882_v1 = vadd.f32 %v3027_v55, %v7795_v19  ;;  %v3029_v37 = vpop.f32.mrb[15].mxu1  ;;  %v3230_v27 = vpop.f32.mrb[133].mxu0  ;;  %v7974_v44 = vadd.f32 %v5879_v15, %v3220_v21 }
 0x34a   : > { %v3231_v6 = vpop.f32.mrb[134].mxu0 }
 0x34b   : > { %v3233_v30 = vpop.f32.mrb[135].mxu0  ;;  %5628 = vmatmul.mubr.bf16.gmra.mrb[116].mxu1 %v1950_v0  ;;  %v7977_v8 = vadd.f32 %v5882_v1, %v3223_v18  ;;  %v1952_v18 = vsel %vm1937_vm6, %v1949_v54, %v1951_v47  ;;  %v6299_v1 = vld [vmem:[#allocation2 + $0x50] sm:$0xff] }
 0x34c   : > { %5631 = vmatprep.mubr.msk.bf16.mxu1 %vm6536_vm5, %v6535_v24  ;;  %v1953_v37 = vrot.slane %v6299_v1, 3 }
 0x34e   : > { %v3032_v31 = vpop.f32.mrb[16].mxu1 }
 0x34f   : > { %v5885_v60 = vadd.f32 %v3032_v31, %v7800_v26  ;;  %v3034_v19 = vpop.f32.mrb[17].mxu1 }
 0x350   : > { %v3035_v42 = vpop.f32.mrb[18].mxu1  ;;  %v3236_v35 = vpop.f32.mrb[136].mxu0 }
 0x351   : > { %v5888_v21 = vadd.f32 %v3035_v42, %v7803_v23  ;;  %v3037_v13 = vpop.f32.mrb[19].mxu1  ;;  %v3238_v14 = vpop.f32.mrb[137].mxu0  ;;  %v7983_v57 = vadd.f32 %v5885_v60, %v3228_v56 }
 0x352   : > { %v3239_v15 = vpop.f32.mrb[138].mxu0 }
 0x353   : > { %v3241_v58 = vpop.f32.mrb[139].mxu0  ;;  %5632 = vmatmul.mubr.bf16.gmra.mrb[120].mxu1 %v1952_v18  ;;  %v7986_v55 = vadd.f32 %v5888_v21, %v3231_v6  ;;  %v1954_v6 = vsel %vm1937_vm6, %v1951_v47, %v1953_v37  ;;  %v6300_v21 = vld [vmem:[#allocation2 + $0x58] sm:$0xff] }
 0x354   : > { %5635 = vmatprep.mubr.msk.bf16.mxu1 %vm6536_vm5, %v6535_v24  ;;  %v1955_v13 = vrot.slane %v6300_v21, 3 }
 0x356   : > { %v3040_v26 = vpop.f32.mrb[20].mxu1 }
 0x357   : > { %v5891_v27 = vadd.f32 %v3040_v26, %v7808_v12  ;;  %v3042_v23 = vpop.f32.mrb[21].mxu1 }
 0x358   : > { %v3043_v0 = vpop.f32.mrb[22].mxu1  ;;  %v3244_v30 = vpop.f32.mrb[140].mxu0 }
 0x359   : > { %v5894_v56 = vadd.f32 %v3043_v0, %v7811_v11  ;;  %v3045_v31 = vpop.f32.mrb[23].mxu1  ;;  %v3246_v45 = vpop.f32.mrb[141].mxu0  ;;  %v7992_v54 = vadd.f32 %v5891_v27, %v3236_v35 }
 0x35a   : > { %v3247_v60 = vpop.f32.mrb[142].mxu0 }
 0x35b   : > { %v3249_v19 = vpop.f32.mrb[143].mxu0  ;;  %5636 = vmatmul.mubr.bf16.gmra.mrb[124].mxu1 %v1954_v6  ;;  %v7995_v42 = vadd.f32 %v5894_v56, %v3239_v15  ;;  %v1956_v15 = vsel %vm1937_vm6, %v1953_v37, %v1955_v13  ;;  %v6301_v56 = vld [vmem:[#allocation2 + $0x60] sm:$0xff] }
 0x35c   : > { %5639 = vmatprep.mubr.msk.bf16.mxu1 %vm6536_vm5, %v6535_v24  ;;  %v1957_v31 = vrot.slane %v6301_v56, 3 }
 0x35e   : > { %v3048_v12 = vpop.f32.mrb[24].mxu1 }
 0x35f   : > { %v5897_v14 = vadd.f32 %v3048_v12, %v7818_v34  ;;  %v3050_v11 = vpop.f32.mrb[25].mxu1 }
 0x360   : > { %v3051_v18 = vpop.f32.mrb[26].mxu1  ;;  %v3252_v58 = vpop.f32.mrb[144].mxu0 }
 0x361   : > { %v5900_v35 = vadd.f32 %v3051_v18, %v7823_v33  ;;  %v3053_v26 = vpop.f32.mrb[27].mxu1  ;;  %v3254_v1 = vpop.f32.mrb[145].mxu0  ;;  %v8001_v47 = vadd.f32 %v5897_v14, %v3244_v30 }
 0x362   : > { %v3255_v27 = vpop.f32.mrb[146].mxu0 }
 0x363   : > { %v3257_v23 = vpop.f32.mrb[147].mxu0  ;;  %5640 = vmatmul.mubr.bf16.gmra.mrb[128].mxu1 %v1956_v15  ;;  %v8004_v0 = vadd.f32 %v5900_v35, %v3247_v60  ;;  %v1958_v60 = vsel %vm1937_vm6, %v1955_v13, %v1957_v31  ;;  %v6302_v35 = vld [vmem:[#allocation2 + $0x68] sm:$0xff] }
 0x364   : > { %5643 = vmatprep.mubr.msk.bf16.mxu1 %vm6536_vm5, %v6535_v24  ;;  %v1959_v26 = vrot.slane %v6302_v35, 3 }
 0x366   : > { %v3056_v34 = vpop.f32.mrb[28].mxu1 }
 0x367   : > { %v5903_v45 = vadd.f32 %v3056_v34, %v7828_v28  ;;  %v3058_v33 = vpop.f32.mrb[29].mxu1 }
 0x368   : > { %v3059_v6 = vpop.f32.mrb[30].mxu1  ;;  %v3260_v19 = vpop.f32.mrb[148].mxu0 }
 0x369   : > { %v5906_v30 = vadd.f32 %v3059_v6, %v7831_v51  ;;  %v3061_v12 = vpop.f32.mrb[31].mxu1  ;;  %v3262_v21 = vpop.f32.mrb[149].mxu0  ;;  %v8010_v37 = vadd.f32 %v5903_v45, %v3252_v58 }
 0x36a   : > { %v3263_v14 = vpop.f32.mrb[150].mxu0 }
 0x36b   : > { %v3265_v11 = vpop.f32.mrb[151].mxu0  ;;  %5644 = vmatmul.mubr.bf16.gmra.mrb[132].mxu1 %v1958_v60  ;;  %v8013_v18 = vadd.f32 %v5906_v30, %v3255_v27  ;;  %v1960_v27 = vsel %vm1937_vm6, %v1957_v31, %v1959_v26  ;;  %v6303_v30 = vld [vmem:[#allocation2 + $0x70] sm:$0xff] }
 0x36c   : > { %5647 = vmatprep.mubr.msk.bf16.mxu1 %vm6536_vm5, %v6535_v24  ;;  %v1961_v12 = vrot.slane %v6303_v30, 3 }
 0x36e   : > { %v3064_v28 = vpop.f32.mrb[32].mxu1 }
 0x36f   : > { %v5909_v1 = vadd.f32 %v3064_v28, %v7837_v40  ;;  %v3066_v51 = vpop.f32.mrb[33].mxu1 }
 0x370   : > { %v3067_v15 = vpop.f32.mrb[34].mxu1  ;;  %v3268_v23 = vpop.f32.mrb[152].mxu0 }
 0x371   : > { %v5912_v58 = vadd.f32 %v3067_v15, %v7840_v5  ;;  %v3069_v34 = vpop.f32.mrb[35].mxu1  ;;  %v3270_v56 = vpop.f32.mrb[153].mxu0  ;;  %v8019_v13 = vadd.f32 %v5909_v1, %v3260_v19 }
 0x372   : > { %v3271_v45 = vpop.f32.mrb[154].mxu0 }
 0x373   : > { %v3273_v33 = vpop.f32.mrb[155].mxu0  ;;  %5648 = vmatmul.mubr.bf16.gmra.mrb[136].mxu1 %v1960_v27  ;;  %v8022_v6 = vadd.f32 %v5912_v58, %v3263_v14  ;;  %v1962_v14 = vsel %vm1937_vm6, %v1959_v26, %v1961_v12  ;;  %v6304_v58 = vld [vmem:[#allocation2 + $0x78] sm:$0xff] }
 0x374   : > { %5651 = vmatprep.mubr.msk.bf16.mxu1 %vm6536_vm5, %v6535_v24  ;;  %v1963_v34 = vrot.slane %v6304_v58, 3 }
 0x376   : > { %v3072_v40 = vpop.f32.mrb[36].mxu1 }
 0x377   : > { %v5915_v21 = vadd.f32 %v3072_v40, %v7846_v36  ;;  %v3074_v5 = vpop.f32.mrb[37].mxu1 }
 0x378   : > { %v3075_v60 = vpop.f32.mrb[38].mxu1  ;;  %v3276_v11 = vpop.f32.mrb[156].mxu0 }
 0x379   : > { %v5918_v19 = vadd.f32 %v3075_v60, %v7848_v63  ;;  %v3077_v28 = vpop.f32.mrb[39].mxu1  ;;  %v3278_v35 = vpop.f32.mrb[157].mxu0  ;;  %v8028_v31 = vadd.f32 %v5915_v21, %v3268_v23 }
 0x37a   : > { %v3279_v1 = vpop.f32.mrb[158].mxu0 }
 0x37b   : > { %v3281_v51 = vpop.f32.mrb[159].mxu0  ;;  %5652 = vmatmul.mubr.bf16.gmra.mrb[140].mxu1 %v1962_v14  ;;  %v8031_v15 = vadd.f32 %v5918_v19, %v3271_v45  ;;  %v1964_v45 = vsel %vm1937_vm6, %v1961_v12, %v1963_v34  ;;  %v6305_v19 = vld [vmem:[#allocation2 + $0x80] sm:$0xff] }
 0x37c   : > { %5655 = vmatprep.mubr.msk.bf16.mxu1 %vm6536_vm5, %v6535_v24  ;;  %v1965_v28 = vrot.slane %v6305_v19, 3 }
 0x37e   : > { %v3080_v36 = vpop.f32.mrb[40].mxu1 }
 0x37f   : > { %v5921_v56 = vadd.f32 %v3080_v36, %v7855_v53  ;;  %v3082_v63 = vpop.f32.mrb[41].mxu1 }
 0x380   : > { %v3083_v27 = vpop.f32.mrb[42].mxu1  ;;  %v3284_v33 = vpop.f32.mrb[160].mxu0 }
 0x381   : > { %v5924_v23 = vadd.f32 %v3083_v27, %v7860_v49  ;;  %v3085_v40 = vpop.f32.mrb[43].mxu1  ;;  %v3286_v30 = vpop.f32.mrb[161].mxu0  ;;  %v8037_v26 = vadd.f32 %v5921_v56, %v3276_v11 }
 0x382   : > { %v3287_v21 = vpop.f32.mrb[162].mxu0 }
 0x383   : > { %v3289_v5 = vpop.f32.mrb[163].mxu0  ;;  %5656 = vmatmul.mubr.bf16.gmra.mrb[144].mxu1 %v1964_v45  ;;  %v8040_v60 = vadd.f32 %v5924_v23, %v3279_v1  ;;  %v1966_v1 = vsel %vm1937_vm6, %v1963_v34, %v1965_v28  ;;  %v1967_v23 = vrot.slane %v7816_v25, 3 }
 0x384   : > { %5659 = vmatprep.mubr.msk.bf16.mxu1 %vm6536_vm5, %v6535_v24 }
 0x386   : > { %v3088_v53 = vpop.f32.mrb[44].mxu1 }
 0x387   : > { %v5927_v35 = vadd.f32 %v3088_v53, %v7868_v41  ;;  %v3090_v49 = vpop.f32.mrb[45].mxu1 }
 0x388   : > { %v3091_v14 = vpop.f32.mrb[46].mxu1  ;;  %v3292_v51 = vpop.f32.mrb[164].mxu0 }
 0x389   : > { %v5930_v11 = vadd.f32 %v3091_v14, %v7870_v39  ;;  %v3093_v36 = vpop.f32.mrb[47].mxu1  ;;  %v3294_v58 = vpop.f32.mrb[165].mxu0  ;;  %v8046_v12 = vadd.f32 %v5927_v35, %v3284_v33 }
 0x38a   : > { %v3295_v56 = vpop.f32.mrb[166].mxu0 }
 0x38b   : > { %v3297_v63 = vpop.f32.mrb[167].mxu0  ;;  %5660 = vmatmul.mubr.bf16.gmra.mrb[148].mxu1 %v1966_v1  ;;  %v8049_v27 = vadd.f32 %v5930_v11, %v3287_v21  ;;  %v1968_v21 = vsel %vm1937_vm6, %v1965_v28, %v1967_v23 }
 0x38c   : > { %5663 = vmatprep.mubr.msk.bf16.mxu1 %vm6536_vm5, %v6535_v24 }
 0x38e   : > { %v3096_v41 = vpop.f32.mrb[48].mxu1 }
 0x38f   : > { %v5933_v40 = vadd.f32 %v3096_v41, %v7874_v29  ;;  %v3098_v39 = vpop.f32.mrb[49].mxu1  ;;  %v6306_v29 = vld [vmem:[#allocation2 + $0x90] sm:$0xff] }
 0x390   : > { %v3099_v30 = vpop.f32.mrb[50].mxu1  ;;  %v3300_v45 = vpop.f32.mrb[168].mxu0  ;;  %v1969_v14 = vrot.slane %v6306_v29, 3 }
 0x391   : > { %v5936_v33 = vadd.f32 %v3099_v30, %v7876_v32  ;;  %v3101_v5 = vpop.f32.mrb[51].mxu1  ;;  %v3302_v53 = vpop.f32.mrb[169].mxu0  ;;  %v8056_v34 = vadd.f32 %v5933_v40, %v3292_v51  ;;  %v6307_v30 = vld [vmem:[#allocation2 + $0x98] sm:$0xff] }
 0x392   : > { %v3303_v19 = vpop.f32.mrb[170].mxu0 }
 0x393   : > { %v3305_v35 = vpop.f32.mrb[171].mxu0  ;;  %5664 = vmatmul.mubr.bf16.gmra.mrb[152].mxu1 %v1968_v21  ;;  %v8059_v49 = vadd.f32 %v5936_v33, %v3295_v56  ;;  %v1970_v56 = vsel %vm1937_vm6, %v1967_v23, %v1969_v14  ;;  %v1971_v33 = vrot.slane %v6307_v30, 3 }
 0x394   : > { %5667 = vmatprep.mubr.msk.bf16.mxu1 %vm6536_vm5, %v6535_v24 }
 0x396   : > { %v3104_v25 = vpop.f32.mrb[52].mxu1 }
 0x397   : > { %v5939_v11 = vadd.f32 %v3104_v25, %v7881_v17  ;;  %v3106_v32 = vpop.f32.mrb[53].mxu1 }
 0x398   : > { %v3107_v36 = vpop.f32.mrb[54].mxu1  ;;  %v3308_v58 = vpop.f32.mrb[172].mxu0 }
 0x399   : > { %v5942_v51 = vadd.f32 %v3107_v36, %v7883_v16  ;;  %v3109_v1 = vpop.f32.mrb[55].mxu1  ;;  %v3310_v63 = vpop.f32.mrb[173].mxu0  ;;  %v8065_v28 = vadd.f32 %v5939_v11, %v3300_v45  ;;  %v1973_v36 = vrot.slane %v7887_v38, 3 }
 0x39a   : > { %v3311_v41 = vpop.f32.mrb[174].mxu0 }
 0x39b   : > { %v3313_v40 = vpop.f32.mrb[175].mxu0  ;;  %5668 = vmatmul.mubr.bf16.gmra.mrb[156].mxu1 %v1970_v56  ;;  %v8068_v39 = vadd.f32 %v5942_v51, %v3303_v19  ;;  %v1972_v19 = vsel %vm1937_vm6, %v1969_v14, %v1971_v33 }
 0x39c   : > { %5671 = vmatprep.mubr.msk.bf16.mxu1 %vm6536_vm5, %v6535_v24 }
 0x39e   : > { %v3112_v17 = vpop.f32.mrb[56].mxu1 }
 0x39f   : > { %v5945_v5 = vadd.f32 %v3112_v17, %v7891_v9  ;;  %v3114_v16 = vpop.f32.mrb[57].mxu1 }
 0x3a0   : > { %v3115_v53 = vpop.f32.mrb[58].mxu1  ;;  %v3316_v21 = vpop.f32.mrb[176].mxu0 }
 0x3a1   : > { %v5948_v45 = vadd.f32 %v3115_v53, %v7893_v52  ;;  %v3117_v35 = vpop.f32.mrb[59].mxu1  ;;  %v3318_v25 = vpop.f32.mrb[177].mxu0  ;;  %v8074_v23 = vadd.f32 %v5945_v5, %v3308_v58 }
 0x3a2   : > { %v3319_v29 = vpop.f32.mrb[178].mxu0 }
 0x3a3   : > { %v3321_v11 = vpop.f32.mrb[179].mxu0  ;;  %5672 = vmatmul.mubr.bf16.gmra.mrb[160].mxu1 %v1972_v19  ;;  %v8077_v32 = vadd.f32 %v5948_v45, %v3311_v41  ;;  %v1974_v41 = vsel %vm1937_vm6, %v1971_v33, %v1973_v36  ;;  %v1977_v19 = vrot.slane %v7903_v22, 3 }
 0x3a4   : > { %5675 = vmatprep.mubr.msk.bf16.mxu1 %vm6536_vm5, %v6535_v24 }
 0x3a6   : > { %v3120_v9 = vpop.f32.mrb[60].mxu1 }
 0x3a7   : > { %v5951_v51 = vadd.f32 %v3120_v9, %v7899_v3  ;;  %v3122_v52 = vpop.f32.mrb[61].mxu1  ;;  %v6308_v3 = vld [vmem:[#allocation2] sm:$0xff] }
 0x3a8   : > { %v3123_v1 = vpop.f32.mrb[62].mxu1  ;;  %v3324_v63 = vpop.f32.mrb[180].mxu0  ;;  %v1975_v16 = vrot.slane %v6308_v3, 3 }
 0x3a9   : > { %v5954_v58 = vadd.f32 %v3123_v1, %v7901_v46  ;;  %v3125_v56 = vpop.f32.mrb[63].mxu1  ;;  %v3326_v40 = vpop.f32.mrb[181].mxu0  ;;  %v8084_v14 = vadd.f32 %v5951_v51, %v3316_v21 }
 0x3aa   : > { %v3327_v17 = vpop.f32.mrb[182].mxu0  ;;  %v1976_v33 = vsel %vm1937_vm6, %v1973_v36, %v1975_v16  ;;  %v1978_v11 = vsel %vm1937_vm6, %v1975_v16, %v1977_v19 }
 0x3ab   : > { %v3329_v30 = vpop.f32.mrb[183].mxu0  ;;  %5676 = vmatmul.mubr.bf16.gmra.mrb[68].mxu1 %v1974_v41  ;;  %v8087_v5 = vadd.f32 %v5954_v58, %v3319_v29 }
 0x3ac   : > { %5679 = vmatprep.mubr.msk.bf16.mxu1 %vm6536_vm5, %v6535_v24 }
 0x3ae   : > { %v3128_v38 = vpop.f32.mrb[64].mxu1 }
 0x3af   : > { %v5957_v53 = vadd.f32 %v3128_v38, %v7910_v20  ;;  %v3130_v46 = vpop.f32.mrb[65].mxu1 }
 0x3b0   : > { %v3131_v45 = vpop.f32.mrb[66].mxu1  ;;  %v8109_v46 = vld [vmem:[%s8484_s5] ss:$0 sm:$0xff] }
 0x3b1   : > { %v5960_v21 = vadd.f32 %v3131_v45, %v7912_v48  ;;  %v3133_v35 = vpop.f32.mrb[67].mxu1  ;;  %v8093_v25 = vadd.f32 %v5957_v53, %v3324_v63 }
 0x3b3   : > { %5680 = vmatmul.mubr.bf16.gmra.mrb[72].mxu1 %v1976_v33  ;;  %v8096_v29 = vadd.f32 %v5960_v21, %v3327_v17 }
 0x3b4   : > { %5683 = vmatprep.mubr.msk.bf16.mxu1 %vm6536_vm5, %v6535_v24 }
 0x3bb   : > { %5684 = vmatmul.mubr.bf16.gmra.mrb[76].mxu1 %v1978_v11 }
 0x3bc   : > { %5687 = vmatprep.mubr.msk.bf16.mxu1 %vm6536_vm5, %v6535_v24 }
 0x3c3   : > { %5688 = vmatmul.mubr.bf16.gmra.mrb[164].mxu1 %v1977_v19 }
 0x3ce   : > { %v3159_v20 = vpop.f32.mrb[88].mxu1 }
 0x3cf   : > { %v3160_v48 = vpop.f32.mrb[89].mxu1 }
 0x3d0   : > { %v3161_v9 = vpop.f32.mrb[90].mxu1 }
 0x3d1   : > { %v3162_v51 = vpop.f32.mrb[91].mxu1 }
 0x3ee   : > { %v3355_v36 = vpop.f32.mrb[92].mxu1 }
 0x3ef   : > { %v3356_v52 = vpop.f32.mrb[93].mxu1 }
 0x3f0   : > { %v3357_v1 = vpop.f32.mrb[94].mxu1 }
 0x3f1   : > { %v3358_v63 = vpop.f32.mrb[95].mxu1 }
 0x3f6   : > { %v3394_v58 = vpop.f32.mrb[96].mxu1 }
 0x3f7   : > { %v5609_v56 = vpop.f32.mrb[97].mxu1 }
 0x3f8   : > { %v3396_v40 = vpop.f32.mrb[98].mxu1 }
 0x3f9   : > { %v5610_v17 = vpop.f32.mrb[99].mxu1 }
 0x3fe   : > { %v3400_v22 = vpop.f32.mrb[100].mxu1 }
 0x3ff   : > { %v5869_v41 = vadd.f32 %v7955_v4, %v3400_v22  ;;  %v5613_v30 = vpop.f32.mrb[101].mxu1 }
 0x400   : > { %v3403_v38 = vpop.f32.mrb[102].mxu1 }
 0x401   : > { %v5872_v3 = vadd.f32 %v7958_v50, %v3403_v38  ;;  %v5614_v16 = vpop.f32.mrb[103].mxu1  ;;  %v3563_v11 = vmul.f32 %v5869_v41, %v8109_v46  ;;  %v8118_v50 = vld [vmem:[%s8485_s6] ss:$0 sm:$0xff] }
 0x403   : > { %v3607_v51 = vadd.f32 %v8118_v50, %v3563_v11  ;;  %v3564_v63 = vmul.f32 %v5872_v3, %v8109_v46 }
 0x405   : > { %v3644_v30 = vmax.f32 %v3607_v51, 0.0 }
 0x406   : > { %v3408_v53 = vpop.f32.mrb[104].mxu1 }
 0x407   : > { %v5875_v45 = vadd.f32 %v7964_v43, %v3408_v53  ;;  %v5617_v21 = vpop.f32.mrb[105].mxu1  ;;  %v3608_v53 = vadd.f32 %v8118_v50, %v3564_v63 }
 0x408   : > { %v3411_v35 = vpop.f32.mrb[106].mxu1 }
 0x409   : > { %v3565_v33 = vmul.f32 %v5875_v45, %v8109_v46  ;;  %v5878_v19 = vadd.f32 %v7967_v62, %v3411_v35  ;;  %v5618_v4 = vpop.f32.mrb[107].mxu1 }
 0x40b   : > { %v3609_v20 = vadd.f32 %v8118_v50, %v3565_v33  ;;  %v3566_v48 = vmul.f32 %v5878_v19, %v8109_v46  ;;  %v3645_v19 = vmax.f32 %v3608_v53, 0.0 }
 0x40d   : > { %v3646_v9 = vmax.f32 %v3609_v20, 0.0  ;;  %v3610_v43 = vadd.f32 %v8118_v50, %v3566_v48 }
 0x40e   : > { %v3416_v36 = vpop.f32.mrb[108].mxu1 }
 0x40f   : > { %v3647_v52 = vmax.f32 %v3610_v43, 0.0  ;;  %v5881_v62 = vadd.f32 %v7974_v44, %v3416_v36  ;;  %v5621_v1 = vpop.f32.mrb[109].mxu1  ;;  %v3685_v56 = vrot.slane %v3646_v9, 2 }
 0x410   : > { %v3419_v58 = vpop.f32.mrb[110].mxu1 }
 0x411   : > { %v3686_v40 = vrot.slane %v3647_v52, 2  ;;  %v3567_v17 = vmul.f32 %v5881_v62, %v8109_v46  ;;  %v5884_v22 = vadd.f32 %v7977_v8, %v3419_v58  ;;  %v5622_v41 = vpop.f32.mrb[111].mxu1 }
 0x413   : > { %v3687_v38 = vsel %vm1579_vm4, %v3685_v56, %v3686_v40  ;;  %v3611_v16 = vadd.f32 %v8118_v50, %v3567_v17 }
 0x414   : > { %v3693_v45 = vadd.f32 %v3687_v38, %v3644_v30 }
 0x415   : > { %v3648_v44 = vmax.f32 %v3611_v16, 0.0 }
 0x416   : > { %v3424_v21 = vpop.f32.mrb[112].mxu1 }
 0x417   : > { %v3688_v35 = vrot.slane %v3648_v44, 2  ;;  %v5887_v3 = vadd.f32 %v7983_v57, %v3424_v21  ;;  %v5625_v33 = vpop.f32.mrb[113].mxu1 }
 0x418   : > { %v3427_v4 = vpop.f32.mrb[114].mxu1 }
 0x419   : > { %v3689_v11 = vsel %vm1579_vm4, %v3686_v40, %v3688_v35  ;;  %v3695_v8 = vadd.f32 %v3688_v35, %v3646_v9  ;;  %v5890_v20 = vadd.f32 %v7986_v55, %v3427_v4  ;;  %v5626_v48 = vpop.f32.mrb[115].mxu1  ;;  %v3568_v55 = vmul.f32 %v5884_v22, %v8109_v46 }
 0x41a   : > { %v3694_v43 = vadd.f32 %v3689_v11, %v3645_v19  ;;  %v3569_v4 = vmul.f32 %v5887_v3, %v8109_v46 }
 0x41b   : > { %v3697_v51 = vpack.c.bf16 %v3695_v8, %v3695_v8  ;;  %v3570_v36 = vmul.f32 %v5890_v20, %v8109_v46  ;;  %v3612_v22 = vadd.f32 %v8118_v50, %v3568_v55 }
 0x41c   : > { %v3696_v52 = vpack.c.bf16 %v3694_v43, %v3693_v45 }
 0x41d   : > { %v3614_v62 = vadd.f32 %v8118_v50, %v3570_v36  ;;  %v3707_v1 = vshrl.u32 %v3697_v51, 16  ;;  %v3710_v63 = vshll.u32 %v3697_v51, 16 }
 0x41e   : > { %v3432_v58 = vpop.f32.mrb[116].mxu1  ;;  %v3699_v57 = vshrl.u32 %v3696_v52, 16  ;;  %v3702_v56 = vshll.u32 %v3696_v52, 16 }
 0x41f   : > { %v3651_v17 = vmax.f32 %v3614_v62, 0.0  ;;  %v5893_v41 = vadd.f32 %v7992_v54, %v3432_v58  ;;  %v5629_v40 = vpop.f32.mrb[117].mxu1  ;;  %v3709_v9 = vrot.slane %v3707_v1, 1  ;;  %v3712_v30 = vrot.slane %v3710_v63, 2 }
 0x420   : > { %v3435_v38 = vpop.f32.mrb[118].mxu1  ;;  %v3701_v16 = vrot.slane %v3699_v57, 1  ;;  %v3704_v53 = vrot.slane %v3702_v56, 2  ;;  %v3649_v63 = vmax.f32 %v3612_v22, 0.0 }
 0x421   : > { %v3764_v21 = vrot.slane %v3651_v17, 2  ;;  %v3571_v45 = vmul.f32 %v5893_v41, %v8109_v46  ;;  %v5896_v35 = vadd.f32 %v7995_v42, %v3435_v38  ;;  %v5630_v33 = vpop.f32.mrb[119].mxu1  ;;  %v3713_v19 = vor.u32 %v3712_v30, %v3709_v9  ;;  %v8151_v42 = vld [vmem:[%s8630_s14] sm:$0xf]  ;;  %s8418_s14 = scalar_lea.vmem [#allocation12], %s5243_s10 }
 0x422   : > { %v3705_v11 = vor.u32 %v3704_v53, %v3701_v16  ;;  %s5116_s27 = sshll.u32 %s8418_s14, 4  ;;  %s8428_s27 = int_to_ptr.vmem [resolvable:$true] %s5116_s27 }
 0x423   : > { %v3772_v8 = vadd.f32 %v3764_v21, %v3648_v44  ;;  %v3615_v54 = vadd.f32 %v8118_v50, %v3571_v45  ;;  %v3572_v20 = vmul.f32 %v5896_v35, %v8109_v46  ;;  %v3613_v44 = vadd.f32 %v8118_v50, %v3569_v4  ;;  %s6451_s17 = scalar_lea.vmem %s8428_s27, 512 }
 0x424   : > { %v3714_v48 = vsel %vm1457_vm2, %v3705_v11, %v3713_v19  ;;  %p6452_p3 = scmp.ne.s32.totalorder %s8428_s27, %s6451_s17 }
 0x425   : > { %v3652_v43 = vmax.f32 %v3615_v54, 0.0  ;;  %v8146_v51 = vadd.f32 %v8118_v50, %v3572_v20  ;;  %5692 = vmatpush3.bf16.msra.mxu0 %v3714_v48  ;;  %v3650_v40 = vmax.f32 %v3613_v44, 0.0 }
 0x426   : > { %v3440_v3 = vpop.f32.mrb[120].mxu1  ;;  %5697 = vmatprep.subr.bf16.mxu0 %v6535_v24  ;;  %p6453_p5 = pnand %p6452_p3, %p6786_p10 }
 0x427   : > { %v3765_v36 = vrot.slane %v3652_v43, 2  ;;  %v3653_v52 = vmax.f32 %v8146_v51, 0.0  ;;  %v5899_v62 = vadd.f32 %v8001_v47, %v3440_v3  ;;  %v5633_v1 = vpop.f32.mrb[121].mxu1 }
 0x428   : > { %v3443_v58 = vpop.f32.mrb[122].mxu1  ;;  %5694 = vmatmul.mubr.msk.bf16.vlgmr.msra.gmra.mrb[184].mxu0 %vm3716_vm7, %v8151_v42  ;;  %p6454_p7 = pneg %p6453_p5 }
 0x429   : > { %v3766_v57 = vsel %vm1579_vm4, %v3764_v21, %v3765_v36  ;;  %v3767_v56 = vrot.slane %v3653_v52, 2  ;;  %v5902_v17 = vadd.f32 %v8004_v0, %v3443_v58  ;;  %v5634_v41 = vpop.f32.mrb[123].mxu1  ;;  %5699 = vmatprep.mubr.msk.bf16.mxu0 %vm6536_vm5, %v6535_v24 }
 0x42a   : > { %v3773_v9 = vadd.f32 %v3766_v57, %v3649_v63 }
 0x42b   : > { %v3768_v30 = vsel %vm1579_vm4, %v3765_v36, %v3767_v56  ;;  %v3574_v47 = vmul.f32 %v5902_v17, %v8109_v46 }
 0x42c   : > { %v3774_v55 = vadd.f32 %v3768_v30, %v3650_v40  ;;  %v3775_v38 = vpack.c.bf16 %v3773_v9, %v3772_v8  ;;  %v3573_v8 = vmul.f32 %v5899_v62, %v8109_v46 }
 0x42d   : > { %v3618_v21 = vadd.f32 %v8118_v50, %v3574_v47 }
 0x42e   : > { %v3448_v16 = vpop.f32.mrb[124].mxu1  ;;  %v3776_v53 = vpack.c.bf16 %v3774_v55, %v3774_v55  ;;  %v3779_v45 = vshrl.u32 %v3775_v38, 16  ;;  %v3782_v35 = vshll.u32 %v3775_v38, 16  ;;  %v3617_v56 = vadd.f32 %v8118_v50, %v3573_v8 }
 0x42f   : > { %v5905_v0 = vadd.f32 %v8010_v37, %v3448_v16  ;;  %v5637_v33 = vpop.f32.mrb[125].mxu1  ;;  %v3655_v3 = vmax.f32 %v3618_v21, 0.0 }
 0x430   : > { %v3451_v19 = vpop.f32.mrb[126].mxu1  ;;  %v3781_v4 = vrot.slane %v3779_v45, 3  ;;  %v3784_v11 = vrot.slane %v3782_v35, 4  ;;  %v3787_v54 = vshrl.u32 %v3776_v53, 16  ;;  %v3790_v20 = vshll.u32 %v3776_v53, 16 }
 0x431   : > { %v3575_v22 = vmul.f32 %v5905_v0, %v8109_v46  ;;  %v5908_v48 = vadd.f32 %v8013_v18, %v3451_v19  ;;  %v5638_v43 = vpop.f32.mrb[127].mxu1  ;;  %v3840_v41 = vrot.slane %v3655_v3, 2  ;;  %v3654_v45 = vmax.f32 %v3617_v56, 0.0 }
 0x432   : > { %v3789_v51 = vrot.slane %v3787_v54, 3  ;;  %v3792_v44 = vrot.slane %v3790_v20, 4  ;;  %v3785_v1 = vor.u32 %v3784_v11, %v3781_v4 }
 0x433   : > { %v3619_v36 = vadd.f32 %v8118_v50, %v3575_v22  ;;  %v3576_v37 = vmul.f32 %v5908_v48, %v8109_v46 }
 0x434   : > { %v3793_v63 = vor.u32 %v3792_v44, %v3789_v51 }
 0x435   : > { %v3656_v58 = vmax.f32 %v3619_v36, 0.0  ;;  %v3620_v57 = vadd.f32 %v8118_v50, %v3576_v37 }
 0x436   : > { %v3456_v17 = vpop.f32.mrb[128].mxu1  ;;  %v3794_v18 = vsel %vm3777_vm8, %v3785_v1, %v3793_v63 }
 0x437   : > { %v3841_v62 = vrot.slane %v3656_v58, 2  ;;  %v3657_v40 = vmax.f32 %v3620_v57, 0.0  ;;  %v5911_v9 = vadd.f32 %v8019_v13, %v3456_v17  ;;  %v5641_v30 = vpop.f32.mrb[129].mxu1  ;;  %5698 = vmatpush3.bf16.msra.mxu0 %v3794_v18 }
 0x438   : > { %v3459_v47 = vpop.f32.mrb[130].mxu1  ;;  %5703 = vmatprep.subr.bf16.mxu0 %v6535_v24 }
 0x439   : > { %v3842_v55 = vsel %vm1579_vm4, %v3840_v41, %v3841_v62  ;;  %v3843_v38 = vrot.slane %v3657_v40, 2  ;;  %v5914_v16 = vadd.f32 %v8022_v6, %v3459_v47  ;;  %v5642_v53 = vpop.f32.mrb[131].mxu1  ;;  %v3577_v36 = vmul.f32 %v5911_v9, %v8109_v46 }
 0x43a   : > { %v3848_v35 = vadd.f32 %v3842_v55, %v3653_v52  ;;  %5700 = vmatmul.mubr.msk.bf16.vlgmr.msra.gmra.mrb[188].mxu0 %vm3716_vm7, %v8151_v42 }
 0x43b   : > { %v3844_v21 = vsel %vm1579_vm4, %v3841_v62, %v3843_v38  ;;  %v3850_v0 = vadd.f32 %v3843_v38, %v3655_v3  ;;  %5705 = vmatprep.mubr.msk.bf16.mxu0 %vm6536_vm5, %v6535_v24  ;;  %v3621_v18 = vadd.f32 %v8118_v50, %v3577_v36  ;;  %v3578_v55 = vmul.f32 %v5914_v16, %v8109_v46 }
 0x43c   : > { %v3849_v13 = vadd.f32 %v3844_v21, %v3654_v45 }
 0x43d   : > { %v3852_v33 = vpack.c.bf16 %v3850_v0, %v3850_v0  ;;  %v3622_v16 = vadd.f32 %v8118_v50, %v3578_v55 }
 0x43e   : > { %v3464_v19 = vpop.f32.mrb[132].mxu1  ;;  %v3851_v4 = vpack.c.bf16 %v3849_v13, %v3848_v35  ;;  %v3658_v13 = vmax.f32 %v3621_v18, 0.0 }
 0x43f   : > { %v5917_v11 = vadd.f32 %v8028_v31, %v3464_v19  ;;  %v5645_v54 = vpop.f32.mrb[133].mxu1  ;;  %v3862_v6 = vshrl.u32 %v3852_v33, 16  ;;  %v3865_v20 = vshll.u32 %v3852_v33, 16 }
 0x440   : > { %v3467_v22 = vpop.f32.mrb[134].mxu1  ;;  %v3854_v52 = vshrl.u32 %v3851_v4, 16  ;;  %v3857_v48 = vshll.u32 %v3851_v4, 16 }
 0x441   : > { %v3579_v43 = vmul.f32 %v5917_v11, %v8109_v46  ;;  %v5920_v8 = vadd.f32 %v8031_v15, %v3467_v22  ;;  %v5646_v51 = vpop.f32.mrb[135].mxu1  ;;  %v3864_v44 = vrot.slane %v3862_v6, 1  ;;  %v3867_v3 = vrot.slane %v3865_v20, 2 }
 0x442   : > { %v3856_v37 = vrot.slane %v3854_v52, 1  ;;  %v3859_v1 = vrot.slane %v3857_v48, 2  ;;  %v3659_v20 = vmax.f32 %v3622_v16, 0.0 }
 0x443   : > { %v3623_v63 = vadd.f32 %v8118_v50, %v3579_v43  ;;  %v3580_v31 = vmul.f32 %v5920_v8, %v8109_v46  ;;  %v3868_v58 = vor.u32 %v3867_v3, %v3864_v44 }
 0x444   : > { %v3860_v57 = vor.u32 %v3859_v1, %v3856_v37 }
 0x445   : > { %v3660_v56 = vmax.f32 %v3623_v63, 0.0  ;;  %v3624_v17 = vadd.f32 %v8118_v50, %v3580_v31 }
 0x446   : > { %v3472_v41 = vpop.f32.mrb[136].mxu1  ;;  %v3869_v15 = vsel %vm1457_vm2, %v3860_v57, %v3868_v58 }
 0x447   : > { %v3915_v62 = vrot.slane %v3660_v56, 2  ;;  %v3661_v30 = vmax.f32 %v3624_v17, 0.0  ;;  %v5923_v9 = vadd.f32 %v8037_v26, %v3472_v41  ;;  %v5649_v47 = vpop.f32.mrb[137].mxu1  ;;  %5704 = vmatpush3.bf16.msra.mxu0 %v3869_v15 }
 0x448   : > { %v3475_v38 = vpop.f32.mrb[138].mxu1  ;;  %5709 = vmatprep.subr.bf16.mxu0 %v6535_v24 }
 0x449   : > { %v3923_v53 = vadd.f32 %v3915_v62, %v3657_v40  ;;  %v3916_v45 = vrot.slane %v3661_v30, 2  ;;  %v3581_v35 = vmul.f32 %v5923_v9, %v8109_v46  ;;  %v5926_v21 = vadd.f32 %v8040_v60, %v3475_v38  ;;  %v5650_v0 = vpop.f32.mrb[139].mxu1 }
 0x44a   : > { %5706 = vmatmul.mubr.msk.bf16.vlgmr.msra.gmra.mrb[192].mxu0 %vm3716_vm7, %v8151_v42 }
 0x44b   : > { %v3917_v26 = vsel %vm1579_vm4, %v3915_v62, %v3916_v45  ;;  %v3625_v33 = vadd.f32 %v8118_v50, %v3581_v35  ;;  %5711 = vmatprep.mubr.msk.bf16.mxu0 %vm6536_vm5, %v6535_v24  ;;  %v3582_v15 = vmul.f32 %v5926_v21, %v8109_v46 }
 0x44c   : > { %v3924_v40 = vadd.f32 %v3917_v26, %v3658_v13 }
 0x44d   : > { %v3662_v19 = vmax.f32 %v3625_v33, 0.0 }
 0x44e   : > { %v3480_v4 = vpop.f32.mrb[140].mxu1  ;;  %v3926_v11 = vpack.c.bf16 %v3924_v40, %v3923_v53 }
 0x44f   : > { %v3918_v54 = vrot.slane %v3662_v19, 2  ;;  %v5929_v60 = vadd.f32 %v8046_v12, %v3480_v4  ;;  %v5653_v6 = vpop.f32.mrb[141].mxu1 }
 0x450   : > { %v3483_v22 = vpop.f32.mrb[142].mxu1  ;;  %v3929_v44 = vshrl.u32 %v3926_v11, 16  ;;  %v3932_v3 = vshll.u32 %v3926_v11, 16 }
 0x451   : > { %v3919_v52 = vsel %vm1579_vm4, %v3916_v45, %v3918_v54  ;;  %v3583_v48 = vmul.f32 %v5929_v60, %v8109_v46  ;;  %v5932_v43 = vadd.f32 %v8049_v27, %v3483_v22  ;;  %v5654_v8 = vpop.f32.mrb[143].mxu1 }
 0x452   : > { %v3925_v51 = vadd.f32 %v3919_v52, %v3659_v20  ;;  %v3931_v58 = vrot.slane %v3929_v44, 3  ;;  %v3934_v57 = vrot.slane %v3932_v3, 4 }
 0x453   : > { %v3627_v36 = vadd.f32 %v8118_v50, %v3583_v48  ;;  %v3584_v37 = vmul.f32 %v5932_v43, %v8109_v46 }
 0x454   : > { %v3927_v1 = vpack.c.bf16 %v3925_v51, %v3925_v51  ;;  %v3935_v35 = vor.u32 %v3934_v57, %v3931_v58 }
 0x455   : > { %v3664_v63 = vmax.f32 %v3627_v36, 0.0  ;;  %v3628_v12 = vadd.f32 %v8118_v50, %v3584_v37 }
 0x456   : > { %v3488_v31 = vpop.f32.mrb[144].mxu1  ;;  %v3937_v56 = vshrl.u32 %v3927_v1, 16  ;;  %v3940_v17 = vshll.u32 %v3927_v1, 16 }
 0x457   : > { %v3665_v18 = vmax.f32 %v3628_v12, 0.0  ;;  %v5935_v27 = vadd.f32 %v8056_v34, %v3488_v31  ;;  %v5657_v41 = vpop.f32.mrb[145].mxu1  ;;  %v3990_v47 = vrot.slane %v3664_v63, 2  ;;  %v3626_v34 = vadd.f32 %v8118_v50, %v3582_v15 }
 0x458   : > { %v3491_v62 = vpop.f32.mrb[146].mxu1  ;;  %v3939_v30 = vrot.slane %v3937_v56, 3  ;;  %v3942_v9 = vrot.slane %v3940_v17, 4 }
 0x459   : > { %v3991_v55 = vrot.slane %v3665_v18, 2  ;;  %v3585_v38 = vmul.f32 %v5935_v27, %v8109_v46  ;;  %v5938_v53 = vadd.f32 %v8059_v49, %v3491_v62  ;;  %v5658_v45 = vpop.f32.mrb[147].mxu1  ;;  %v3663_v54 = vmax.f32 %v3626_v34, 0.0 }
 0x45a   : > { %v3943_v0 = vor.u32 %v3942_v9, %v3939_v30 }
 0x45b   : > { %v3992_v13 = vsel %vm1579_vm4, %v3990_v47, %v3991_v55  ;;  %v3629_v26 = vadd.f32 %v8118_v50, %v3585_v38  ;;  %v3586_v58 = vmul.f32 %v5938_v53, %v8109_v46 }
 0x45c   : > { %v3998_v33 = vadd.f32 %v3992_v13, %v3662_v19  ;;  %v3944_v21 = vsel %vm3777_vm8, %v3935_v35, %v3943_v0 }
 0x45d   : > { %v3666_v16 = vmax.f32 %v3629_v26, 0.0  ;;  %5710 = vmatpush3.bf16.msra.mxu0 %v3944_v21  ;;  %v3630_v38 = vadd.f32 %v8118_v50, %v3586_v58 }
 0x45e   : > { %v3496_v40 = vpop.f32.mrb[148].mxu1  ;;  %5715 = vmatprep.subr.bf16.mxu0 %v6535_v24 }
 0x45f   : > { %v3993_v4 = vrot.slane %v3666_v16, 2  ;;  %v5941_v49 = vadd.f32 %v8065_v28, %v3496_v40  ;;  %v5661_v11 = vpop.f32.mrb[149].mxu1  ;;  %v3667_v21 = vmax.f32 %v3630_v38, 0.0 }
 0x460   : > { %v3499_v60 = vpop.f32.mrb[150].mxu1  ;;  %5712 = vmatmul.mubr.msk.bf16.vlgmr.msra.gmra.mrb[196].mxu0 %vm3716_vm7, %v8151_v42 }
 0x461   : > { %v3994_v6 = vsel %vm1579_vm4, %v3991_v55, %v3993_v4  ;;  %v4000_v20 = vadd.f32 %v3993_v4, %v3664_v63  ;;  %v5944_v19 = vadd.f32 %v8068_v39, %v3499_v60  ;;  %v5662_v22 = vpop.f32.mrb[151].mxu1  ;;  %5717 = vmatprep.mubr.msk.bf16.mxu0 %vm6536_vm5, %v6535_v24  ;;  %v3587_v30 = vmul.f32 %v5941_v49, %v8109_v46 }
 0x462   : > { %v3999_v52 = vadd.f32 %v3994_v6, %v3663_v54 }
 0x463   : > { %v4002_v48 = vpack.c.bf16 %v4000_v20, %v4000_v20  ;;  %v3588_v43 = vmul.f32 %v5944_v19, %v8109_v46 }
 0x464   : > { %v4001_v28 = vpack.c.bf16 %v3999_v52, %v3998_v33 }
 0x465   : > { %v3632_v8 = vadd.f32 %v8118_v50, %v3588_v43  ;;  %v4012_v51 = vshrl.u32 %v4002_v48, 16  ;;  %v4015_v44 = vshll.u32 %v4002_v48, 16 }
 0x466   : > { %v3504_v3 = vpop.f32.mrb[152].mxu1  ;;  %v4004_v36 = vshrl.u32 %v4001_v28, 16  ;;  %v4007_v37 = vshll.u32 %v4001_v28, 16 }
 0x467   : > { %v3669_v1 = vmax.f32 %v3632_v8, 0.0  ;;  %v5947_v63 = vadd.f32 %v8074_v23, %v3504_v3  ;;  %v5665_v39 = vpop.f32.mrb[153].mxu1  ;;  %v4014_v12 = vrot.slane %v4012_v51, 1  ;;  %v4017_v31 = vrot.slane %v4015_v44, 2 }
 0x468   : > { %v3507_v57 = vpop.f32.mrb[154].mxu1  ;;  %v4006_v56 = vrot.slane %v4004_v36, 1  ;;  %v4009_v17 = vrot.slane %v4007_v37, 2 }
 0x469   : > { %v4065_v18 = vrot.slane %v3669_v1, 2  ;;  %v3589_v27 = vmul.f32 %v5947_v63, %v8109_v46  ;;  %v5950_v41 = vadd.f32 %v8077_v32, %v3507_v57  ;;  %v5666_v15 = vpop.f32.mrb[155].mxu1  ;;  %v4018_v62 = vor.u32 %v4017_v31, %v4014_v12 }
 0x46a   : > { %v4010_v9 = vor.u32 %v4009_v17, %v4006_v56  ;;  %v3631_v32 = vadd.f32 %v8118_v50, %v3587_v30 }
 0x46b   : > { %v4073_v47 = vadd.f32 %v4065_v18, %v3666_v16  ;;  %v3633_v23 = vadd.f32 %v8118_v50, %v3589_v27  ;;  %v3590_v55 = vmul.f32 %v5950_v41, %v8109_v46 }
 0x46c   : > { %v4019_v53 = vsel %vm1457_vm2, %v4010_v9, %v4018_v62  ;;  %v3668_v54 = vmax.f32 %v3631_v32, 0.0 }
 0x46d   : > { %v3670_v45 = vmax.f32 %v3633_v23, 0.0  ;;  %v8240_v35 = vadd.f32 %v8118_v50, %v3590_v55  ;;  %5716 = vmatpush3.bf16.msra.mxu0 %v4019_v53 }
 0x46e   : > { %v3512_v0 = vpop.f32.mrb[156].mxu1  ;;  %5721 = vmatprep.subr.bf16.mxu0 %v6535_v24 }
 0x46f   : > { %v4066_v13 = vrot.slane %v3670_v45, 2  ;;  %v3671_v26 = vmax.f32 %v8240_v35, 0.0  ;;  %v5953_v34 = vadd.f32 %v8084_v14, %v3512_v0  ;;  %v5669_v33 = vpop.f32.mrb[157].mxu1 }
 0x470   : > { %v3515_v16 = vpop.f32.mrb[158].mxu1  ;;  %5718 = vmatmul.mubr.msk.bf16.vlgmr.msra.gmra.mrb[200].mxu0 %vm3716_vm7, %v8151_v42 }
 0x471   : > { %v4067_v40 = vsel %vm1579_vm4, %v4065_v18, %v4066_v13  ;;  %v4068_v4 = vrot.slane %v3671_v26, 2  ;;  %v5956_v49 = vadd.f32 %v8087_v5, %v3515_v16  ;;  %v5670_v11 = vpop.f32.mrb[159].mxu1  ;;  %5723 = vmatprep.mubr.msk.bf16.mxu0 %vm6536_vm5, %v6535_v24  ;;  %v3591_v12 = vmul.f32 %v5953_v34, %v8109_v46 }
 0x472   : > { %v4074_v60 = vadd.f32 %v4067_v40, %v3667_v21 }
 0x473   : > { %v4069_v6 = vsel %vm1579_vm4, %v4066_v13, %v4068_v4  ;;  %v3592_v14 = vmul.f32 %v5956_v49, %v8109_v46  ;;  %v3635_v15 = vadd.f32 %v8118_v50, %v3591_v12 }
 0x474   : > { %v4075_v20 = vadd.f32 %v4069_v6, %v3668_v54  ;;  %v4076_v19 = vpack.c.bf16 %v4074_v60, %v4073_v47 }
 0x475   : > { %v3636_v28 = vadd.f32 %v8118_v50, %v3592_v14  ;;  %v3672_v0 = vmax.f32 %v3635_v15, 0.0 }
 0x476   : > { %v3520_v22 = vpop.f32.mrb[160].mxu1  ;;  %v4077_v52 = vpack.c.bf16 %v4075_v20, %v4075_v20  ;;  %v4079_v48 = vshrl.u32 %v4076_v19, 16  ;;  %v4082_v43 = vshll.u32 %v4076_v19, 16 }
 0x477   : > { %v5959_v5 = vadd.f32 %v8093_v25, %v3520_v22  ;;  %v5673_v8 = vpop.f32.mrb[161].mxu1  ;;  %v3673_v57 = vmax.f32 %v3636_v28, 0.0 }
 0x478   : > { %v3523_v51 = vpop.f32.mrb[162].mxu1  ;;  %v4081_v44 = vrot.slane %v4079_v48, 3  ;;  %v4084_v3 = vrot.slane %v4082_v43, 4  ;;  %v4087_v36 = vshrl.u32 %v4077_v52, 16  ;;  %v4090_v37 = vshll.u32 %v4077_v52, 16 }
 0x479   : > { %v3593_v1 = vmul.f32 %v5959_v5, %v8109_v46  ;;  %v5962_v63 = vadd.f32 %v8096_v29, %v3523_v51  ;;  %v5674_v39 = vpop.f32.mrb[163].mxu1  ;;  %v4140_v30 = vrot.slane %v3673_v57, 2 }
 0x47a   : > { %v4089_v31 = vrot.slane %v4087_v36, 3  ;;  %v4092_v58 = vrot.slane %v4090_v37, 4  ;;  %v4085_v17 = vor.u32 %v4084_v3, %v4081_v44 }
 0x47b   : > { %v3637_v56 = vadd.f32 %v8118_v50, %v3593_v1  ;;  %v3594_v25 = vmul.f32 %v5962_v63, %v8109_v46 }
 0x47c   : > { %v4093_v18 = vor.u32 %v4092_v58, %v4089_v31 }
 0x47d   : > { %v3674_v27 = vmax.f32 %v3637_v56, 0.0  ;;  %v3638_v41 = vadd.f32 %v8118_v50, %v3594_v25 }
 0x47e   : > { %v3528_v62 = vpop.f32.mrb[68].mxu1  ;;  %v4094_v29 = vsel %vm3777_vm8, %v4085_v17, %v4093_v18 }
 0x47f   : > { %v4141_v9 = vrot.slane %v3674_v27, 2  ;;  %v3675_v47 = vmax.f32 %v3638_v41, 0.0  ;;  %v5963_v23 = vadd.f32 %v3528_v62, %v7919_v61  ;;  %v5677_v55 = vpop.f32.mrb[69].mxu1  ;;  %5722 = vmatpush3.bf16.msra.mxu0 %v4094_v29 }
 0x480   : > { %v3531_v38 = vpop.f32.mrb[70].mxu1  ;;  %5727 = vmatprep.subr.bf16.mxu0 %v6535_v24 }
 0x481   : > { %v4142_v53 = vsel %vm1579_vm4, %v4140_v30, %v4141_v9  ;;  %v4143_v45 = vrot.slane %v3675_v47, 2  ;;  %v5964_v35 = vadd.f32 %v3531_v38, %v7923_v59  ;;  %v5678_v32 = vpop.f32.mrb[71].mxu1  ;;  %v3595_v52 = vmul.f32 %v5963_v23, %v8109_v46 }
 0x482   : > { %v4148_v13 = vadd.f32 %v4142_v53, %v3671_v26  ;;  %5724 = vmatmul.mubr.msk.bf16.vlgmr.msra.gmra.mrb[204].mxu0 %vm3716_vm7, %v8151_v42 }
 0x483   : > { %v4144_v34 = vsel %vm1579_vm4, %v4141_v9, %v4143_v45  ;;  %v4150_v33 = vadd.f32 %v4143_v45, %v3673_v57  ;;  %5729 = vmatprep.mubr.msk.bf16.mxu0 %vm6536_vm5, %v6535_v24  ;;  %v3639_v3 = vadd.f32 %v8118_v50, %v3595_v52  ;;  %v3596_v12 = vmul.f32 %v5964_v35, %v8109_v46  ;;  %v8632_v52 = vld [vmem:[#allocation20_spill] sm:$0xff] }
 0x484   : > { %v4149_v61 = vadd.f32 %v4144_v34, %v3672_v0 }
 0x485   : > { %v4152_v21 = vpack.c.bf16 %v4150_v33, %v4150_v33  ;;  %v3676_v17 = vmax.f32 %v3639_v3, 0.0  ;;  %v3640_v27 = vadd.f32 %v8118_v50, %v3596_v12  ;;  %v8640_v12 = vld [vmem:[#allocation25_spill] sm:$0xff] }
 0x486   : > { %v3536_v16 = vpop.f32.mrb[72].mxu1  ;;  %v4151_v40 = vpack.c.bf16 %v4149_v61, %v4148_v13 }
 0x487   : > { %v5965_v4 = vadd.f32 %v3536_v16, %v7927_v7  ;;  %v5681_v49 = vpop.f32.mrb[73].mxu1  ;;  %v4162_v59 = vshrl.u32 %v4152_v21, 16  ;;  %v4165_v11 = vshll.u32 %v4152_v21, 16  ;;  %v3677_v9 = vmax.f32 %v3640_v27, 0.0  ;;  %v6258_v16 = vld [vmem:[#allocation9] sm:$0xff]   ;;  %v8647_v27 = vld [vmem:[#allocation28_spill] sm:$0xff] }
 0x488   : > { %v3539_v54 = vpop.f32.mrb[74].mxu1  ;;  %v4154_v26 = vshrl.u32 %v4151_v40, 16  ;;  %v4157_v60 = vshll.u32 %v4151_v40, 16  ;;  %v6260_v49 = vld [vmem:[#allocation9 + $0x10] sm:$0xff]  }
 0x489   : > { %v3597_v6 = vmul.f32 %v5965_v4, %v8109_v46  ;;  %v5966_v14 = vadd.f32 %v3539_v54, %v7931_v2  ;;  %v5682_v20 = vpop.f32.mrb[75].mxu1  ;;  %v4164_v19 = vrot.slane %v4162_v59, 1  ;;  %v4167_v22 = vrot.slane %v4165_v11, 2  ;;  %v6259_v4 = vld [vmem:[#allocation9 + $0x8] sm:$0xff]   ;;  %v6261_v59 = vld [vmem:[#allocation9 + $0x18] sm:$0xff]   ;;  %v6262_v11 = vld [vmem:[#allocation9 + $0x20] sm:$0xff]  }
 0x48a   : > { %v4156_v48 = vrot.slane %v4154_v26, 1  ;;  %v4159_v43 = vrot.slane %v4157_v60, 2  ;;  %v6263_v54 = vld [vmem:[#allocation9 + $0x28] sm:$0xff]   ;;  %v6264_v26 = vld [vmem:[#allocation9 + $0x30] sm:$0xff]   ;;  %v6265_v60 = vld [vmem:[#allocation9 + $0x38] sm:$0xff]  }
 0x48b   : > { %v3641_v28 = vadd.f32 %v8118_v50, %v3597_v6  ;;  %v3598_v7 = vmul.f32 %v5966_v14, %v8109_v46  ;;  %v4168_v5 = vor.u32 %v4167_v22, %v4164_v19  ;;  %v8631_v22 = vld [vmem:[#allocation22_spill] sm:$0xff] }
 0x48c   : > { %v4160_v8 = vor.u32 %v4159_v43, %v4156_v48  ;;  %v8633_v48 = vadd.bf16 %v8631_v22, %v8632_v52  ;;  %v8634_v43 = vld [vmem:[#allocation21_spill] sm:$0xff]  ;;  %v8667_v22 = vld [vmem:[#allocation47_spill] sm:$0xff] }
 0x48d   : > { %v3678_v51 = vmax.f32 %v3641_v28, 0.0  ;;  %v3642_v44 = vadd.f32 %v8118_v50, %v3598_v7  ;;  %v8635_v28 = vld [vmem:[#allocation19_spill] sm:$0xff]  ;;  %v8668_v52 = vld [vmem:[#allocation45_spill] sm:$0xff] }
 0x48e   : > { %v3544_v36 = vpop.f32.mrb[76].mxu1  ;;  %v4169_v2 = vsel %vm1457_vm2, %v4160_v8, %v4168_v5  ;;  %v8636_v7 = vadd.bf16 %v8634_v43, %v8635_v28  ;;  %v8670_v43 = vld [vmem:[#allocation46_spill] sm:$0xff]  ;;  %v8671_v28 = vld [vmem:[#allocation44_spill] sm:$0xff] }
 0x48f   : > { %v4215_v37 = vrot.slane %v3678_v51, 2  ;;  %v3679_v1 = vmax.f32 %v3642_v44, 0.0  ;;  %v5967_v63 = vadd.f32 %v3544_v36, %v7934_v10  ;;  %v5685_v39 = vpop.f32.mrb[77].mxu1  ;;  %5728 = vmatpush3.bf16.msra.mxu0 %v4169_v2 }
 0x490   : > { %v3547_v31 = vpop.f32.mrb[78].mxu1  ;;  %5733 = vmatprep.subr.bf16.mxu0 %v6535_v24  ;;  %v5364_v5 = vcombine.low %v8636_v7, %v8633_v48  ;;  %v8669_v48 = vadd.bf16 %v8667_v22, %v8668_v52  ;;  %v8672_v7 = vadd.bf16 %v8670_v43, %v8671_v28 }
 0x491   : > { %v4223_v58 = vadd.f32 %v4215_v37, %v3675_v47  ;;  %v4216_v57 = vrot.slane %v3679_v1, 2  ;;  %v3599_v56 = vmul.f32 %v5967_v63, %v8109_v46  ;;  %v5686_v25 = vpop.f32.mrb[79].mxu1  ;;  %v8637_v1 = vld [vmem:[#allocation26_spill] sm:$0xff]  ;;  %v8638_v63 = vld [vmem:[#allocation24_spill] sm:$0xff]  ;;  %v8641_v31 = vld [vmem:[#allocation23_spill] sm:$0xff] }
 0x492   : > { %5730 = vmatmul.mubr.msk.bf16.vlgmr.msra.gmra.mrb[208].mxu0 %vm3716_vm7, %v8151_v42  ;;  %v8639_v39 = vadd.bf16 %v8637_v1, %v8638_v63  ;;  %v8643_v25 = vld [vmem:[#allocation31_spill] sm:$0xff] }
 0x493   : > { %v4217_v18 = vsel %vm1579_vm4, %v4215_v37, %v4216_v57  ;;  %v3643_v10 = vadd.f32 %v8118_v50, %v3599_v56  ;;  %5735 = vmatprep.mubr.msk.bf16.mxu0 %vm6536_vm5, %v6535_v24 }
 0x494   : > { %v4224_v41 = vadd.f32 %v4217_v18, %v3676_v17  ;;  %v8644_v17 = vld [vmem:[#allocation29_spill] sm:$0xff] }
 0x495   : > { %v3680_v15 = vmax.f32 %v3643_v10, 0.0  ;;  %v8645_v18 = vadd.bf16 %v8643_v25, %v8644_v17  ;;  %v8646_v10 = vld [vmem:[#allocation30_spill] sm:$0xff] }
 0x496   : > { %v4226_v62 = vpack.c.bf16 %v4224_v41, %v4223_v58  ;;  %v3551_v29 = vpop.f32.mrb[164].mxu1  ;;  %v8642_v58 = vadd.bf16 %v8640_v12, %v8641_v31  ;;  %v8648_v41 = vadd.bf16 %v8646_v10, %v8647_v27 }
 0x497   : > { %v4218_v30 = vrot.slane %v3680_v15, 2  ;;  %v5689_v46 = vpop.f32.mrb[165].mxu1 }
 0x498   : > { %v3553_v47 = vpop.f32.mrb[166].mxu1  ;;  %v4229_v53 = vshrl.u32 %v4226_v62, 16  ;;  %v4232_v45 = vshll.u32 %v4226_v62, 16  ;;  %v5368_v15 = vcombine.low %v8648_v41, %v8645_v18 }
 0x499   : > { %v4219_v23 = vsel %vm1579_vm4, %v4216_v57, %v4218_v30  ;;  %v5690_v55 = vpop.f32.mrb[167].mxu1  ;;  %v5366_v57 = vcombine.low %v8642_v58, %v8639_v39  ;;  %v8650_v47 = vld [vmem:[#allocation33_spill] sm:$0xff] }
 0x49a   : > { %v4225_v38 = vadd.f32 %v4219_v23, %v3677_v9  ;;  %v4231_v32 = vrot.slane %v4229_v53, 3  ;;  %v4234_v0 = vrot.slane %v4232_v45, 4  ;;  %v8649_v9 = vld [vmem:[#allocation35_spill] sm:$0xff]  ;;  %v8652_v55 = vld [vmem:[#allocation34_spill] sm:$0xff] }
 0x49b   : > { %v8651_v23 = vadd.bf16 %v8649_v9, %v8650_v47 }
 0x49c   : > { %v4227_v35 = vpack.c.bf16 %v4225_v38, %v4225_v38  ;;  %v4235_v61 = vor.u32 %v4234_v0, %v4231_v32  ;;  %v8653_v38 = vld [vmem:[#allocation32_spill] sm:$0xff]  ;;  %v8656_v32 = vld [vmem:[#allocation37_spill] sm:$0xff] }
 0x49d   : > { %v8654_v53 = vadd.bf16 %v8652_v55, %v8653_v38  ;;  %v6270_v55 = vld [vmem:[#allocation11 + $0x20] sm:$0xff]   ;;  %v6271_v38 = vld [vmem:[#allocation11 + $0x28] sm:$0xff]  }
 0x49e   : > { %v4237_v13 = vshrl.u32 %v4227_v35, 16  ;;  %v4240_v34 = vshll.u32 %v4227_v35, 16  ;;  %v8655_v35 = vld [vmem:[#allocation39_spill] sm:$0xff] }
 0x49f   : > { %v5370_v45 = vcombine.low %v8654_v53, %v8651_v23  ;;  %v8657_v0 = vadd.bf16 %v8655_v35, %v8656_v32  ;;  %v6269_v23 = vld [vmem:[#allocation11 + $0x18] sm:$0xff]  }
 0x4a0   : > { %v4239_v50 = vrot.slane %v4237_v13, 3  ;;  %v4242_v33 = vrot.slane %v4240_v34, 4  ;;  %v8658_v13 = vld [vmem:[#allocation38_spill] sm:$0xff]  ;;  %v8659_v34 = vld [vmem:[#allocation36_spill] sm:$0xff] }
 0x4a1   : > { %v6273_v53 = vld [vmem:[#allocation11 + $0x38] sm:$0xff]  }
 0x4a2   : > { %v4243_v21 = vor.u32 %v4242_v33, %v4239_v50  ;;  %v8660_v50 = vadd.bf16 %v8658_v13, %v8659_v34 }
 0x4a4   : > { %v4244_v40 = vsel %vm3777_vm8, %v4235_v61, %v4243_v21  ;;  %v5372_v33 = vcombine.low %v8660_v50, %v8657_v0  ;;  %v8661_v61 = vld [vmem:[#allocation43_spill] sm:$0xff]  ;;  %v8662_v21 = vld [vmem:[#allocation41_spill] sm:$0xff] }
 0x4a5   : > { %5734 = vmatpush3.bf16.msra.mxu0 %v4244_v40  ;;  %v8664_v40 = vld [vmem:[#allocation42_spill] sm:$0xff] }
 0x4a6   : > { %5739 = vmatprep.subr.bf16.mxu0 %v6258_v16 }
 0x4a8   : > { %5736 = vmatmul.mubr.msk.bf16.vlgmr.msra.gmra.mrb[212].mxu0 %vm3716_vm7, %v8151_v42 }
 0x4a9   : > { %5740 = vmatpush3.bf16.msra.mxu0 %v6258_v16  ;;  %v8663_v16 = vadd.bf16 %v8661_v61, %v8662_v21 }
 0x4aa   : > { %5741 = vmatprep.subr.bf16.mxu0 %v6259_v4 }
 0x4ad   : > { %5742 = vmatpush3.bf16.msra.mxu0 %v6259_v4  ;;  %v8665_v4 = vld [vmem:[#allocation40_spill] sm:$0xff] }
 0x4ae   : > { %5743 = vmatprep.subr.bf16.mxu0 %v6260_v49 }
 0x4b1   : > { %5744 = vmatpush3.bf16.msra.mxu0 %v6260_v49  ;;  %v8666_v49 = vadd.bf16 %v8664_v40, %v8665_v4 }
 0x4b2   : > { %5745 = vmatprep.subr.bf16.mxu0 %v6261_v59 }
 0x4b5   : > { %5746 = vmatpush3.bf16.msra.mxu0 %v6261_v59  ;;  %v5374_v59 = vcombine.low %v8666_v49, %v8663_v16 }
 0x4b6   : > { %5747 = vmatprep.subr.bf16.mxu0 %v6262_v11 }
 0x4b9   : > { %5748 = vmatpush3.bf16.msra.mxu0 %v6262_v11 }
 0x4ba   : > { %5749 = vmatprep.subr.bf16.mxu0 %v6263_v54 }
 0x4bd   : > { %5750 = vmatpush3.bf16.msra.mxu0 %v6263_v54 }
 0x4be   : > { %5751 = vmatprep.subr.bf16.mxu0 %v6264_v26 }
 0x4c1   : > { %5752 = vmatpush3.bf16.msra.mxu0 %v6264_v26 }
 0x4c2   : > { %5753 = vmatprep.subr.bf16.mxu0 %v6265_v60 }
 0x4c5   : > { %5754 = vmatpush3.bf16.msra.mxu0 %v6265_v60 }
 0x4c6   : > { %5763 = vmatprep.subr.bf16.mxu0 %v6535_v24 }
 0x4fb   : > { %v3754_v6 = vpop.f32.mrb[184].mxu0 }
 0x4fc   : > { %v5695_v14 = vpop.f32.mrb[185].mxu0  ;;  %v3760_v51 = vpack.c.bf16 %v3754_v6, %v3754_v6 }
 0x4fd   : > { %v3757_v20 = vpop.f32.mrb[186].mxu0 }
 0x4fe   : > { %v5696_v19 = vpop.f32.mrb[187].mxu0 }
 0x50d   : > { %v3830_v8 = vpop.f32.mrb[188].mxu0 }
 0x50e   : > { %v3836_v44 = vpack.c.bf16 %v3830_v8, %v3830_v8  ;;  %v5701_v3 = vpop.f32.mrb[189].mxu0  ;;  %v5376_v8 = vcombine.low %v8672_v7, %v8669_v48 }
 0x50f   : > { %v3833_v36 = vpop.f32.mrb[190].mxu0 }
 0x510   : > { %v4288_v2 = vrot.slane %v3836_v44, 4  ;;  %v5702_v37 = vpop.f32.mrb[191].mxu0 }
 0x512   : > { %v4298_v56 = vsel %vm4295_vm9, %v3760_v51, %v4288_v2  ;;  %v8673_v51 = vld [vmem:[#allocation27_spill] sm:$0xff] }
 0x513   : > { %5755 = vmatprep.mubr.bf16.mxu0 %v4298_v56 }
 0x51d   : > { %v3905_v62 = vpop.f32.mrb[192].mxu0 }
 0x51e   : > { %v5707_v29 = vpop.f32.mrb[193].mxu0  ;;  %v3911_v54 = vpack.c.bf16 %v3905_v62, %v3905_v62 }
 0x51f   : > { %v3908_v30 = vpop.f32.mrb[194].mxu0 }
 0x520   : > { %v5708_v46 = vpop.f32.mrb[195].mxu0 }
 0x533   : > { %v3980_v11 = vpop.f32.mrb[196].mxu0 }
 0x534   : > { %v3986_v26 = vpack.c.bf16 %v3980_v11, %v3980_v11  ;;  %v5713_v60 = vpop.f32.mrb[197].mxu0 }
 0x535   : > { %v3983_v6 = vpop.f32.mrb[198].mxu0 }
 0x536   : > { %v4290_v14 = vrot.slane %v3986_v26, 4  ;;  %v5714_v20 = vpop.f32.mrb[199].mxu0 }
 0x538   : > { %v4302_v19 = vsel %vm4295_vm9, %v3911_v54, %v4290_v14 }
 0x539   : > { %5756 = vmatmul.mubr.bf16.vlgmr.msra.gmra.mrb[216].mxu0 %v4302_v19 }
 0x53a   : > { %5764 = vmatpush3.bf16.msra.mxu0 %v8673_v51 }
 0x53b   : > { %5769 = vmatprep.subr.bf16.mxu0 %v6535_v24 }
 0x543   : > { %v4055_v44 = vpop.f32.mrb[200].mxu0 }
 0x544   : > { %v5719_v3 = vpop.f32.mrb[201].mxu0  ;;  %v4061_v1 = vpack.c.bf16 %v4055_v44, %v4055_v44 }
 0x545   : > { %v4058_v36 = vpop.f32.mrb[202].mxu0 }
 0x546   : > { %v5720_v2 = vpop.f32.mrb[203].mxu0 }
 0x555   : > { %v4130_v37 = vpop.f32.mrb[204].mxu0 }
 0x556   : > { %v4136_v63 = vpack.c.bf16 %v4130_v37, %v4130_v37  ;;  %v5725_v39 = vpop.f32.mrb[205].mxu0 }
 0x557   : > { %v4133_v12 = vpop.f32.mrb[206].mxu0 }
 0x558   : > { %v4292_v31 = vrot.slane %v4136_v63, 4  ;;  %v5726_v58 = vpop.f32.mrb[207].mxu0 }
 0x55a   : > { %v4306_v56 = vsel %vm4295_vm9, %v4061_v1, %v4292_v31 }
 0x55b   : > { %5759 = vmatprep.mubr.bf16.mxu0 %v4306_v56 }
 0x565   : > { %v4205_v25 = vpop.f32.mrb[208].mxu0 }
 0x566   : > { %v5731_v17 = vpop.f32.mrb[209].mxu0  ;;  %v4211_v30 = vpack.c.bf16 %v4205_v25, %v4205_v25 }
 0x567   : > { %v4208_v18 = vpop.f32.mrb[210].mxu0 }
 0x568   : > { %v5732_v10 = vpop.f32.mrb[211].mxu0 }
 0x57b   : > { %v4280_v27 = vpop.f32.mrb[212].mxu0 }
 0x57c   : > { %v4286_v41 = vpack.c.bf16 %v4280_v27, %v4280_v27  ;;  %v5737_v62 = vpop.f32.mrb[213].mxu0 }
 0x57d   : > { %v4283_v29 = vpop.f32.mrb[214].mxu0 }
 0x57e   : > { %v4294_v46 = vrot.slane %v4286_v41, 4  ;;  %v5738_v9 = vpop.f32.mrb[215].mxu0 }
 0x580   : > { %v4310_v47 = vsel %vm4295_vm9, %v4211_v30, %v4294_v46 }
 0x581   : > { %5760 = vmatmul.mubr.bf16.gmra.mrb[220].mxu0 %v4310_v47 }
 0x582   : > { %5765 = vmatprep.mubr.msk.bf16.mxu0 %vm6536_vm5, %v6535_v24 }
 0x589   : > { %5766 = vmatmul.mubr.msk.bf16.vlgmr.msra.gmra.mrb[224].mxu0 %vm3716_vm7, %v8151_v42 }
 0x58a   : > { %5770 = vmatpush3.bf16.msra.mxu0 %v5364_v5  ;;  %5771 = vmatprep.mubr.msk.bf16.mxu0 %vm6536_vm5, %v6535_v24  ;;  %v6266_v5 = vld [vmem:[#allocation11] sm:$0xff]  }
 0x58b   : > { %5775 = vmatprep.subr.bf16.mxu0 %v6535_v24 }
 0x591   : > { %5772 = vmatmul.mubr.msk.bf16.vlgmr.msra.gmra.mrb[228].mxu0 %vm3716_vm7, %v8151_v42 }
 0x592   : > { %5776 = vmatpush3.bf16.msra.mxu0 %v5366_v57  ;;  %5777 = vmatprep.mubr.msk.bf16.mxu0 %vm6536_vm5, %v6535_v24  ;;  %v6267_v57 = vld [vmem:[#allocation11 + $0x8] sm:$0xff]  }
 0x593   : > { %5781 = vmatprep.subr.bf16.mxu0 %v6535_v24 }
 0x599   : > { %5778 = vmatmul.mubr.msk.bf16.vlgmr.msra.gmra.mrb[232].mxu0 %vm3716_vm7, %v8151_v42 }
 0x59a   : > { %5782 = vmatpush3.bf16.msra.mxu0 %v5368_v15  ;;  %5783 = vmatprep.mubr.msk.bf16.mxu0 %vm6536_vm5, %v6535_v24  ;;  %v6268_v15 = vld [vmem:[#allocation11 + $0x10] sm:$0xff]  }
 0x59b   : > { %5787 = vmatprep.subr.bf16.mxu0 %v6535_v24 }
 0x5a1   : > { %5784 = vmatmul.mubr.msk.bf16.vlgmr.msra.gmra.mrb[236].mxu0 %vm3716_vm7, %v8151_v42 }
 0x5a2   : > { %5788 = vmatpush3.bf16.msra.mxu0 %v5370_v45  ;;  %5789 = vmatprep.mubr.msk.bf16.mxu0 %vm6536_vm5, %v6535_v24 }
 0x5a3   : > { %5793 = vmatprep.subr.bf16.mxu0 %v6535_v24 }
 0x5a9   : > { %5790 = vmatmul.mubr.msk.bf16.vlgmr.msra.gmra.mrb[240].mxu0 %vm3716_vm7, %v8151_v42 }
 0x5aa   : > { %5794 = vmatpush3.bf16.msra.mxu0 %v5372_v33  ;;  %5795 = vmatprep.mubr.msk.bf16.mxu0 %vm6536_vm5, %v6535_v24 }
 0x5ab   : > { %5799 = vmatprep.subr.bf16.mxu0 %v6535_v24 }
 0x5b1   : > { %5796 = vmatmul.mubr.msk.bf16.vlgmr.msra.gmra.mrb[244].mxu0 %vm3716_vm7, %v8151_v42 }
 0x5b2   : > { %5800 = vmatpush3.bf16.msra.mxu0 %v5374_v59  ;;  %5801 = vmatprep.mubr.msk.bf16.mxu0 %vm6536_vm5, %v6535_v24 }
 0x5b3   : > { %5805 = vmatprep.subr.bf16.mxu0 %v6535_v24 }
 0x5b9   : > { %5802 = vmatmul.mubr.msk.bf16.vlgmr.msra.gmra.mrb[248].mxu0 %vm3716_vm7, %v8151_v42 }
 0x5ba   : > { %5806 = vmatpush3.bf16.msra.mxu0 %v5376_v8  ;;  %5807 = vmatprep.mubr.msk.bf16.mxu0 %vm6536_vm5, %v6535_v24  ;;  %v6272_v24 = vld [vmem:[#allocation11 + $0x30] sm:$0xff]  }
 0x5bb   : > { %5811 = vmatprep.subr.bf16.mxu0 %v6266_v5 }
 0x5c1   : > { %5808 = vmatmul.mubr.msk.bf16.vlgmr.msra.gmra.mrb[252].mxu0 %vm3716_vm7, %v8151_v42 }
 0x5c2   : > { %5812 = vmatpush3.bf16.msra.mxu0 %v6266_v5  ;;  %v5360_v5 = vld [vmem:[%s8674_s22] ss:$0 sm:$0xff] }
 0x5c3   : > { %5813 = vmatprep.subr.bf16.mxu0 %v6267_v57 }
 0x5c6   : > { %5814 = vmatpush3.bf16.msra.mxu0 %v6267_v57  ;;  %v5386_v57 = vld [vmem:[%s8675_s29] ss:$0 sm:$0xff]  ;;  %s8433_s29 = scalar_lea.hbm %s8678_s21, %s5410_s28 }
 0x5c7   : > { %5815 = vmatprep.subr.bf16.mxu0 %v6268_v15 }
 0x5ca   : > { %5816 = vmatpush3.bf16.msra.mxu0 %v6268_v15 }
 0x5cb   : > { %5817 = vmatprep.subr.bf16.mxu0 %v6269_v23 }
 0x5ce   : > { %5818 = vmatpush3.bf16.msra.mxu0 %v6269_v23  ;;  %v5361_v23 = vld [vmem:[%s8676_s26] ss:$0 sm:$0xff]  ;;  %s6455_s26 = sshll.u32 %s6537_s23, 4  ;;  %s6456_s26 = int_to_ptr.vmem [resolvable:$false] %s6455_s26 }
 0x5cf   : > { %5819 = vmatprep.subr.bf16.mxu0 %v6270_v55  ;;  %s6457_s8 = scalar_lea.vmem %s6456_s26, 1024  ;;  %p6458_p12 = scmp.lt.s32.totalorder %s8428_s27, %s6456_s26 }
 0x5d0   : > { %p6459_p1 = scmp.lt.s32.totalorder %s6457_s8, %s6451_s17 }
 0x5d2   : > { %5820 = vmatpush3.bf16.msra.mxu0 %v6270_v55  ;;  %p6460_p2 = por %p6459_p1, %p6458_p12 }
 0x5d3   : > { %5821 = vmatprep.subr.bf16.mxu0 %v6271_v38 }
 0x5d4   : > { %p6461_p13 = pnand %p6460_p2, %p6454_p7 }
 0x5d6   : > { %5822 = vmatpush3.bf16.msra.mxu0 %v6271_v38 }
 0x5d7   : > { %5823 = vmatprep.subr.bf16.mxu0 %v6272_v24 }
 0x5da   : > { %5824 = vmatpush3.bf16.msra.mxu0 %v6272_v24  ;;  %v5387_v24 = vld [vmem:[%s8677_s25] ss:$0 sm:$0xff] }
 0x5db   : > { %5825 = vmatprep.subr.bf16.mxu0 %v6273_v53 }
 0x5de   : > { %5826 = vmatpush3.bf16.msra.mxu0 %v6273_v53 }
 0x60c   : > { %v5757_v42 = vpop.f32.mrb[216].mxu0 }
 0x60d   : > { %v8384_v45 = vpop.f32.mrb[217].mxu0  ;;  %v4450_v15 = vmul.f32 %v5757_v42, %v5360_v5 }
 0x60e   : > { %v8386_v35 = vpop.f32.mrb[218].mxu0  ;;  %v4448_v55 = vmul.f32 %v5360_v5, %v8384_v45 }
 0x60f   : > { %v8388_v32 = vpop.f32.mrb[219].mxu0  ;;  %v4451_v53 = vmul.f32 %v8386_v35, %v5360_v5 }
 0x654   : > { %v8390_v0 = vpop.f32.mrb[220].mxu0 }
 0x655   : > { %v8392_v13 = vpop.f32.mrb[221].mxu0 }
 0x656   : > { %v8394_v34 = vpop.f32.mrb[222].mxu0 }
 0x657   : > { %v8396_v50 = vpop.f32.mrb[223].mxu0 }
 0x65c   : > { %v4513_v33 = vpop.f32.mrb[224].mxu0 }
 0x65d   : > { %v5767_v61 = vpop.f32.mrb[225].mxu0  ;;  %v4519_v11 = vpack.c.bf16 %v4513_v33, %v4513_v33 }
 0x65e   : > { %v4516_v21 = vpop.f32.mrb[226].mxu0 }
 0x65f   : > { %v5768_v16 = vpop.f32.mrb[227].mxu0  ;;  %v4449_v21 = vmul.f32 %v5360_v5, %v8388_v32 }
 0x664   : > { %v4562_v40 = vpop.f32.mrb[228].mxu0 }
 0x665   : > { %v4568_v4 = vpack.c.bf16 %v4562_v40, %v4562_v40  ;;  %v5773_v49 = vpop.f32.mrb[229].mxu0  ;;  %v4465_v40 = vadd.f32 %v5361_v23, %v4450_v15 }
 0x666   : > { %v4565_v59 = vpop.f32.mrb[230].mxu0 }
 0x667   : > { %v4864_v54 = vrot.slane %v4568_v4, 4  ;;  %v5774_v26 = vpop.f32.mrb[231].mxu0 }
 0x668   : > { %v4466_v26 = vadd.f32 %v5361_v23, %v4451_v53 }
 0x669   : > { %v4873_v60 = vsel %vm4295_vm9, %v4519_v11, %v4864_v54  ;;  %v4463_v11 = vadd.f32 %v5361_v23, %v4448_v55 }
 0x66a   : > { %5827 = vmatprep.mubr.bf16.mxu0 %v4873_v60 }
 0x66c   : > { %v4611_v6 = vpop.f32.mrb[232].mxu0 }
 0x66d   : > { %v5779_v14 = vpop.f32.mrb[233].mxu0  ;;  %v4617_v28 = vpack.c.bf16 %v4611_v6, %v4611_v6 }
 0x66e   : > { %v4614_v20 = vpop.f32.mrb[234].mxu0  ;;  %v4464_v14 = vadd.f32 %v5361_v23, %v4449_v21 }
 0x66f   : > { %v5780_v19 = vpop.f32.mrb[235].mxu0 }
 0x674   : > { %v4660_v22 = vpop.f32.mrb[236].mxu0 }
 0x675   : > { %v4666_v52 = vpack.c.bf16 %v4660_v22, %v4660_v22  ;;  %v5785_v48 = vpop.f32.mrb[237].mxu0 }
 0x676   : > { %v4663_v43 = vpop.f32.mrb[238].mxu0 }
 0x677   : > { %v4866_v7 = vrot.slane %v4666_v52, 4  ;;  %v5786_v8 = vpop.f32.mrb[239].mxu0 }
 0x678   : > { %v4454_v8 = vmul.f32 %v8390_v0, %v5360_v5 }
 0x679   : > { %v4877_v51 = vsel %vm4295_vm9, %v4617_v28, %v4866_v7 }
 0x67a   : > { %5828 = vmatmul.mubr.bf16.vlgmr.msra.gmra.mrb[0].mxu0 %v4877_v51  ;;  %v4452_v51 = vmul.f32 %v5360_v5, %v8392_v13 }
 0x67c   : > { %v4709_v44 = vpop.f32.mrb[240].mxu0 }
 0x67d   : > { %v5791_v3 = vpop.f32.mrb[241].mxu0  ;;  %v4715_v12 = vpack.c.bf16 %v4709_v44, %v4709_v44 }
 0x67e   : > { %v4712_v36 = vpop.f32.mrb[242].mxu0  ;;  %v4455_v3 = vmul.f32 %v8394_v34, %v5360_v5 }
 0x67f   : > { %v5792_v2 = vpop.f32.mrb[243].mxu0 }
 0x684   : > { %v4758_v37 = vpop.f32.mrb[244].mxu0 }
 0x685   : > { %v4764_v1 = vpack.c.bf16 %v4758_v37, %v4758_v37  ;;  %v5797_v63 = vpop.f32.mrb[245].mxu0  ;;  %v4453_v37 = vmul.f32 %v5360_v5, %v8396_v50 }
 0x686   : > { %v4761_v39 = vpop.f32.mrb[246].mxu0 }
 0x687   : > { %v4868_v31 = vrot.slane %v4764_v1, 4  ;;  %v5798_v58 = vpop.f32.mrb[247].mxu0  ;;  %v4469_v39 = vadd.f32 %v5361_v23, %v4454_v8  ;;  %v4468_v34 = vadd.f32 %v5361_v23, %v4453_v37 }
 0x689   : > { %v4881_v56 = vsel %vm4295_vm9, %v4715_v12, %v4868_v31 }
 0x68a   : > { %5831 = vmatprep.mubr.bf16.mxu0 %v4881_v56  ;;  %v4467_v56 = vadd.f32 %v5361_v23, %v4452_v51 }
 0x68c   : > { %v4807_v25 = vpop.f32.mrb[248].mxu0 }
 0x68d   : > { %v5803_v17 = vpop.f32.mrb[249].mxu0  ;;  %v4813_v30 = vpack.c.bf16 %v4807_v25, %v4807_v25 }
 0x68e   : > { %v4810_v18 = vpop.f32.mrb[250].mxu0  ;;  %v4470_v17 = vadd.f32 %v5361_v23, %v4455_v3 }
 0x68f   : > { %v5804_v10 = vpop.f32.mrb[251].mxu0 }
 0x694   : > { %v4856_v27 = vpop.f32.mrb[252].mxu0 }
 0x695   : > { %v4862_v41 = vpack.c.bf16 %v4856_v27, %v4856_v27  ;;  %v5809_v62 = vpop.f32.mrb[253].mxu0 }
 0x696   : > { %v4859_v29 = vpop.f32.mrb[254].mxu0 }
 0x697   : > { %v4870_v46 = vrot.slane %v4862_v41, 4  ;;  %v5810_v9 = vpop.f32.mrb[255].mxu0 }
 0x699   : > { %v4885_v47 = vsel %vm4295_vm9, %v4813_v30, %v4870_v46 }
 0x69a   : > { %5832 = vmatmul.mubr.bf16.gmra.mrb[4].mxu0 %v4885_v47 }
 0x74d   : > { %v5829_v38 = vpop.f32.mrb[0].mxu0 }
 0x74e   : > { %v5025_v33 = vmul.f32 %v5829_v38, %v5386_v57  ;;  %v4985_v61 = vpop.f32.mrb[1].mxu0 }
 0x74f   : > { %v5023_v16 = vmul.f32 %v5386_v57, %v4985_v61  ;;  %v5830_v42 = vpop.f32.mrb[2].mxu0 }
 0x750   : > { %v5040_v4 = vadd.f32 %v5387_v24, %v5025_v33  ;;  %v5026_v49 = vmul.f32 %v5830_v42, %v5386_v57  ;;  %v4988_v59 = vpop.f32.mrb[3].mxu0 }
 0x751   : > { %v5038_v45 = vadd.f32 %v5387_v24, %v5023_v16  ;;  %v5024_v54 = vmul.f32 %v5386_v57, %v4988_v59 }
 0x752   : > { %v5048_v60 = vadd.f32 %v5040_v4, %v4465_v40  ;;  %v5041_v6 = vadd.f32 %v5387_v24, %v5026_v49 }
 0x753   : > { %v5046_v20 = vadd.f32 %v5038_v45, %v4463_v11  ;;  %v5039_v35 = vadd.f32 %v5387_v24, %v5024_v54 }
 0x754   : > { %v5049_v19 = vadd.f32 %v5041_v6, %v4466_v26  ;;  %v5056_v32 = vmax.f32 %v5048_v60, 0.0 }
 0x755   : > { %v5047_v22 = vadd.f32 %v5039_v35, %v4464_v14  ;;  %v5054_v48 = vmax.f32 %v5046_v20, 0.0 }
 0x756   : > { %v5057_v52 = vmax.f32 %v5049_v19, 0.0 }
 0x757   : > { %v5055_v43 = vmax.f32 %v5047_v22, 0.0 }
 0x758   : > { %v5419_v28 = vpack.c.bf16 %v5057_v52, %v5056_v32 }
 0x759   : > { %v5414_v7 = vpack.c.bf16 %v5055_v43, %v5054_v48 }
 0x75a   : > { %5431 = vst [vmem:[%s8418_s14 + $0x8] sm:$0xff] %v5419_v28  }
 0x75b   : > { %5415 = vst [vmem:[%s8418_s14] sm:$0xff] %v5414_v7  }
 0x76d   : > { %v5833_v44 = vpop.f32.mrb[4].mxu0 }
 0x76e   : > { %v5029_v36 = vmul.f32 %v5833_v44, %v5386_v57  ;;  %v5001_v2 = vpop.f32.mrb[5].mxu0 }
 0x76f   : > { %v5027_v1 = vmul.f32 %v5386_v57, %v5001_v2  ;;  %v5834_v63 = vpop.f32.mrb[6].mxu0 }
 0x770   : > { %v5044_v12 = vadd.f32 %v5387_v24, %v5029_v36  ;;  %v5030_v31 = vmul.f32 %v5834_v63, %v5386_v57  ;;  %v5004_v58 = vpop.f32.mrb[7].mxu0 }
 0x771   : > { %v5042_v25 = vadd.f32 %v5387_v24, %v5027_v1  ;;  %v5028_v0 = vmul.f32 %v5386_v57, %v5004_v58 }
 0x772   : > { %v5052_v13 = vadd.f32 %v5044_v12, %v4469_v39  ;;  %v5045_v18 = vadd.f32 %v5387_v24, %v5030_v31 }
 0x773   : > { %v5050_v10 = vadd.f32 %v5042_v25, %v4467_v56  ;;  %v5043_v50 = vadd.f32 %v5387_v24, %v5028_v0 }
 0x774   : > { %v5053_v27 = vadd.f32 %v5045_v18, %v4470_v17  ;;  %v5060_v62 = vmax.f32 %v5052_v13, 0.0 }
 0x775   : > { %v5051_v41 = vadd.f32 %v5043_v50, %v4468_v34  ;;  %v5058_v30 = vmax.f32 %v5050_v10, 0.0 }
 0x776   : > { %v5061_v29 = vmax.f32 %v5053_v27, 0.0 }
 0x777   : > { %v5059_v46 = vmax.f32 %v5051_v41, 0.0 }
 0x778   : > { %v5429_v9 = vpack.c.bf16 %v5061_v29, %v5060_v62 }
 0x779   : > { %v5424_v47 = vpack.c.bf16 %v5059_v46, %v5058_v30 }
 0x77a   : > { %5433 = vst [vmem:[%s8418_s14 + $0x18] sm:$0xff] %v5429_v9  }
 0x77b   : > { %5432 = vst [vmem:[%s8418_s14 + $0x10] sm:$0xff] %v5424_v47  }
 0x77c   : > { %6464 = shalt.err (!%p6461_p13)
}
 0x77d   : > { %s6465_s24 = scalar_lea.hbm %s8433_s29, 512  ;;  %s6469_s14 = scalar_lea.hbm %s8678_s21, 1024 }
 0x77e   : > { %p6466_p9 = scmp.ne.s32.totalorder %s8433_s29, %s6465_s24  ;;  %p6470_p4 = scmp.lt.u32.totalorder %s8433_s29, %s8678_s21 }
 0x77f   : > { %p6471_p8 = scmp.lt.u32.totalorder %s6469_s14, %s6465_s24  ;;  %p6473_p3 = scmp.lt.u32.totalorder %s6465_s24, %s8433_s29 }
 0x780   : > { %p6467_p0 = pnand %p6466_p9, %p6786_p10 }
 0x781   : > { %p6472_p6 = por %p6471_p8, %p6470_p4 }
 0x782   : > { %p6468_p11 = pneg %p6467_p0 }
 0x783   : > { %p6474_p5 = por %p6473_p3, %p6472_p6 }
 0x785   : > { %p6475_p7 = pnand %p6474_p5, %p6468_p11 }
 0x787   : > { %6478 = shalt.err (!%p6475_p7)
}
 0x788   : > { %s6538_s19 = smov 64   ;;  %s6539_s17 = smov 4  }
 0x789   : > { %6086 = dma.vmem_to_hbm [thread:$0]  (%p6786_p10), %s8428_s27, 512, %s8433_s29, %s5103_s20, %s6538_s19, %s6538_s19, %s6539_s17  }
 0x78a PF: > { %s8679_s23 = sld [smem:[#allocation17_spill]]  ;;  %s8680_s26 = sld [smem:[#allocation18_spill]] }
 0x78b   : > { %p8682_p1 = scmp.ge.s32.totalorder %s6525_s16, 2 }
 0x790   : > { %s5131_s8 = sand.u32 1, %s8679_s23   ;;  %p8681_p12 = scmp.ne.s32.totalorder %s8680_s26, 0 }
 0x791   : > { %s5132_s24 = scalar_lea.sflag [#allocation5], %s5131_s8 }
 0x792   : > { %p6106_p2 = pnand %p8682_p1, %p8681_p12 }
 0x794   : > { %6508 = dma.done.wait (!%p6106_p2), %s5132_s24, 512  }
 0x795   : > { %6510 = vsyncadd (!%p6106_p2), %s5132_s24, 4294966784  ;;  %p29_p13 = scmp.ge.s32.totalorder %s6776_s13, 4   ;;  %s8683_s29 = smov %s6517_s30 }
 0x796   : > { %s8684_s30 = smov %s6521_s15  ;;  %s8685_s15 = smov %s6792_s18 }
 0x797   : > { %s8686_s16 = smov %s6776_s13  ;;  %31 = sbr.rel (!%p29_p13) target bundleno = 14 (0xe), region = 137 }
 0x79e   :  { %5137 = vsyncpa [#allocation4], 1 }
 0x79f   :  { %5139 = vsyncpa [#allocation4 + $0x1], 1 }
 0x7a0   :  { %5140 = vsyncpa [#allocation7], 1 }
 0x7a1   :  { %5141 = vsyncpa [#allocation10], 1 }
 0x7a2   :  { %5142 = vsyncpa [#allocation5], 1 }
 0x7a3   :  { %5144 = vsyncpa [#allocation5 + $0x1], 1 }

</bundles_post_ra>
